<compile_context>
chip_gen: v6e
topology: v6e:2x2x1
jax: 0.10.0
libtpu: 0.0.40
codegen_flags: <defaults>
</compile_context>

<pallas_src>
import functools

import jax
import jax.numpy as jnp
from jax.experimental import pallas as pl
from jax.experimental.pallas import tpu as pltpu

TB = 128  # batch tile = one lane width of scores per grid step


def _mf_infer_kernel(uidx_ref, iidx_ref, w_ref, h_ref, out_ref, prod_ref, *, tb):
    """Inference tile: gather rows, multiply, reduce -> (1, TB) lane-dense scores.

    uidx_ref, iidx_ref : SMEM int32 refs, full padded batch of indices
    w_ref, h_ref       : VMEM refs, full embedding tables (num_rows, K)
    out_ref            : (1, tb) scores for this tile (batch on lanes)
    prod_ref           : (tb, K) VMEM scratch holding U_emb * V_emb
    """
    t = pl.program_id(0)
    base = t * tb
    for r in range(tb):  # static unrolled scalar-driven row gather
        u = uidx_ref[base + r]
        i = iidx_ref[base + r]
        prod_ref[pl.ds(r, 1), :] = w_ref[pl.ds(u, 1), :] * h_ref[pl.ds(i, 1), :]
    # Single vectorized reduce over the embedding (lane) axis; the store is a
    # full-width (1, TB) unmasked vst.
    out_ref[...] = jnp.sum(prod_ref[...], axis=1)[None, :]


def _mf_train_kernel(uidx_ref, iidx_ref, w_ref, h_ref,
                     out_ref, u_out_ref, v_out_ref, *, tb):
    """Training tile: additionally emits the gathered embeddings (no extra scratch)."""
    t = pl.program_id(0)
    base = t * tb
    for r in range(tb):
        u = uidx_ref[base + r]
        i = iidx_ref[base + r]
        u_out_ref[pl.ds(r, 1), :] = w_ref[pl.ds(u, 1), :]
        v_out_ref[pl.ds(r, 1), :] = h_ref[pl.ds(i, 1), :]
    prod = u_out_ref[...] * v_out_ref[...]          # read back, no prod scratch
    out_ref[...] = jnp.sum(prod, axis=1)[None, :]


def mf_cvib_forward(x, W, H, is_training=False):
    """Pallas implementation of MF_CVIB.forward.

    x: (B, 2) integer array of [user_idx, item_idx] pairs.
    W: (num_users, K) float32 user embedding table.
    H: (num_items, K) float32 item embedding table.
    """
    B = x.shape[0]
    num_users, K = W.shape
    num_items, _ = H.shape

    B_pad = pl.cdiv(B, TB) * TB
    n_tiles = B_pad // TB
    uidx = jnp.zeros((B_pad,), jnp.int32).at[:B].set(x[:, 0].astype(jnp.int32))
    iidx = jnp.zeros((B_pad,), jnp.int32).at[:B].set(x[:, 1].astype(jnp.int32))

    # Full tables resident in VMEM (block == full array, constant index_map).
    table_specs = [
        pl.BlockSpec((num_users, K), lambda t, u, i: (0, 0)),
        pl.BlockSpec((num_items, K), lambda t, u, i: (0, 0)),
    ]
    # Lane-dense scores: (1, B_pad) array, (1, TB) block per grid step.
    score_spec = pl.BlockSpec((1, TB), lambda t, u, i: (0, t))
    score_shape = jax.ShapeDtypeStruct((1, B_pad), jnp.float32)

    compiler_params = pltpu.CompilerParams(
        dimension_semantics=("parallel",))  # tiles independent -> 2 TCs on v7x

    if is_training:
        out, U_emb, V_emb = pl.pallas_call(
            functools.partial(_mf_train_kernel, tb=TB),
            out_shape=(
                score_shape,
                jax.ShapeDtypeStruct((B_pad, K), jnp.float32),
                jax.ShapeDtypeStruct((B_pad, K), jnp.float32),
            ),
            grid_spec=pltpu.PrefetchScalarGridSpec(
                num_scalar_prefetch=2,  # uidx, iidx -> SMEM
                grid=(n_tiles,),
                in_specs=table_specs,
                out_specs=[
                    score_spec,
                    pl.BlockSpec((TB, K), lambda t, u, i: (t, 0)),
                    pl.BlockSpec((TB, K), lambda t, u, i: (t, 0)),
                ],
            ),
            compiler_params=compiler_params,
        )(uidx, iidx, W, H)
        return out[0, :B], U_emb[:B], V_emb[:B]

    out = pl.pallas_call(
        functools.partial(_mf_infer_kernel, tb=TB),
        out_shape=score_shape,
        grid_spec=pltpu.PrefetchScalarGridSpec(
            num_scalar_prefetch=2,
            grid=(n_tiles,),
            in_specs=table_specs,
            out_specs=score_spec,
            scratch_shapes=[pltpu.VMEM((TB, K), jnp.float32)],
        ),
        compiler_params=compiler_params,
    )(uidx, iidx, W, H)
    return out[0, :B]


if __name__ == "__main__":
    key = jax.random.PRNGKey(0)
    k_w, k_h, k_u, k_i = jax.random.split(key, 4)

    num_users, num_items, embedding_k = 10, 12, 4
    B = 16

    # Deterministic parameter init (torch.nn.Embedding default is N(0, 1)).
    W = jax.random.normal(k_w, (num_users, embedding_k), dtype=jnp.float32)
    H = jax.random.normal(k_h, (num_items, embedding_k), dtype=jnp.float32)

    # Deterministic (user, item) index pairs, analogous to x in forward().
    user_idx = jax.random.randint(k_u, (B,), 0, num_users, dtype=jnp.int32)
    item_idx = jax.random.randint(k_i, (B,), 0, num_items, dtype=jnp.int32)
    x = jnp.stack([user_idx, item_idx], axis=1)  # (B, 2)

    # Run the Pallas kernels (inference path + training path).
    out = mf_cvib_forward(x, W, H, is_training=False)
    out_tr, U_emb, V_emb = mf_cvib_forward(x, W, H, is_training=True)
    jax.block_until_ready((out, out_tr, U_emb, V_emb))

    # Pure-JAX reference check of the forward semantics.
    U_ref = W[user_idx]
    V_ref = H[item_idx]
    out_ref = jnp.sum(U_ref * V_ref, axis=1)
    assert out.shape == (B,)
    assert jnp.allclose(out, out_ref, atol=1e-5), "inference output mismatch"
    assert jnp.allclose(out_tr, out_ref, atol=1e-5), "training output mismatch"
    assert jnp.allclose(U_emb, U_ref, atol=1e-5), "U_emb mismatch"
    assert jnp.allclose(V_emb, V_ref, atol=1e-5), "V_emb mismatch"

    print("KERNEL_OK")
</pallas_src>

<mosaic_0001>
module attributes {stable_mosaic.version = 11 : i64} {
  func.func @_mf_infer_kernel(%arg0: i32, %arg1: memref<128xi32, #tpu.memory_space<smem>>, %arg2: memref<128xi32, #tpu.memory_space<smem>>, %arg3: memref<10x4xf32, #tpu.memory_space<vmem>>, %arg4: memref<12x4xf32, #tpu.memory_space<vmem>>, %arg5: memref<1x128xf32, #tpu.memory_space<vmem>>, %arg6: memref<128x4xf32, #tpu.memory_space<vmem>>) attributes {dimension_semantics = [#tpu.dimension_semantics<parallel>], iteration_bounds = array<i64: 1>, scalar_prefetch = 2 : i64, scratch_operands = 1 : i64, tpu.core_type = #tpu.core_type<tc>, window_params = [{pipeline_mode = #tpu.pipeline_mode<synchronous>, transform_indices = @transform_0, window_bounds = array<i64: 10, 4>}, {pipeline_mode = #tpu.pipeline_mode<synchronous>, transform_indices = @transform_1, window_bounds = array<i64: 12, 4>}, {transform_indices = @transform_2, window_bounds = array<i64: 1, 128>}]} {
    %c128_i32 = arith.constant 128 : i32
    %0 = arith.muli %arg0, %c128_i32 : i32
    %c0_i32 = arith.constant 0 : i32
    %1 = arith.addi %0, %c0_i32 : i32
    %2 = arith.index_cast %1 : i32 to index
    %3 = memref.load %arg1[%2] : memref<128xi32, #tpu.memory_space<smem>>
    %c0_i32_0 = arith.constant 0 : i32
    %4 = arith.addi %0, %c0_i32_0 : i32
    %5 = arith.index_cast %4 : i32 to index
    %6 = memref.load %arg2[%5] : memref<128xi32, #tpu.memory_space<smem>>
    %7 = arith.index_cast %3 : i32 to index
    %c0 = arith.constant 0 : index
    %8 = vector.load %arg3[%7, %c0] : memref<10x4xf32, #tpu.memory_space<vmem>>, vector<1x4xf32>
    %9 = arith.index_cast %6 : i32 to index
    %c0_1 = arith.constant 0 : index
    %10 = vector.load %arg4[%9, %c0_1] : memref<12x4xf32, #tpu.memory_space<vmem>>, vector<1x4xf32>
    %11 = arith.mulf %8, %10 : vector<1x4xf32>
    %c0_2 = arith.constant 0 : index
    %c0_3 = arith.constant 0 : index
    %12 = vector.load %arg6[%c0_2, %c0_3] : memref<128x4xf32, #tpu.memory_space<vmem>>, vector<1x4xf32>
    tpu.vector_store %arg6[%c0_2, %c0_3], %11 {strides = array<i32>} : memref<128x4xf32, #tpu.memory_space<vmem>>, vector<1x4xf32>,
    %c1_i32 = arith.constant 1 : i32
    %13 = arith.addi %0, %c1_i32 : i32
    %14 = arith.index_cast %13 : i32 to index
    %15 = memref.load %arg1[%14] : memref<128xi32, #tpu.memory_space<smem>>
    %c1_i32_4 = arith.constant 1 : i32
    %16 = arith.addi %0, %c1_i32_4 : i32
    %17 = arith.index_cast %16 : i32 to index
    %18 = memref.load %arg2[%17] : memref<128xi32, #tpu.memory_space<smem>>
    %19 = arith.index_cast %15 : i32 to index
    %c0_5 = arith.constant 0 : index
    %20 = vector.load %arg3[%19, %c0_5] : memref<10x4xf32, #tpu.memory_space<vmem>>, vector<1x4xf32>
    %21 = arith.index_cast %18 : i32 to index
    %c0_6 = arith.constant 0 : index
    %22 = vector.load %arg4[%21, %c0_6] : memref<12x4xf32, #tpu.memory_space<vmem>>, vector<1x4xf32>
    %23 = arith.mulf %20, %22 : vector<1x4xf32>
    %c1 = arith.constant 1 : index
    %c0_7 = arith.constant 0 : index
    %24 = vector.load %arg6[%c1, %c0_7] : memref<128x4xf32, #tpu.memory_space<vmem>>, vector<1x4xf32>
    tpu.vector_store %arg6[%c1, %c0_7], %23 {strides = array<i32>} : memref<128x4xf32, #tpu.memory_space<vmem>>, vector<1x4xf32>,
    %c2_i32 = arith.constant 2 : i32
    %25 = arith.addi %0, %c2_i32 : i32
    %26 = arith.index_cast %25 : i32 to index
    %27 = memref.load %arg1[%26] : memref<128xi32, #tpu.memory_space<smem>>
    %c2_i32_8 = arith.constant 2 : i32
    %28 = arith.addi %0, %c2_i32_8 : i32
    %29 = arith.index_cast %28 : i32 to index
    %30 = memref.load %arg2[%29] : memref<128xi32, #tpu.memory_space<smem>>
    %31 = arith.index_cast %27 : i32 to index
    %c0_9 = arith.constant 0 : index
    %32 = vector.load %arg3[%31, %c0_9] : memref<10x4xf32, #tpu.memory_space<vmem>>, vector<1x4xf32>
    %33 = arith.index_cast %30 : i32 to index
    %c0_10 = arith.constant 0 : index
    %34 = vector.load %arg4[%33, %c0_10] : memref<12x4xf32, #tpu.memory_space<vmem>>, vector<1x4xf32>
    %35 = arith.mulf %32, %34 : vector<1x4xf32>
    %c2 = arith.constant 2 : index
    %c0_11 = arith.constant 0 : index
    %36 = vector.load %arg6[%c2, %c0_11] : memref<128x4xf32, #tpu.memory_space<vmem>>, vector<1x4xf32>
    tpu.vector_store %arg6[%c2, %c0_11], %35 {strides = array<i32>} : memref<128x4xf32, #tpu.memory_space<vmem>>, vector<1x4xf32>,
    %c3_i32 = arith.constant 3 : i32
    %37 = arith.addi %0, %c3_i32 : i32
    %38 = arith.index_cast %37 : i32 to index
    %39 = memref.load %arg1[%38] : memref<128xi32, #tpu.memory_space<smem>>
    %c3_i32_12 = arith.constant 3 : i32
    %40 = arith.addi %0, %c3_i32_12 : i32
    %41 = arith.index_cast %40 : i32 to index
    %42 = memref.load %arg2[%41] : memref<128xi32, #tpu.memory_space<smem>>
    %43 = arith.index_cast %39 : i32 to index
    %c0_13 = arith.constant 0 : index
    %44 = vector.load %arg3[%43, %c0_13] : memref<10x4xf32, #tpu.memory_space<vmem>>, vector<1x4xf32>
    %45 = arith.index_cast %42 : i32 to index
    %c0_14 = arith.constant 0 : index
    %46 = vector.load %arg4[%45, %c0_14] : memref<12x4xf32, #tpu.memory_space<vmem>>, vector<1x4xf32>
    %47 = arith.mulf %44, %46 : vector<1x4xf32>
    %c3 = arith.constant 3 : index
    %c0_15 = arith.constant 0 : index
    %48 = vector.load %arg6[%c3, %c0_15] : memref<128x4xf32, #tpu.memory_space<vmem>>, vector<1x4xf32>
    tpu.vector_store %arg6[%c3, %c0_15], %47 {strides = array<i32>} : memref<128x4xf32, #tpu.memory_space<vmem>>, vector<1x4xf32>,
    %c4_i32 = arith.constant 4 : i32
    %49 = arith.addi %0, %c4_i32 : i32
    %50 = arith.index_cast %49 : i32 to index
    %51 = memref.load %arg1[%50] : memref<128xi32, #tpu.memory_space<smem>>
    %c4_i32_16 = arith.constant 4 : i32
    %52 = arith.addi %0, %c4_i32_16 : i32
    %53 = arith.index_cast %52 : i32 to index
    %54 = memref.load %arg2[%53] : memref<128xi32, #tpu.memory_space<smem>>
    %55 = arith.index_cast %51 : i32 to index
    %c0_17 = arith.constant 0 : index
    %56 = vector.load %arg3[%55, %c0_17] : memref<10x4xf32, #tpu.memory_space<vmem>>, vector<1x4xf32>
    %57 = arith.index_cast %54 : i32 to index
    %c0_18 = arith.constant 0 : index
    %58 = vector.load %arg4[%57, %c0_18] : memref<12x4xf32, #tpu.memory_space<vmem>>, vector<1x4xf32>
    %59 = arith.mulf %56, %58 : vector<1x4xf32>
    %c4 = arith.constant 4 : index
    %c0_19 = arith.constant 0 : index
    %60 = vector.load %arg6[%c4, %c0_19] : memref<128x4xf32, #tpu.memory_space<vmem>>, vector<1x4xf32>
    tpu.vector_store %arg6[%c4, %c0_19], %59 {strides = array<i32>} : memref<128x4xf32, #tpu.memory_space<vmem>>, vector<1x4xf32>,
    %c5_i32 = arith.constant 5 : i32
    %61 = arith.addi %0, %c5_i32 : i32
    %62 = arith.index_cast %61 : i32 to index
    %63 = memref.load %arg1[%62] : memref<128xi32, #tpu.memory_space<smem>>
    %c5_i32_20 = arith.constant 5 : i32
    %64 = arith.addi %0, %c5_i32_20 : i32
    %65 = arith.index_cast %64 : i32 to index
    %66 = memref.load %arg2[%65] : memref<128xi32, #tpu.memory_space<smem>>
    %67 = arith.index_cast %63 : i32 to index
    %c0_21 = arith.constant 0 : index
    %68 = vector.load %arg3[%67, %c0_21] : memref<10x4xf32, #tpu.memory_space<vmem>>, vector<1x4xf32>
    %69 = arith.index_cast %66 : i32 to index
    %c0_22 = arith.constant 0 : index
    %70 = vector.load %arg4[%69, %c0_22] : memref<12x4xf32, #tpu.memory_space<vmem>>, vector<1x4xf32>
    %71 = arith.mulf %68, %70 : vector<1x4xf32>
    %c5 = arith.constant 5 : index
    %c0_23 = arith.constant 0 : index
    %72 = vector.load %arg6[%c5, %c0_23] : memref<128x4xf32, #tpu.memory_space<vmem>>, vector<1x4xf32>
    tpu.vector_store %arg6[%c5, %c0_23], %71 {strides = array<i32>} : memref<128x4xf32, #tpu.memory_space<vmem>>, vector<1x4xf32>,
    %c6_i32 = arith.constant 6 : i32
    %73 = arith.addi %0, %c6_i32 : i32
    %74 = arith.index_cast %73 : i32 to index
    %75 = memref.load %arg1[%74] : memref<128xi32, #tpu.memory_space<smem>>
    %c6_i32_24 = arith.constant 6 : i32
    %76 = arith.addi %0, %c6_i32_24 : i32
    %77 = arith.index_cast %76 : i32 to index
    %78 = memref.load %arg2[%77] : memref<128xi32, #tpu.memory_space<smem>>
    %79 = arith.index_cast %75 : i32 to index
    %c0_25 = arith.constant 0 : index
    %80 = vector.load %arg3[%79, %c0_25] : memref<10x4xf32, #tpu.memory_space<vmem>>, vector<1x4xf32>
    %81 = arith.index_cast %78 : i32 to index
    %c0_26 = arith.constant 0 : index
    %82 = vector.load %arg4[%81, %c0_26] : memref<12x4xf32, #tpu.memory_space<vmem>>, vector<1x4xf32>
    %83 = arith.mulf %80, %82 : vector<1x4xf32>
    %c6 = arith.constant 6 : index
    %c0_27 = arith.constant 0 : index
    %84 = vector.load %arg6[%c6, %c0_27] : memref<128x4xf32, #tpu.memory_space<vmem>>, vector<1x4xf32>
    tpu.vector_store %arg6[%c6, %c0_27], %83 {strides = array<i32>} : memref<128x4xf32, #tpu.memory_space<vmem>>, vector<1x4xf32>,
    %c7_i32 = arith.constant 7 : i32
    %85 = arith.addi %0, %c7_i32 : i32
    %86 = arith.index_cast %85 : i32 to index
    %87 = memref.load %arg1[%86] : memref<128xi32, #tpu.memory_space<smem>>
    %c7_i32_28 = arith.constant 7 : i32
    %88 = arith.addi %0, %c7_i32_28 : i32
    %89 = arith.index_cast %88 : i32 to index
    %90 = memref.load %arg2[%89] : memref<128xi32, #tpu.memory_space<smem>>
    %91 = arith.index_cast %87 : i32 to index
    %c0_29 = arith.constant 0 : index
    %92 = vector.load %arg3[%91, %c0_29] : memref<10x4xf32, #tpu.memory_space<vmem>>, vector<1x4xf32>
    %93 = arith.index_cast %90 : i32 to index
    %c0_30 = arith.constant 0 : index
    %94 = vector.load %arg4[%93, %c0_30] : memref<12x4xf32, #tpu.memory_space<vmem>>, vector<1x4xf32>
    %95 = arith.mulf %92, %94 : vector<1x4xf32>
    %c7 = arith.constant 7 : index
    %c0_31 = arith.constant 0 : index
    %96 = vector.load %arg6[%c7, %c0_31] : memref<128x4xf32, #tpu.memory_space<vmem>>, vector<1x4xf32>
    tpu.vector_store %arg6[%c7, %c0_31], %95 {strides = array<i32>} : memref<128x4xf32, #tpu.memory_space<vmem>>, vector<1x4xf32>,
    %c8_i32 = arith.constant 8 : i32
    %97 = arith.addi %0, %c8_i32 : i32
    %98 = arith.index_cast %97 : i32 to index
    %99 = memref.load %arg1[%98] : memref<128xi32, #tpu.memory_space<smem>>
    %c8_i32_32 = arith.constant 8 : i32
    %100 = arith.addi %0, %c8_i32_32 : i32
    %101 = arith.index_cast %100 : i32 to index
    %102 = memref.load %arg2[%101] : memref<128xi32, #tpu.memory_space<smem>>
    %103 = arith.index_cast %99 : i32 to index
    %c0_33 = arith.constant 0 : index
    %104 = vector.load %arg3[%103, %c0_33] : memref<10x4xf32, #tpu.memory_space<vmem>>, vector<1x4xf32>
    %105 = arith.index_cast %102 : i32 to index
    %c0_34 = arith.constant 0 : index
    %106 = vector.load %arg4[%105, %c0_34] : memref<12x4xf32, #tpu.memory_space<vmem>>, vector<1x4xf32>
    %107 = arith.mulf %104, %106 : vector<1x4xf32>
    %c8 = arith.constant 8 : index
    %c0_35 = arith.constant 0 : index
    %108 = vector.load %arg6[%c8, %c0_35] : memref<128x4xf32, #tpu.memory_space<vmem>>, vector<1x4xf32>
    tpu.vector_store %arg6[%c8, %c0_35], %107 {strides = array<i32>} : memref<128x4xf32, #tpu.memory_space<vmem>>, vector<1x4xf32>,
    %c9_i32 = arith.constant 9 : i32
    %109 = arith.addi %0, %c9_i32 : i32
    %110 = arith.index_cast %109 : i32 to index
    %111 = memref.load %arg1[%110] : memref<128xi32, #tpu.memory_space<smem>>
    %c9_i32_36 = arith.constant 9 : i32
    %112 = arith.addi %0, %c9_i32_36 : i32
    %113 = arith.index_cast %112 : i32 to index
    %114 = memref.load %arg2[%113] : memref<128xi32, #tpu.memory_space<smem>>
    %115 = arith.index_cast %111 : i32 to index
    %c0_37 = arith.constant 0 : index
    %116 = vector.load %arg3[%115, %c0_37] : memref<10x4xf32, #tpu.memory_space<vmem>>, vector<1x4xf32>
    %117 = arith.index_cast %114 : i32 to index
    %c0_38 = arith.constant 0 : index
    %118 = vector.load %arg4[%117, %c0_38] : memref<12x4xf32, #tpu.memory_space<vmem>>, vector<1x4xf32>
    %119 = arith.mulf %116, %118 : vector<1x4xf32>
    %c9 = arith.constant 9 : index
    %c0_39 = arith.constant 0 : index
    %120 = vector.load %arg6[%c9, %c0_39] : memref<128x4xf32, #tpu.memory_space<vmem>>, vector<1x4xf32>
    tpu.vector_store %arg6[%c9, %c0_39], %119 {strides = array<i32>} : memref<128x4xf32, #tpu.memory_space<vmem>>, vector<1x4xf32>,
    %c10_i32 = arith.constant 10 : i32
    %121 = arith.addi %0, %c10_i32 : i32
    %122 = arith.index_cast %121 : i32 to index
    %123 = memref.load %arg1[%122] : memref<128xi32, #tpu.memory_space<smem>>
    %c10_i32_40 = arith.constant 10 : i32
    %124 = arith.addi %0, %c10_i32_40 : i32
    %125 = arith.index_cast %124 : i32 to index
    %126 = memref.load %arg2[%125] : memref<128xi32, #tpu.memory_space<smem>>
    %127 = arith.index_cast %123 : i32 to index
    %c0_41 = arith.constant 0 : index
    %128 = vector.load %arg3[%127, %c0_41] : memref<10x4xf32, #tpu.memory_space<vmem>>, vector<1x4xf32>
    %129 = arith.index_cast %126 : i32 to index
    %c0_42 = arith.constant 0 : index
    %130 = vector.load %arg4[%129, %c0_42] : memref<12x4xf32, #tpu.memory_space<vmem>>, vector<1x4xf32>
    %131 = arith.mulf %128, %130 : vector<1x4xf32>
    %c10 = arith.constant 10 : index
    %c0_43 = arith.constant 0 : index
    %132 = vector.load %arg6[%c10, %c0_43] : memref<128x4xf32, #tpu.memory_space<vmem>>, vector<1x4xf32>
    tpu.vector_store %arg6[%c10, %c0_43], %131 {strides = array<i32>} : memref<128x4xf32, #tpu.memory_space<vmem>>, vector<1x4xf32>,
    %c11_i32 = arith.constant 11 : i32
    %133 = arith.addi %0, %c11_i32 : i32
    %134 = arith.index_cast %133 : i32 to index
    %135 = memref.load %arg1[%134] : memref<128xi32, #tpu.memory_space<smem>>
    %c11_i32_44 = arith.constant 11 : i32
    %136 = arith.addi %0, %c11_i32_44 : i32
    %137 = arith.index_cast %136 : i32 to index
    %138 = memref.load %arg2[%137] : memref<128xi32, #tpu.memory_space<smem>>
    %139 = arith.index_cast %135 : i32 to index
    %c0_45 = arith.constant 0 : index
    %140 = vector.load %arg3[%139, %c0_45] : memref<10x4xf32, #tpu.memory_space<vmem>>, vector<1x4xf32>
    %141 = arith.index_cast %138 : i32 to index
    %c0_46 = arith.constant 0 : index
    %142 = vector.load %arg4[%141, %c0_46] : memref<12x4xf32, #tpu.memory_space<vmem>>, vector<1x4xf32>
    %143 = arith.mulf %140, %142 : vector<1x4xf32>
    %c11 = arith.constant 11 : index
    %c0_47 = arith.constant 0 : index
    %144 = vector.load %arg6[%c11, %c0_47] : memref<128x4xf32, #tpu.memory_space<vmem>>, vector<1x4xf32>
    tpu.vector_store %arg6[%c11, %c0_47], %143 {strides = array<i32>} : memref<128x4xf32, #tpu.memory_space<vmem>>, vector<1x4xf32>,
    %c12_i32 = arith.constant 12 : i32
    %145 = arith.addi %0, %c12_i32 : i32
    %146 = arith.index_cast %145 : i32 to index
    %147 = memref.load %arg1[%146] : memref<128xi32, #tpu.memory_space<smem>>
    %c12_i32_48 = arith.constant 12 : i32
    %148 = arith.addi %0, %c12_i32_48 : i32
    %149 = arith.index_cast %148 : i32 to index
    %150 = memref.load %arg2[%149] : memref<128xi32, #tpu.memory_space<smem>>
    %151 = arith.index_cast %147 : i32 to index
    %c0_49 = arith.constant 0 : index
    %152 = vector.load %arg3[%151, %c0_49] : memref<10x4xf32, #tpu.memory_space<vmem>>, vector<1x4xf32>
    %153 = arith.index_cast %150 : i32 to index
    %c0_50 = arith.constant 0 : index
    %154 = vector.load %arg4[%153, %c0_50] : memref<12x4xf32, #tpu.memory_space<vmem>>, vector<1x4xf32>
    %155 = arith.mulf %152, %154 : vector<1x4xf32>
    %c12 = arith.constant 12 : index
    %c0_51 = arith.constant 0 : index
    %156 = vector.load %arg6[%c12, %c0_51] : memref<128x4xf32, #tpu.memory_space<vmem>>, vector<1x4xf32>
    tpu.vector_store %arg6[%c12, %c0_51], %155 {strides = array<i32>} : memref<128x4xf32, #tpu.memory_space<vmem>>, vector<1x4xf32>,
    %c13_i32 = arith.constant 13 : i32
    %157 = arith.addi %0, %c13_i32 : i32
    %158 = arith.index_cast %157 : i32 to index
    %159 = memref.load %arg1[%158] : memref<128xi32, #tpu.memory_space<smem>>
    %c13_i32_52 = arith.constant 13 : i32
    %160 = arith.addi %0, %c13_i32_52 : i32
    %161 = arith.index_cast %160 : i32 to index
    %162 = memref.load %arg2[%161] : memref<128xi32, #tpu.memory_space<smem>>
    %163 = arith.index_cast %159 : i32 to index
    %c0_53 = arith.constant 0 : index
    %164 = vector.load %arg3[%163, %c0_53] : memref<10x4xf32, #tpu.memory_space<vmem>>, vector<1x4xf32>
    %165 = arith.index_cast %162 : i32 to index
    %c0_54 = arith.constant 0 : index
    %166 = vector.load %arg4[%165, %c0_54] : memref<12x4xf32, #tpu.memory_space<vmem>>, vector<1x4xf32>
    %167 = arith.mulf %164, %166 : vector<1x4xf32>
    %c13 = arith.constant 13 : index
    %c0_55 = arith.constant 0 : index
    %168 = vector.load %arg6[%c13, %c0_55] : memref<128x4xf32, #tpu.memory_space<vmem>>, vector<1x4xf32>
    tpu.vector_store %arg6[%c13, %c0_55], %167 {strides = array<i32>} : memref<128x4xf32, #tpu.memory_space<vmem>>, vector<1x4xf32>,
    %c14_i32 = arith.constant 14 : i32
    %169 = arith.addi %0, %c14_i32 : i32
    %170 = arith.index_cast %169 : i32 to index
    %171 = memref.load %arg1[%170] : memref<128xi32, #tpu.memory_space<smem>>
    %c14_i32_56 = arith.constant 14 : i32
    %172 = arith.addi %0, %c14_i32_56 : i32
    %173 = arith.index_cast %172 : i32 to index
    %174 = memref.load %arg2[%173] : memref<128xi32, #tpu.memory_space<smem>>
    %175 = arith.index_cast %171 : i32 to index
    %c0_57 = arith.constant 0 : index
    %176 = vector.load %arg3[%175, %c0_57] : memref<10x4xf32, #tpu.memory_space<vmem>>, vector<1x4xf32>
    %177 = arith.index_cast %174 : i32 to index
    %c0_58 = arith.constant 0 : index
    %178 = vector.load %arg4[%177, %c0_58] : memref<12x4xf32, #tpu.memory_space<vmem>>, vector<1x4xf32>
    %179 = arith.mulf %176, %178 : vector<1x4xf32>
    %c14 = arith.constant 14 : index
    %c0_59 = arith.constant 0 : index
    %180 = vector.load %arg6[%c14, %c0_59] : memref<128x4xf32, #tpu.memory_space<vmem>>, vector<1x4xf32>
    tpu.vector_store %arg6[%c14, %c0_59], %179 {strides = array<i32>} : memref<128x4xf32, #tpu.memory_space<vmem>>, vector<1x4xf32>,
    %c15_i32 = arith.constant 15 : i32
    %181 = arith.addi %0, %c15_i32 : i32
    %182 = arith.index_cast %181 : i32 to index
    %183 = memref.load %arg1[%182] : memref<128xi32, #tpu.memory_space<smem>>
    %c15_i32_60 = arith.constant 15 : i32
    %184 = arith.addi %0, %c15_i32_60 : i32
    %185 = arith.index_cast %184 : i32 to index
    %186 = memref.load %arg2[%185] : memref<128xi32, #tpu.memory_space<smem>>
    %187 = arith.index_cast %183 : i32 to index
    %c0_61 = arith.constant 0 : index
    %188 = vector.load %arg3[%187, %c0_61] : memref<10x4xf32, #tpu.memory_space<vmem>>, vector<1x4xf32>
    %189 = arith.index_cast %186 : i32 to index
    %c0_62 = arith.constant 0 : index
    %190 = vector.load %arg4[%189, %c0_62] : memref<12x4xf32, #tpu.memory_space<vmem>>, vector<1x4xf32>
    %191 = arith.mulf %188, %190 : vector<1x4xf32>
    %c15 = arith.constant 15 : index
    %c0_63 = arith.constant 0 : index
    %192 = vector.load %arg6[%c15, %c0_63] : memref<128x4xf32, #tpu.memory_space<vmem>>, vector<1x4xf32>
    tpu.vector_store %arg6[%c15, %c0_63], %191 {strides = array<i32>} : memref<128x4xf32, #tpu.memory_space<vmem>>, vector<1x4xf32>,
    %c16_i32 = arith.constant 16 : i32
    %193 = arith.addi %0, %c16_i32 : i32
    %194 = arith.index_cast %193 : i32 to index
    %195 = memref.load %arg1[%194] : memref<128xi32, #tpu.memory_space<smem>>
    %c16_i32_64 = arith.constant 16 : i32
    %196 = arith.addi %0, %c16_i32_64 : i32
    %197 = arith.index_cast %196 : i32 to index
    %198 = memref.load %arg2[%197] : memref<128xi32, #tpu.memory_space<smem>>
    %199 = arith.index_cast %195 : i32 to index
    %c0_65 = arith.constant 0 : index
    %200 = vector.load %arg3[%199, %c0_65] : memref<10x4xf32, #tpu.memory_space<vmem>>, vector<1x4xf32>
    %201 = arith.index_cast %198 : i32 to index
    %c0_66 = arith.constant 0 : index
    %202 = vector.load %arg4[%201, %c0_66] : memref<12x4xf32, #tpu.memory_space<vmem>>, vector<1x4xf32>
    %203 = arith.mulf %200, %202 : vector<1x4xf32>
    %c16 = arith.constant 16 : index
    %c0_67 = arith.constant 0 : index
    %204 = vector.load %arg6[%c16, %c0_67] : memref<128x4xf32, #tpu.memory_space<vmem>>, vector<1x4xf32>
    tpu.vector_store %arg6[%c16, %c0_67], %203 {strides = array<i32>} : memref<128x4xf32, #tpu.memory_space<vmem>>, vector<1x4xf32>,
    %c17_i32 = arith.constant 17 : i32
    %205 = arith.addi %0, %c17_i32 : i32
    %206 = arith.index_cast %205 : i32 to index
    %207 = memref.load %arg1[%206] : memref<128xi32, #tpu.memory_space<smem>>
    %c17_i32_68 = arith.constant 17 : i32
    %208 = arith.addi %0, %c17_i32_68 : i32
    %209 = arith.index_cast %208 : i32 to index
    %210 = memref.load %arg2[%209] : memref<128xi32, #tpu.memory_space<smem>>
    %211 = arith.index_cast %207 : i32 to index
    %c0_69 = arith.constant 0 : index
    %212 = vector.load %arg3[%211, %c0_69] : memref<10x4xf32, #tpu.memory_space<vmem>>, vector<1x4xf32>
    %213 = arith.index_cast %210 : i32 to index
    %c0_70 = arith.constant 0 : index
    %214 = vector.load %arg4[%213, %c0_70] : memref<12x4xf32, #tpu.memory_space<vmem>>, vector<1x4xf32>
    %215 = arith.mulf %212, %214 : vector<1x4xf32>
    %c17 = arith.constant 17 : index
    %c0_71 = arith.constant 0 : index
    %216 = vector.load %arg6[%c17, %c0_71] : memref<128x4xf32, #tpu.memory_space<vmem>>, vector<1x4xf32>
    tpu.vector_store %arg6[%c17, %c0_71], %215 {strides = array<i32>} : memref<128x4xf32, #tpu.memory_space<vmem>>, vector<1x4xf32>,
    %c18_i32 = arith.constant 18 : i32
    %217 = arith.addi %0, %c18_i32 : i32
    %218 = arith.index_cast %217 : i32 to index
    %219 = memref.load %arg1[%218] : memref<128xi32, #tpu.memory_space<smem>>
    %c18_i32_72 = arith.constant 18 : i32
    %220 = arith.addi %0, %c18_i32_72 : i32
    %221 = arith.index_cast %220 : i32 to index
    %222 = memref.load %arg2[%221] : memref<128xi32, #tpu.memory_space<smem>>
    %223 = arith.index_cast %219 : i32 to index
    %c0_73 = arith.constant 0 : index
    %224 = vector.load %arg3[%223, %c0_73] : memref<10x4xf32, #tpu.memory_space<vmem>>, vector<1x4xf32>
    %225 = arith.index_cast %222 : i32 to index
    %c0_74 = arith.constant 0 : index
    %226 = vector.load %arg4[%225, %c0_74] : memref<12x4xf32, #tpu.memory_space<vmem>>, vector<1x4xf32>
    %227 = arith.mulf %224, %226 : vector<1x4xf32>
    %c18 = arith.constant 18 : index
    %c0_75 = arith.constant 0 : index
    %228 = vector.load %arg6[%c18, %c0_75] : memref<128x4xf32, #tpu.memory_space<vmem>>, vector<1x4xf32>
    tpu.vector_store %arg6[%c18, %c0_75], %227 {strides = array<i32>} : memref<128x4xf32, #tpu.memory_space<vmem>>, vector<1x4xf32>,
    %c19_i32 = arith.constant 19 : i32
    %229 = arith.addi %0, %c19_i32 : i32
    %230 = arith.index_cast %229 : i32 to index
    %231 = memref.load %arg1[%230] : memref<128xi32, #tpu.memory_space<smem>>
    %c19_i32_76 = arith.constant 19 : i32
    %232 = arith.addi %0, %c19_i32_76 : i32
    %233 = arith.index_cast %232 : i32 to index
    %234 = memref.load %arg2[%233] : memref<128xi32, #tpu.memory_space<smem>>
    %235 = arith.index_cast %231 : i32 to index
    %c0_77 = arith.constant 0 : index
    %236 = vector.load %arg3[%235, %c0_77] : memref<10x4xf32, #tpu.memory_space<vmem>>, vector<1x4xf32>
    %237 = arith.index_cast %234 : i32 to index
    %c0_78 = arith.constant 0 : index
    %238 = vector.load %arg4[%237, %c0_78] : memref<12x4xf32, #tpu.memory_space<vmem>>, vector<1x4xf32>
    %239 = arith.mulf %236, %238 : vector<1x4xf32>
    %c19 = arith.constant 19 : index
    %c0_79 = arith.constant 0 : index
    %240 = vector.load %arg6[%c19, %c0_79] : memref<128x4xf32, #tpu.memory_space<vmem>>, vector<1x4xf32>
    tpu.vector_store %arg6[%c19, %c0_79], %239 {strides = array<i32>} : memref<128x4xf32, #tpu.memory_space<vmem>>, vector<1x4xf32>,
    %c20_i32 = arith.constant 20 : i32
    %241 = arith.addi %0, %c20_i32 : i32
    %242 = arith.index_cast %241 : i32 to index
    %243 = memref.load %arg1[%242] : memref<128xi32, #tpu.memory_space<smem>>
    %c20_i32_80 = arith.constant 20 : i32
    %244 = arith.addi %0, %c20_i32_80 : i32
    %245 = arith.index_cast %244 : i32 to index
    %246 = memref.load %arg2[%245] : memref<128xi32, #tpu.memory_space<smem>>
    %247 = arith.index_cast %243 : i32 to index
    %c0_81 = arith.constant 0 : index
    %248 = vector.load %arg3[%247, %c0_81] : memref<10x4xf32, #tpu.memory_space<vmem>>, vector<1x4xf32>
    %249 = arith.index_cast %246 : i32 to index
    %c0_82 = arith.constant 0 : index
    %250 = vector.load %arg4[%249, %c0_82] : memref<12x4xf32, #tpu.memory_space<vmem>>, vector<1x4xf32>
    %251 = arith.mulf %248, %250 : vector<1x4xf32>
    %c20 = arith.constant 20 : index
    %c0_83 = arith.constant 0 : index
    %252 = vector.load %arg6[%c20, %c0_83] : memref<128x4xf32, #tpu.memory_space<vmem>>, vector<1x4xf32>
    tpu.vector_store %arg6[%c20, %c0_83], %251 {strides = array<i32>} : memref<128x4xf32, #tpu.memory_space<vmem>>, vector<1x4xf32>,
    %c21_i32 = arith.constant 21 : i32
    %253 = arith.addi %0, %c21_i32 : i32
    %254 = arith.index_cast %253 : i32 to index
    %255 = memref.load %arg1[%254] : memref<128xi32, #tpu.memory_space<smem>>
    %c21_i32_84 = arith.constant 21 : i32
    %256 = arith.addi %0, %c21_i32_84 : i32
    %257 = arith.index_cast %256 : i32 to index
    %258 = memref.load %arg2[%257] : memref<128xi32, #tpu.memory_space<smem>>
    %259 = arith.index_cast %255 : i32 to index
    %c0_85 = arith.constant 0 : index
    %260 = vector.load %arg3[%259, %c0_85] : memref<10x4xf32, #tpu.memory_space<vmem>>, vector<1x4xf32>
    %261 = arith.index_cast %258 : i32 to index
    %c0_86 = arith.constant 0 : index
    %262 = vector.load %arg4[%261, %c0_86] : memref<12x4xf32, #tpu.memory_space<vmem>>, vector<1x4xf32>
    %263 = arith.mulf %260, %262 : vector<1x4xf32>
    %c21 = arith.constant 21 : index
    %c0_87 = arith.constant 0 : index
    %264 = vector.load %arg6[%c21, %c0_87] : memref<128x4xf32, #tpu.memory_space<vmem>>, vector<1x4xf32>
    tpu.vector_store %arg6[%c21, %c0_87], %263 {strides = array<i32>} : memref<128x4xf32, #tpu.memory_space<vmem>>, vector<1x4xf32>,
    %c22_i32 = arith.constant 22 : i32
    %265 = arith.addi %0, %c22_i32 : i32
    %266 = arith.index_cast %265 : i32 to index
    %267 = memref.load %arg1[%266] : memref<128xi32, #tpu.memory_space<smem>>
    %c22_i32_88 = arith.constant 22 : i32
    %268 = arith.addi %0, %c22_i32_88 : i32
    %269 = arith.index_cast %268 : i32 to index
    %270 = memref.load %arg2[%269] : memref<128xi32, #tpu.memory_space<smem>>
    %271 = arith.index_cast %267 : i32 to index
    %c0_89 = arith.constant 0 : index
    %272 = vector.load %arg3[%271, %c0_89] : memref<10x4xf32, #tpu.memory_space<vmem>>, vector<1x4xf32>
    %273 = arith.index_cast %270 : i32 to index
    %c0_90 = arith.constant 0 : index
    %274 = vector.load %arg4[%273, %c0_90] : memref<12x4xf32, #tpu.memory_space<vmem>>, vector<1x4xf32>
    %275 = arith.mulf %272, %274 : vector<1x4xf32>
    %c22 = arith.constant 22 : index
    %c0_91 = arith.constant 0 : index
    %276 = vector.load %arg6[%c22, %c0_91] : memref<128x4xf32, #tpu.memory_space<vmem>>, vector<1x4xf32>
    tpu.vector_store %arg6[%c22, %c0_91], %275 {strides = array<i32>} : memref<128x4xf32, #tpu.memory_space<vmem>>, vector<1x4xf32>,
    %c23_i32 = arith.constant 23 : i32
    %277 = arith.addi %0, %c23_i32 : i32
    %278 = arith.index_cast %277 : i32 to index
    %279 = memref.load %arg1[%278] : memref<128xi32, #tpu.memory_space<smem>>
    %c23_i32_92 = arith.constant 23 : i32
    %280 = arith.addi %0, %c23_i32_92 : i32
    %281 = arith.index_cast %280 : i32 to index
    %282 = memref.load %arg2[%281] : memref<128xi32, #tpu.memory_space<smem>>
    %283 = arith.index_cast %279 : i32 to index
    %c0_93 = arith.constant 0 : index
    %284 = vector.load %arg3[%283, %c0_93] : memref<10x4xf32, #tpu.memory_space<vmem>>, vector<1x4xf32>
    %285 = arith.index_cast %282 : i32 to index
    %c0_94 = arith.constant 0 : index
    %286 = vector.load %arg4[%285, %c0_94] : memref<12x4xf32, #tpu.memory_space<vmem>>, vector<1x4xf32>
    %287 = arith.mulf %284, %286 : vector<1x4xf32>
    %c23 = arith.constant 23 : index
    %c0_95 = arith.constant 0 : index
    %288 = vector.load %arg6[%c23, %c0_95] : memref<128x4xf32, #tpu.memory_space<vmem>>, vector<1x4xf32>
    tpu.vector_store %arg6[%c23, %c0_95], %287 {strides = array<i32>} : memref<128x4xf32, #tpu.memory_space<vmem>>, vector<1x4xf32>,
    %c24_i32 = arith.constant 24 : i32
    %289 = arith.addi %0, %c24_i32 : i32
    %290 = arith.index_cast %289 : i32 to index
    %291 = memref.load %arg1[%290] : memref<128xi32, #tpu.memory_space<smem>>
    %c24_i32_96 = arith.constant 24 : i32
    %292 = arith.addi %0, %c24_i32_96 : i32
    %293 = arith.index_cast %292 : i32 to index
    %294 = memref.load %arg2[%293] : memref<128xi32, #tpu.memory_space<smem>>
    %295 = arith.index_cast %291 : i32 to index
    %c0_97 = arith.constant 0 : index
    %296 = vector.load %arg3[%295, %c0_97] : memref<10x4xf32, #tpu.memory_space<vmem>>, vector<1x4xf32>
    %297 = arith.index_cast %294 : i32 to index
    %c0_98 = arith.constant 0 : index
    %298 = vector.load %arg4[%297, %c0_98] : memref<12x4xf32, #tpu.memory_space<vmem>>, vector<1x4xf32>
    %299 = arith.mulf %296, %298 : vector<1x4xf32>
    %c24 = arith.constant 24 : index
    %c0_99 = arith.constant 0 : index
    %300 = vector.load %arg6[%c24, %c0_99] : memref<128x4xf32, #tpu.memory_space<vmem>>, vector<1x4xf32>
    tpu.vector_store %arg6[%c24, %c0_99], %299 {strides = array<i32>} : memref<128x4xf32, #tpu.memory_space<vmem>>, vector<1x4xf32>,
    %c25_i32 = arith.constant 25 : i32
    %301 = arith.addi %0, %c25_i32 : i32
    %302 = arith.index_cast %301 : i32 to index
    %303 = memref.load %arg1[%302] : memref<128xi32, #tpu.memory_space<smem>>
    %c25_i32_100 = arith.constant 25 : i32
    %304 = arith.addi %0, %c25_i32_100 : i32
    %305 = arith.index_cast %304 : i32 to index
    %306 = memref.load %arg2[%305] : memref<128xi32, #tpu.memory_space<smem>>
    %307 = arith.index_cast %303 : i32 to index
    %c0_101 = arith.constant 0 : index
    %308 = vector.load %arg3[%307, %c0_101] : memref<10x4xf32, #tpu.memory_space<vmem>>, vector<1x4xf32>
    %309 = arith.index_cast %306 : i32 to index
    %c0_102 = arith.constant 0 : index
    %310 = vector.load %arg4[%309, %c0_102] : memref<12x4xf32, #tpu.memory_space<vmem>>, vector<1x4xf32>
    %311 = arith.mulf %308, %310 : vector<1x4xf32>
    %c25 = arith.constant 25 : index
    %c0_103 = arith.constant 0 : index
    %312 = vector.load %arg6[%c25, %c0_103] : memref<128x4xf32, #tpu.memory_space<vmem>>, vector<1x4xf32>
    tpu.vector_store %arg6[%c25, %c0_103], %311 {strides = array<i32>} : memref<128x4xf32, #tpu.memory_space<vmem>>, vector<1x4xf32>,
    %c26_i32 = arith.constant 26 : i32
    %313 = arith.addi %0, %c26_i32 : i32
    %314 = arith.index_cast %313 : i32 to index
    %315 = memref.load %arg1[%314] : memref<128xi32, #tpu.memory_space<smem>>
    %c26_i32_104 = arith.constant 26 : i32
    %316 = arith.addi %0, %c26_i32_104 : i32
    %317 = arith.index_cast %316 : i32 to index
    %318 = memref.load %arg2[%317] : memref<128xi32, #tpu.memory_space<smem>>
    %319 = arith.index_cast %315 : i32 to index
    %c0_105 = arith.constant 0 : index
    %320 = vector.load %arg3[%319, %c0_105] : memref<10x4xf32, #tpu.memory_space<vmem>>, vector<1x4xf32>
    %321 = arith.index_cast %318 : i32 to index
    %c0_106 = arith.constant 0 : index
    %322 = vector.load %arg4[%321, %c0_106] : memref<12x4xf32, #tpu.memory_space<vmem>>, vector<1x4xf32>
    %323 = arith.mulf %320, %322 : vector<1x4xf32>
    %c26 = arith.constant 26 : index
    %c0_107 = arith.constant 0 : index
    %324 = vector.load %arg6[%c26, %c0_107] : memref<128x4xf32, #tpu.memory_space<vmem>>, vector<1x4xf32>
    tpu.vector_store %arg6[%c26, %c0_107], %323 {strides = array<i32>} : memref<128x4xf32, #tpu.memory_space<vmem>>, vector<1x4xf32>,
    %c27_i32 = arith.constant 27 : i32
    %325 = arith.addi %0, %c27_i32 : i32
    %326 = arith.index_cast %325 : i32 to index
    %327 = memref.load %arg1[%326] : memref<128xi32, #tpu.memory_space<smem>>
    %c27_i32_108 = arith.constant 27 : i32
    %328 = arith.addi %0, %c27_i32_108 : i32
    %329 = arith.index_cast %328 : i32 to index
    %330 = memref.load %arg2[%329] : memref<128xi32, #tpu.memory_space<smem>>
    %331 = arith.index_cast %327 : i32 to index
    %c0_109 = arith.constant 0 : index
    %332 = vector.load %arg3[%331, %c0_109] : memref<10x4xf32, #tpu.memory_space<vmem>>, vector<1x4xf32>
    %333 = arith.index_cast %330 : i32 to index
    %c0_110 = arith.constant 0 : index
    %334 = vector.load %arg4[%333, %c0_110] : memref<12x4xf32, #tpu.memory_space<vmem>>, vector<1x4xf32>
    %335 = arith.mulf %332, %334 : vector<1x4xf32>
    %c27 = arith.constant 27 : index
    %c0_111 = arith.constant 0 : index
    %336 = vector.load %arg6[%c27, %c0_111] : memref<128x4xf32, #tpu.memory_space<vmem>>, vector<1x4xf32>
    tpu.vector_store %arg6[%c27, %c0_111], %335 {strides = array<i32>} : memref<128x4xf32, #tpu.memory_space<vmem>>, vector<1x4xf32>,
    %c28_i32 = arith.constant 28 : i32
    %337 = arith.addi %0, %c28_i32 : i32
    %338 = arith.index_cast %337 : i32 to index
    %339 = memref.load %arg1[%338] : memref<128xi32, #tpu.memory_space<smem>>
    %c28_i32_112 = arith.constant 28 : i32
    %340 = arith.addi %0, %c28_i32_112 : i32
    %341 = arith.index_cast %340 : i32 to index
    %342 = memref.load %arg2[%341] : memref<128xi32, #tpu.memory_space<smem>>
    %343 = arith.index_cast %339 : i32 to index
    %c0_113 = arith.constant 0 : index
    %344 = vector.load %arg3[%343, %c0_113] : memref<10x4xf32, #tpu.memory_space<vmem>>, vector<1x4xf32>
    %345 = arith.index_cast %342 : i32 to index
    %c0_114 = arith.constant 0 : index
    %346 = vector.load %arg4[%345, %c0_114] : memref<12x4xf32, #tpu.memory_space<vmem>>, vector<1x4xf32>
    %347 = arith.mulf %344, %346 : vector<1x4xf32>
    %c28 = arith.constant 28 : index
    %c0_115 = arith.constant 0 : index
    %348 = vector.load %arg6[%c28, %c0_115] : memref<128x4xf32, #tpu.memory_space<vmem>>, vector<1x4xf32>
    tpu.vector_store %arg6[%c28, %c0_115], %347 {strides = array<i32>} : memref<128x4xf32, #tpu.memory_space<vmem>>, vector<1x4xf32>,
    %c29_i32 = arith.constant 29 : i32
    %349 = arith.addi %0, %c29_i32 : i32
    %350 = arith.index_cast %349 : i32 to index
    %351 = memref.load %arg1[%350] : memref<128xi32, #tpu.memory_space<smem>>
    %c29_i32_116 = arith.constant 29 : i32
    %352 = arith.addi %0, %c29_i32_116 : i32
    %353 = arith.index_cast %352 : i32 to index
    %354 = memref.load %arg2[%353] : memref<128xi32, #tpu.memory_space<smem>>
    %355 = arith.index_cast %351 : i32 to index
    %c0_117 = arith.constant 0 : index
    %356 = vector.load %arg3[%355, %c0_117] : memref<10x4xf32, #tpu.memory_space<vmem>>, vector<1x4xf32>
    %357 = arith.index_cast %354 : i32 to index
    %c0_118 = arith.constant 0 : index
    %358 = vector.load %arg4[%357, %c0_118] : memref<12x4xf32, #tpu.memory_space<vmem>>, vector<1x4xf32>
    %359 = arith.mulf %356, %358 : vector<1x4xf32>
    %c29 = arith.constant 29 : index
    %c0_119 = arith.constant 0 : index
    %360 = vector.load %arg6[%c29, %c0_119] : memref<128x4xf32, #tpu.memory_space<vmem>>, vector<1x4xf32>
    tpu.vector_store %arg6[%c29, %c0_119], %359 {strides = array<i32>} : memref<128x4xf32, #tpu.memory_space<vmem>>, vector<1x4xf32>,
    %c30_i32 = arith.constant 30 : i32
    %361 = arith.addi %0, %c30_i32 : i32
    %362 = arith.index_cast %361 : i32 to index
    %363 = memref.load %arg1[%362] : memref<128xi32, #tpu.memory_space<smem>>
    %c30_i32_120 = arith.constant 30 : i32
    %364 = arith.addi %0, %c30_i32_120 : i32
    %365 = arith.index_cast %364 : i32 to index
    %366 = memref.load %arg2[%365] : memref<128xi32, #tpu.memory_space<smem>>
    %367 = arith.index_cast %363 : i32 to index
    %c0_121 = arith.constant 0 : index
    %368 = vector.load %arg3[%367, %c0_121] : memref<10x4xf32, #tpu.memory_space<vmem>>, vector<1x4xf32>
    %369 = arith.index_cast %366 : i32 to index
    %c0_122 = arith.constant 0 : index
    %370 = vector.load %arg4[%369, %c0_122] : memref<12x4xf32, #tpu.memory_space<vmem>>, vector<1x4xf32>
    %371 = arith.mulf %368, %370 : vector<1x4xf32>
    %c30 = arith.constant 30 : index
    %c0_123 = arith.constant 0 : index
    %372 = vector.load %arg6[%c30, %c0_123] : memref<128x4xf32, #tpu.memory_space<vmem>>, vector<1x4xf32>
    tpu.vector_store %arg6[%c30, %c0_123], %371 {strides = array<i32>} : memref<128x4xf32, #tpu.memory_space<vmem>>, vector<1x4xf32>,
    %c31_i32 = arith.constant 31 : i32
    %373 = arith.addi %0, %c31_i32 : i32
    %374 = arith.index_cast %373 : i32 to index
    %375 = memref.load %arg1[%374] : memref<128xi32, #tpu.memory_space<smem>>
    %c31_i32_124 = arith.constant 31 : i32
    %376 = arith.addi %0, %c31_i32_124 : i32
    %377 = arith.index_cast %376 : i32 to index
    %378 = memref.load %arg2[%377] : memref<128xi32, #tpu.memory_space<smem>>
    %379 = arith.index_cast %375 : i32 to index
    %c0_125 = arith.constant 0 : index
    %380 = vector.load %arg3[%379, %c0_125] : memref<10x4xf32, #tpu.memory_space<vmem>>, vector<1x4xf32>
    %381 = arith.index_cast %378 : i32 to index
    %c0_126 = arith.constant 0 : index
    %382 = vector.load %arg4[%381, %c0_126] : memref<12x4xf32, #tpu.memory_space<vmem>>, vector<1x4xf32>
    %383 = arith.mulf %380, %382 : vector<1x4xf32>
    %c31 = arith.constant 31 : index
    %c0_127 = arith.constant 0 : index
    %384 = vector.load %arg6[%c31, %c0_127] : memref<128x4xf32, #tpu.memory_space<vmem>>, vector<1x4xf32>
    tpu.vector_store %arg6[%c31, %c0_127], %383 {strides = array<i32>} : memref<128x4xf32, #tpu.memory_space<vmem>>, vector<1x4xf32>,
    %c32_i32 = arith.constant 32 : i32
    %385 = arith.addi %0, %c32_i32 : i32
    %386 = arith.index_cast %385 : i32 to index
    %387 = memref.load %arg1[%386] : memref<128xi32, #tpu.memory_space<smem>>
    %c32_i32_128 = arith.constant 32 : i32
    %388 = arith.addi %0, %c32_i32_128 : i32
    %389 = arith.index_cast %388 : i32 to index
    %390 = memref.load %arg2[%389] : memref<128xi32, #tpu.memory_space<smem>>
    %391 = arith.index_cast %387 : i32 to index
    %c0_129 = arith.constant 0 : index
    %392 = vector.load %arg3[%391, %c0_129] : memref<10x4xf32, #tpu.memory_space<vmem>>, vector<1x4xf32>
    %393 = arith.index_cast %390 : i32 to index
    %c0_130 = arith.constant 0 : index
    %394 = vector.load %arg4[%393, %c0_130] : memref<12x4xf32, #tpu.memory_space<vmem>>, vector<1x4xf32>
    %395 = arith.mulf %392, %394 : vector<1x4xf32>
    %c32 = arith.constant 32 : index
    %c0_131 = arith.constant 0 : index
    %396 = vector.load %arg6[%c32, %c0_131] : memref<128x4xf32, #tpu.memory_space<vmem>>, vector<1x4xf32>
    tpu.vector_store %arg6[%c32, %c0_131], %395 {strides = array<i32>} : memref<128x4xf32, #tpu.memory_space<vmem>>, vector<1x4xf32>,
    %c33_i32 = arith.constant 33 : i32
    %397 = arith.addi %0, %c33_i32 : i32
    %398 = arith.index_cast %397 : i32 to index
    %399 = memref.load %arg1[%398] : memref<128xi32, #tpu.memory_space<smem>>
    %c33_i32_132 = arith.constant 33 : i32
    %400 = arith.addi %0, %c33_i32_132 : i32
    %401 = arith.index_cast %400 : i32 to index
    %402 = memref.load %arg2[%401] : memref<128xi32, #tpu.memory_space<smem>>
    %403 = arith.index_cast %399 : i32 to index
    %c0_133 = arith.constant 0 : index
    %404 = vector.load %arg3[%403, %c0_133] : memref<10x4xf32, #tpu.memory_space<vmem>>, vector<1x4xf32>
    %405 = arith.index_cast %402 : i32 to index
    %c0_134 = arith.constant 0 : index
    %406 = vector.load %arg4[%405, %c0_134] : memref<12x4xf32, #tpu.memory_space<vmem>>, vector<1x4xf32>
    %407 = arith.mulf %404, %406 : vector<1x4xf32>
    %c33 = arith.constant 33 : index
    %c0_135 = arith.constant 0 : index
    %408 = vector.load %arg6[%c33, %c0_135] : memref<128x4xf32, #tpu.memory_space<vmem>>, vector<1x4xf32>
    tpu.vector_store %arg6[%c33, %c0_135], %407 {strides = array<i32>} : memref<128x4xf32, #tpu.memory_space<vmem>>, vector<1x4xf32>,
    %c34_i32 = arith.constant 34 : i32
    %409 = arith.addi %0, %c34_i32 : i32
    %410 = arith.index_cast %409 : i32 to index
    %411 = memref.load %arg1[%410] : memref<128xi32, #tpu.memory_space<smem>>
    %c34_i32_136 = arith.constant 34 : i32
    %412 = arith.addi %0, %c34_i32_136 : i32
    %413 = arith.index_cast %412 : i32 to index
    %414 = memref.load %arg2[%413] : memref<128xi32, #tpu.memory_space<smem>>
    %415 = arith.index_cast %411 : i32 to index
    %c0_137 = arith.constant 0 : index
    %416 = vector.load %arg3[%415, %c0_137] : memref<10x4xf32, #tpu.memory_space<vmem>>, vector<1x4xf32>
    %417 = arith.index_cast %414 : i32 to index
    %c0_138 = arith.constant 0 : index
    %418 = vector.load %arg4[%417, %c0_138] : memref<12x4xf32, #tpu.memory_space<vmem>>, vector<1x4xf32>
    %419 = arith.mulf %416, %418 : vector<1x4xf32>
    %c34 = arith.constant 34 : index
    %c0_139 = arith.constant 0 : index
    %420 = vector.load %arg6[%c34, %c0_139] : memref<128x4xf32, #tpu.memory_space<vmem>>, vector<1x4xf32>
    tpu.vector_store %arg6[%c34, %c0_139], %419 {strides = array<i32>} : memref<128x4xf32, #tpu.memory_space<vmem>>, vector<1x4xf32>,
    %c35_i32 = arith.constant 35 : i32
    %421 = arith.addi %0, %c35_i32 : i32
    %422 = arith.index_cast %421 : i32 to index
    %423 = memref.load %arg1[%422] : memref<128xi32, #tpu.memory_space<smem>>
    %c35_i32_140 = arith.constant 35 : i32
    %424 = arith.addi %0, %c35_i32_140 : i32
    %425 = arith.index_cast %424 : i32 to index
    %426 = memref.load %arg2[%425] : memref<128xi32, #tpu.memory_space<smem>>
    %427 = arith.index_cast %423 : i32 to index
    %c0_141 = arith.constant 0 : index
    %428 = vector.load %arg3[%427, %c0_141] : memref<10x4xf32, #tpu.memory_space<vmem>>, vector<1x4xf32>
    %429 = arith.index_cast %426 : i32 to index
    %c0_142 = arith.constant 0 : index
    %430 = vector.load %arg4[%429, %c0_142] : memref<12x4xf32, #tpu.memory_space<vmem>>, vector<1x4xf32>
    %431 = arith.mulf %428, %430 : vector<1x4xf32>
    %c35 = arith.constant 35 : index
    %c0_143 = arith.constant 0 : index
    %432 = vector.load %arg6[%c35, %c0_143] : memref<128x4xf32, #tpu.memory_space<vmem>>, vector<1x4xf32>
    tpu.vector_store %arg6[%c35, %c0_143], %431 {strides = array<i32>} : memref<128x4xf32, #tpu.memory_space<vmem>>, vector<1x4xf32>,
    %c36_i32 = arith.constant 36 : i32
    %433 = arith.addi %0, %c36_i32 : i32
    %434 = arith.index_cast %433 : i32 to index
    %435 = memref.load %arg1[%434] : memref<128xi32, #tpu.memory_space<smem>>
    %c36_i32_144 = arith.constant 36 : i32
    %436 = arith.addi %0, %c36_i32_144 : i32
    %437 = arith.index_cast %436 : i32 to index
    %438 = memref.load %arg2[%437] : memref<128xi32, #tpu.memory_space<smem>>
    %439 = arith.index_cast %435 : i32 to index
    %c0_145 = arith.constant 0 : index
    %440 = vector.load %arg3[%439, %c0_145] : memref<10x4xf32, #tpu.memory_space<vmem>>, vector<1x4xf32>
    %441 = arith.index_cast %438 : i32 to index
    %c0_146 = arith.constant 0 : index
    %442 = vector.load %arg4[%441, %c0_146] : memref<12x4xf32, #tpu.memory_space<vmem>>, vector<1x4xf32>
    %443 = arith.mulf %440, %442 : vector<1x4xf32>
    %c36 = arith.constant 36 : index
    %c0_147 = arith.constant 0 : index
    %444 = vector.load %arg6[%c36, %c0_147] : memref<128x4xf32, #tpu.memory_space<vmem>>, vector<1x4xf32>
    tpu.vector_store %arg6[%c36, %c0_147], %443 {strides = array<i32>} : memref<128x4xf32, #tpu.memory_space<vmem>>, vector<1x4xf32>,
    %c37_i32 = arith.constant 37 : i32
    %445 = arith.addi %0, %c37_i32 : i32
    %446 = arith.index_cast %445 : i32 to index
    %447 = memref.load %arg1[%446] : memref<128xi32, #tpu.memory_space<smem>>
    %c37_i32_148 = arith.constant 37 : i32
    %448 = arith.addi %0, %c37_i32_148 : i32
    %449 = arith.index_cast %448 : i32 to index
    %450 = memref.load %arg2[%449] : memref<128xi32, #tpu.memory_space<smem>>
    %451 = arith.index_cast %447 : i32 to index
    %c0_149 = arith.constant 0 : index
    %452 = vector.load %arg3[%451, %c0_149] : memref<10x4xf32, #tpu.memory_space<vmem>>, vector<1x4xf32>
    %453 = arith.index_cast %450 : i32 to index
    %c0_150 = arith.constant 0 : index
    %454 = vector.load %arg4[%453, %c0_150] : memref<12x4xf32, #tpu.memory_space<vmem>>, vector<1x4xf32>
    %455 = arith.mulf %452, %454 : vector<1x4xf32>
    %c37 = arith.constant 37 : index
    %c0_151 = arith.constant 0 : index
    %456 = vector.load %arg6[%c37, %c0_151] : memref<128x4xf32, #tpu.memory_space<vmem>>, vector<1x4xf32>
    tpu.vector_store %arg6[%c37, %c0_151], %455 {strides = array<i32>} : memref<128x4xf32, #tpu.memory_space<vmem>>, vector<1x4xf32>,
    %c38_i32 = arith.constant 38 : i32
    %457 = arith.addi %0, %c38_i32 : i32
    %458 = arith.index_cast %457 : i32 to index
    %459 = memref.load %arg1[%458] : memref<128xi32, #tpu.memory_space<smem>>
    %c38_i32_152 = arith.constant 38 : i32
    %460 = arith.addi %0, %c38_i32_152 : i32
    %461 = arith.index_cast %460 : i32 to index
    %462 = memref.load %arg2[%461] : memref<128xi32, #tpu.memory_space<smem>>
    %463 = arith.index_cast %459 : i32 to index
    %c0_153 = arith.constant 0 : index
    %464 = vector.load %arg3[%463, %c0_153] : memref<10x4xf32, #tpu.memory_space<vmem>>, vector<1x4xf32>
    %465 = arith.index_cast %462 : i32 to index
    %c0_154 = arith.constant 0 : index
    %466 = vector.load %arg4[%465, %c0_154] : memref<12x4xf32, #tpu.memory_space<vmem>>, vector<1x4xf32>
    %467 = arith.mulf %464, %466 : vector<1x4xf32>
    %c38 = arith.constant 38 : index
    %c0_155 = arith.constant 0 : index
    %468 = vector.load %arg6[%c38, %c0_155] : memref<128x4xf32, #tpu.memory_space<vmem>>, vector<1x4xf32>
    tpu.vector_store %arg6[%c38, %c0_155], %467 {strides = array<i32>} : memref<128x4xf32, #tpu.memory_space<vmem>>, vector<1x4xf32>,
    %c39_i32 = arith.constant 39 : i32
    %469 = arith.addi %0, %c39_i32 : i32
    %470 = arith.index_cast %469 : i32 to index
    %471 = memref.load %arg1[%470] : memref<128xi32, #tpu.memory_space<smem>>
    %c39_i32_156 = arith.constant 39 : i32
    %472 = arith.addi %0, %c39_i32_156 : i32
    %473 = arith.index_cast %472 : i32 to index
    %474 = memref.load %arg2[%473] : memref<128xi32, #tpu.memory_space<smem>>
    %475 = arith.index_cast %471 : i32 to index
    %c0_157 = arith.constant 0 : index
    %476 = vector.load %arg3[%475, %c0_157] : memref<10x4xf32, #tpu.memory_space<vmem>>, vector<1x4xf32>
    %477 = arith.index_cast %474 : i32 to index
    %c0_158 = arith.constant 0 : index
    %478 = vector.load %arg4[%477, %c0_158] : memref<12x4xf32, #tpu.memory_space<vmem>>, vector<1x4xf32>
    %479 = arith.mulf %476, %478 : vector<1x4xf32>
    %c39 = arith.constant 39 : index
    %c0_159 = arith.constant 0 : index
    %480 = vector.load %arg6[%c39, %c0_159] : memref<128x4xf32, #tpu.memory_space<vmem>>, vector<1x4xf32>
    tpu.vector_store %arg6[%c39, %c0_159], %479 {strides = array<i32>} : memref<128x4xf32, #tpu.memory_space<vmem>>, vector<1x4xf32>,
    %c40_i32 = arith.constant 40 : i32
    %481 = arith.addi %0, %c40_i32 : i32
    %482 = arith.index_cast %481 : i32 to index
    %483 = memref.load %arg1[%482] : memref<128xi32, #tpu.memory_space<smem>>
    %c40_i32_160 = arith.constant 40 : i32
    %484 = arith.addi %0, %c40_i32_160 : i32
    %485 = arith.index_cast %484 : i32 to index
    %486 = memref.load %arg2[%485] : memref<128xi32, #tpu.memory_space<smem>>
    %487 = arith.index_cast %483 : i32 to index
    %c0_161 = arith.constant 0 : index
    %488 = vector.load %arg3[%487, %c0_161] : memref<10x4xf32, #tpu.memory_space<vmem>>, vector<1x4xf32>
    %489 = arith.index_cast %486 : i32 to index
    %c0_162 = arith.constant 0 : index
    %490 = vector.load %arg4[%489, %c0_162] : memref<12x4xf32, #tpu.memory_space<vmem>>, vector<1x4xf32>
    %491 = arith.mulf %488, %490 : vector<1x4xf32>
    %c40 = arith.constant 40 : index
    %c0_163 = arith.constant 0 : index
    %492 = vector.load %arg6[%c40, %c0_163] : memref<128x4xf32, #tpu.memory_space<vmem>>, vector<1x4xf32>
    tpu.vector_store %arg6[%c40, %c0_163], %491 {strides = array<i32>} : memref<128x4xf32, #tpu.memory_space<vmem>>, vector<1x4xf32>,
    %c41_i32 = arith.constant 41 : i32
    %493 = arith.addi %0, %c41_i32 : i32
    %494 = arith.index_cast %493 : i32 to index
    %495 = memref.load %arg1[%494] : memref<128xi32, #tpu.memory_space<smem>>
    %c41_i32_164 = arith.constant 41 : i32
    %496 = arith.addi %0, %c41_i32_164 : i32
    %497 = arith.index_cast %496 : i32 to index
    %498 = memref.load %arg2[%497] : memref<128xi32, #tpu.memory_space<smem>>
    %499 = arith.index_cast %495 : i32 to index
    %c0_165 = arith.constant 0 : index
    %500 = vector.load %arg3[%499, %c0_165] : memref<10x4xf32, #tpu.memory_space<vmem>>, vector<1x4xf32>
    %501 = arith.index_cast %498 : i32 to index
    %c0_166 = arith.constant 0 : index
    %502 = vector.load %arg4[%501, %c0_166] : memref<12x4xf32, #tpu.memory_space<vmem>>, vector<1x4xf32>
    %503 = arith.mulf %500, %502 : vector<1x4xf32>
    %c41 = arith.constant 41 : index
    %c0_167 = arith.constant 0 : index
    %504 = vector.load %arg6[%c41, %c0_167] : memref<128x4xf32, #tpu.memory_space<vmem>>, vector<1x4xf32>
    tpu.vector_store %arg6[%c41, %c0_167], %503 {strides = array<i32>} : memref<128x4xf32, #tpu.memory_space<vmem>>, vector<1x4xf32>,
    %c42_i32 = arith.constant 42 : i32
    %505 = arith.addi %0, %c42_i32 : i32
    %506 = arith.index_cast %505 : i32 to index
    %507 = memref.load %arg1[%506] : memref<128xi32, #tpu.memory_space<smem>>
    %c42_i32_168 = arith.constant 42 : i32
    %508 = arith.addi %0, %c42_i32_168 : i32
    %509 = arith.index_cast %508 : i32 to index
    %510 = memref.load %arg2[%509] : memref<128xi32, #tpu.memory_space<smem>>
    %511 = arith.index_cast %507 : i32 to index
    %c0_169 = arith.constant 0 : index
    %512 = vector.load %arg3[%511, %c0_169] : memref<10x4xf32, #tpu.memory_space<vmem>>, vector<1x4xf32>
    %513 = arith.index_cast %510 : i32 to index
    %c0_170 = arith.constant 0 : index
    %514 = vector.load %arg4[%513, %c0_170] : memref<12x4xf32, #tpu.memory_space<vmem>>, vector<1x4xf32>
    %515 = arith.mulf %512, %514 : vector<1x4xf32>
    %c42 = arith.constant 42 : index
    %c0_171 = arith.constant 0 : index
    %516 = vector.load %arg6[%c42, %c0_171] : memref<128x4xf32, #tpu.memory_space<vmem>>, vector<1x4xf32>
    tpu.vector_store %arg6[%c42, %c0_171], %515 {strides = array<i32>} : memref<128x4xf32, #tpu.memory_space<vmem>>, vector<1x4xf32>,
    %c43_i32 = arith.constant 43 : i32
    %517 = arith.addi %0, %c43_i32 : i32
    %518 = arith.index_cast %517 : i32 to index
    %519 = memref.load %arg1[%518] : memref<128xi32, #tpu.memory_space<smem>>
    %c43_i32_172 = arith.constant 43 : i32
    %520 = arith.addi %0, %c43_i32_172 : i32
    %521 = arith.index_cast %520 : i32 to index
    %522 = memref.load %arg2[%521] : memref<128xi32, #tpu.memory_space<smem>>
    %523 = arith.index_cast %519 : i32 to index
    %c0_173 = arith.constant 0 : index
    %524 = vector.load %arg3[%523, %c0_173] : memref<10x4xf32, #tpu.memory_space<vmem>>, vector<1x4xf32>
    %525 = arith.index_cast %522 : i32 to index
    %c0_174 = arith.constant 0 : index
    %526 = vector.load %arg4[%525, %c0_174] : memref<12x4xf32, #tpu.memory_space<vmem>>, vector<1x4xf32>
    %527 = arith.mulf %524, %526 : vector<1x4xf32>
    %c43 = arith.constant 43 : index
    %c0_175 = arith.constant 0 : index
    %528 = vector.load %arg6[%c43, %c0_175] : memref<128x4xf32, #tpu.memory_space<vmem>>, vector<1x4xf32>
    tpu.vector_store %arg6[%c43, %c0_175], %527 {strides = array<i32>} : memref<128x4xf32, #tpu.memory_space<vmem>>, vector<1x4xf32>,
    %c44_i32 = arith.constant 44 : i32
    %529 = arith.addi %0, %c44_i32 : i32
    %530 = arith.index_cast %529 : i32 to index
    %531 = memref.load %arg1[%530] : memref<128xi32, #tpu.memory_space<smem>>
    %c44_i32_176 = arith.constant 44 : i32
    %532 = arith.addi %0, %c44_i32_176 : i32
    %533 = arith.index_cast %532 : i32 to index
    %534 = memref.load %arg2[%533] : memref<128xi32, #tpu.memory_space<smem>>
    %535 = arith.index_cast %531 : i32 to index
    %c0_177 = arith.constant 0 : index
    %536 = vector.load %arg3[%535, %c0_177] : memref<10x4xf32, #tpu.memory_space<vmem>>, vector<1x4xf32>
    %537 = arith.index_cast %534 : i32 to index
    %c0_178 = arith.constant 0 : index
    %538 = vector.load %arg4[%537, %c0_178] : memref<12x4xf32, #tpu.memory_space<vmem>>, vector<1x4xf32>
    %539 = arith.mulf %536, %538 : vector<1x4xf32>
    %c44 = arith.constant 44 : index
    %c0_179 = arith.constant 0 : index
    %540 = vector.load %arg6[%c44, %c0_179] : memref<128x4xf32, #tpu.memory_space<vmem>>, vector<1x4xf32>
    tpu.vector_store %arg6[%c44, %c0_179], %539 {strides = array<i32>} : memref<128x4xf32, #tpu.memory_space<vmem>>, vector<1x4xf32>,
    %c45_i32 = arith.constant 45 : i32
    %541 = arith.addi %0, %c45_i32 : i32
    %542 = arith.index_cast %541 : i32 to index
    %543 = memref.load %arg1[%542] : memref<128xi32, #tpu.memory_space<smem>>
    %c45_i32_180 = arith.constant 45 : i32
    %544 = arith.addi %0, %c45_i32_180 : i32
    %545 = arith.index_cast %544 : i32 to index
    %546 = memref.load %arg2[%545] : memref<128xi32, #tpu.memory_space<smem>>
    %547 = arith.index_cast %543 : i32 to index
    %c0_181 = arith.constant 0 : index
    %548 = vector.load %arg3[%547, %c0_181] : memref<10x4xf32, #tpu.memory_space<vmem>>, vector<1x4xf32>
    %549 = arith.index_cast %546 : i32 to index
    %c0_182 = arith.constant 0 : index
    %550 = vector.load %arg4[%549, %c0_182] : memref<12x4xf32, #tpu.memory_space<vmem>>, vector<1x4xf32>
    %551 = arith.mulf %548, %550 : vector<1x4xf32>
    %c45 = arith.constant 45 : index
    %c0_183 = arith.constant 0 : index
    %552 = vector.load %arg6[%c45, %c0_183] : memref<128x4xf32, #tpu.memory_space<vmem>>, vector<1x4xf32>
    tpu.vector_store %arg6[%c45, %c0_183], %551 {strides = array<i32>} : memref<128x4xf32, #tpu.memory_space<vmem>>, vector<1x4xf32>,
    %c46_i32 = arith.constant 46 : i32
    %553 = arith.addi %0, %c46_i32 : i32
    %554 = arith.index_cast %553 : i32 to index
    %555 = memref.load %arg1[%554] : memref<128xi32, #tpu.memory_space<smem>>
    %c46_i32_184 = arith.constant 46 : i32
    %556 = arith.addi %0, %c46_i32_184 : i32
    %557 = arith.index_cast %556 : i32 to index
    %558 = memref.load %arg2[%557] : memref<128xi32, #tpu.memory_space<smem>>
    %559 = arith.index_cast %555 : i32 to index
    %c0_185 = arith.constant 0 : index
    %560 = vector.load %arg3[%559, %c0_185] : memref<10x4xf32, #tpu.memory_space<vmem>>, vector<1x4xf32>
    %561 = arith.index_cast %558 : i32 to index
    %c0_186 = arith.constant 0 : index
    %562 = vector.load %arg4[%561, %c0_186] : memref<12x4xf32, #tpu.memory_space<vmem>>, vector<1x4xf32>
    %563 = arith.mulf %560, %562 : vector<1x4xf32>
    %c46 = arith.constant 46 : index
    %c0_187 = arith.constant 0 : index
    %564 = vector.load %arg6[%c46, %c0_187] : memref<128x4xf32, #tpu.memory_space<vmem>>, vector<1x4xf32>
    tpu.vector_store %arg6[%c46, %c0_187], %563 {strides = array<i32>} : memref<128x4xf32, #tpu.memory_space<vmem>>, vector<1x4xf32>,
    %c47_i32 = arith.constant 47 : i32
    %565 = arith.addi %0, %c47_i32 : i32
    %566 = arith.index_cast %565 : i32 to index
    %567 = memref.load %arg1[%566] : memref<128xi32, #tpu.memory_space<smem>>
    %c47_i32_188 = arith.constant 47 : i32
    %568 = arith.addi %0, %c47_i32_188 : i32
    %569 = arith.index_cast %568 : i32 to index
    %570 = memref.load %arg2[%569] : memref<128xi32, #tpu.memory_space<smem>>
    %571 = arith.index_cast %567 : i32 to index
    %c0_189 = arith.constant 0 : index
    %572 = vector.load %arg3[%571, %c0_189] : memref<10x4xf32, #tpu.memory_space<vmem>>, vector<1x4xf32>
    %573 = arith.index_cast %570 : i32 to index
    %c0_190 = arith.constant 0 : index
    %574 = vector.load %arg4[%573, %c0_190] : memref<12x4xf32, #tpu.memory_space<vmem>>, vector<1x4xf32>
    %575 = arith.mulf %572, %574 : vector<1x4xf32>
    %c47 = arith.constant 47 : index
    %c0_191 = arith.constant 0 : index
    %576 = vector.load %arg6[%c47, %c0_191] : memref<128x4xf32, #tpu.memory_space<vmem>>, vector<1x4xf32>
    tpu.vector_store %arg6[%c47, %c0_191], %575 {strides = array<i32>} : memref<128x4xf32, #tpu.memory_space<vmem>>, vector<1x4xf32>,
    %c48_i32 = arith.constant 48 : i32
    %577 = arith.addi %0, %c48_i32 : i32
    %578 = arith.index_cast %577 : i32 to index
    %579 = memref.load %arg1[%578] : memref<128xi32, #tpu.memory_space<smem>>
    %c48_i32_192 = arith.constant 48 : i32
    %580 = arith.addi %0, %c48_i32_192 : i32
    %581 = arith.index_cast %580 : i32 to index
    %582 = memref.load %arg2[%581] : memref<128xi32, #tpu.memory_space<smem>>
    %583 = arith.index_cast %579 : i32 to index
    %c0_193 = arith.constant 0 : index
    %584 = vector.load %arg3[%583, %c0_193] : memref<10x4xf32, #tpu.memory_space<vmem>>, vector<1x4xf32>
    %585 = arith.index_cast %582 : i32 to index
    %c0_194 = arith.constant 0 : index
    %586 = vector.load %arg4[%585, %c0_194] : memref<12x4xf32, #tpu.memory_space<vmem>>, vector<1x4xf32>
    %587 = arith.mulf %584, %586 : vector<1x4xf32>
    %c48 = arith.constant 48 : index
    %c0_195 = arith.constant 0 : index
    %588 = vector.load %arg6[%c48, %c0_195] : memref<128x4xf32, #tpu.memory_space<vmem>>, vector<1x4xf32>
    tpu.vector_store %arg6[%c48, %c0_195], %587 {strides = array<i32>} : memref<128x4xf32, #tpu.memory_space<vmem>>, vector<1x4xf32>,
    %c49_i32 = arith.constant 49 : i32
    %589 = arith.addi %0, %c49_i32 : i32
    %590 = arith.index_cast %589 : i32 to index
    %591 = memref.load %arg1[%590] : memref<128xi32, #tpu.memory_space<smem>>
    %c49_i32_196 = arith.constant 49 : i32
    %592 = arith.addi %0, %c49_i32_196 : i32
    %593 = arith.index_cast %592 : i32 to index
    %594 = memref.load %arg2[%593] : memref<128xi32, #tpu.memory_space<smem>>
    %595 = arith.index_cast %591 : i32 to index
    %c0_197 = arith.constant 0 : index
    %596 = vector.load %arg3[%595, %c0_197] : memref<10x4xf32, #tpu.memory_space<vmem>>, vector<1x4xf32>
    %597 = arith.index_cast %594 : i32 to index
    %c0_198 = arith.constant 0 : index
    %598 = vector.load %arg4[%597, %c0_198] : memref<12x4xf32, #tpu.memory_space<vmem>>, vector<1x4xf32>
    %599 = arith.mulf %596, %598 : vector<1x4xf32>
    %c49 = arith.constant 49 : index
    %c0_199 = arith.constant 0 : index
    %600 = vector.load %arg6[%c49, %c0_199] : memref<128x4xf32, #tpu.memory_space<vmem>>, vector<1x4xf32>
    tpu.vector_store %arg6[%c49, %c0_199], %599 {strides = array<i32>} : memref<128x4xf32, #tpu.memory_space<vmem>>, vector<1x4xf32>,
    %c50_i32 = arith.constant 50 : i32
    %601 = arith.addi %0, %c50_i32 : i32
    %602 = arith.index_cast %601 : i32 to index
    %603 = memref.load %arg1[%602] : memref<128xi32, #tpu.memory_space<smem>>
    %c50_i32_200 = arith.constant 50 : i32
    %604 = arith.addi %0, %c50_i32_200 : i32
    %605 = arith.index_cast %604 : i32 to index
    %606 = memref.load %arg2[%605] : memref<128xi32, #tpu.memory_space<smem>>
    %607 = arith.index_cast %603 : i32 to index
    %c0_201 = arith.constant 0 : index
    %608 = vector.load %arg3[%607, %c0_201] : memref<10x4xf32, #tpu.memory_space<vmem>>, vector<1x4xf32>
    %609 = arith.index_cast %606 : i32 to index
    %c0_202 = arith.constant 0 : index
    %610 = vector.load %arg4[%609, %c0_202] : memref<12x4xf32, #tpu.memory_space<vmem>>, vector<1x4xf32>
    %611 = arith.mulf %608, %610 : vector<1x4xf32>
    %c50 = arith.constant 50 : index
    %c0_203 = arith.constant 0 : index
    %612 = vector.load %arg6[%c50, %c0_203] : memref<128x4xf32, #tpu.memory_space<vmem>>, vector<1x4xf32>
    tpu.vector_store %arg6[%c50, %c0_203], %611 {strides = array<i32>} : memref<128x4xf32, #tpu.memory_space<vmem>>, vector<1x4xf32>,
    %c51_i32 = arith.constant 51 : i32
    %613 = arith.addi %0, %c51_i32 : i32
    %614 = arith.index_cast %613 : i32 to index
    %615 = memref.load %arg1[%614] : memref<128xi32, #tpu.memory_space<smem>>
    %c51_i32_204 = arith.constant 51 : i32
    %616 = arith.addi %0, %c51_i32_204 : i32
    %617 = arith.index_cast %616 : i32 to index
    %618 = memref.load %arg2[%617] : memref<128xi32, #tpu.memory_space<smem>>
    %619 = arith.index_cast %615 : i32 to index
    %c0_205 = arith.constant 0 : index
    %620 = vector.load %arg3[%619, %c0_205] : memref<10x4xf32, #tpu.memory_space<vmem>>, vector<1x4xf32>
    %621 = arith.index_cast %618 : i32 to index
    %c0_206 = arith.constant 0 : index
    %622 = vector.load %arg4[%621, %c0_206] : memref<12x4xf32, #tpu.memory_space<vmem>>, vector<1x4xf32>
    %623 = arith.mulf %620, %622 : vector<1x4xf32>
    %c51 = arith.constant 51 : index
    %c0_207 = arith.constant 0 : index
    %624 = vector.load %arg6[%c51, %c0_207] : memref<128x4xf32, #tpu.memory_space<vmem>>, vector<1x4xf32>
    tpu.vector_store %arg6[%c51, %c0_207], %623 {strides = array<i32>} : memref<128x4xf32, #tpu.memory_space<vmem>>, vector<1x4xf32>,
    %c52_i32 = arith.constant 52 : i32
    %625 = arith.addi %0, %c52_i32 : i32
    %626 = arith.index_cast %625 : i32 to index
    %627 = memref.load %arg1[%626] : memref<128xi32, #tpu.memory_space<smem>>
    %c52_i32_208 = arith.constant 52 : i32
    %628 = arith.addi %0, %c52_i32_208 : i32
    %629 = arith.index_cast %628 : i32 to index
    %630 = memref.load %arg2[%629] : memref<128xi32, #tpu.memory_space<smem>>
    %631 = arith.index_cast %627 : i32 to index
    %c0_209 = arith.constant 0 : index
    %632 = vector.load %arg3[%631, %c0_209] : memref<10x4xf32, #tpu.memory_space<vmem>>, vector<1x4xf32>
    %633 = arith.index_cast %630 : i32 to index
    %c0_210 = arith.constant 0 : index
    %634 = vector.load %arg4[%633, %c0_210] : memref<12x4xf32, #tpu.memory_space<vmem>>, vector<1x4xf32>
    %635 = arith.mulf %632, %634 : vector<1x4xf32>
    %c52 = arith.constant 52 : index
    %c0_211 = arith.constant 0 : index
    %636 = vector.load %arg6[%c52, %c0_211] : memref<128x4xf32, #tpu.memory_space<vmem>>, vector<1x4xf32>
    tpu.vector_store %arg6[%c52, %c0_211], %635 {strides = array<i32>} : memref<128x4xf32, #tpu.memory_space<vmem>>, vector<1x4xf32>,
    %c53_i32 = arith.constant 53 : i32
    %637 = arith.addi %0, %c53_i32 : i32
    %638 = arith.index_cast %637 : i32 to index
    %639 = memref.load %arg1[%638] : memref<128xi32, #tpu.memory_space<smem>>
    %c53_i32_212 = arith.constant 53 : i32
    %640 = arith.addi %0, %c53_i32_212 : i32
    %641 = arith.index_cast %640 : i32 to index
    %642 = memref.load %arg2[%641] : memref<128xi32, #tpu.memory_space<smem>>
    %643 = arith.index_cast %639 : i32 to index
    %c0_213 = arith.constant 0 : index
    %644 = vector.load %arg3[%643, %c0_213] : memref<10x4xf32, #tpu.memory_space<vmem>>, vector<1x4xf32>
    %645 = arith.index_cast %642 : i32 to index
    %c0_214 = arith.constant 0 : index
    %646 = vector.load %arg4[%645, %c0_214] : memref<12x4xf32, #tpu.memory_space<vmem>>, vector<1x4xf32>
    %647 = arith.mulf %644, %646 : vector<1x4xf32>
    %c53 = arith.constant 53 : index
    %c0_215 = arith.constant 0 : index
    %648 = vector.load %arg6[%c53, %c0_215] : memref<128x4xf32, #tpu.memory_space<vmem>>, vector<1x4xf32>
    tpu.vector_store %arg6[%c53, %c0_215], %647 {strides = array<i32>} : memref<128x4xf32, #tpu.memory_space<vmem>>, vector<1x4xf32>,
    %c54_i32 = arith.constant 54 : i32
    %649 = arith.addi %0, %c54_i32 : i32
    %650 = arith.index_cast %649 : i32 to index
    %651 = memref.load %arg1[%650] : memref<128xi32, #tpu.memory_space<smem>>
    %c54_i32_216 = arith.constant 54 : i32
    %652 = arith.addi %0, %c54_i32_216 : i32
    %653 = arith.index_cast %652 : i32 to index
    %654 = memref.load %arg2[%653] : memref<128xi32, #tpu.memory_space<smem>>
    %655 = arith.index_cast %651 : i32 to index
    %c0_217 = arith.constant 0 : index
    %656 = vector.load %arg3[%655, %c0_217] : memref<10x4xf32, #tpu.memory_space<vmem>>, vector<1x4xf32>
    %657 = arith.index_cast %654 : i32 to index
    %c0_218 = arith.constant 0 : index
    %658 = vector.load %arg4[%657, %c0_218] : memref<12x4xf32, #tpu.memory_space<vmem>>, vector<1x4xf32>
    %659 = arith.mulf %656, %658 : vector<1x4xf32>
    %c54 = arith.constant 54 : index
    %c0_219 = arith.constant 0 : index
    %660 = vector.load %arg6[%c54, %c0_219] : memref<128x4xf32, #tpu.memory_space<vmem>>, vector<1x4xf32>
    tpu.vector_store %arg6[%c54, %c0_219], %659 {strides = array<i32>} : memref<128x4xf32, #tpu.memory_space<vmem>>, vector<1x4xf32>,
    %c55_i32 = arith.constant 55 : i32
    %661 = arith.addi %0, %c55_i32 : i32
    %662 = arith.index_cast %661 : i32 to index
    %663 = memref.load %arg1[%662] : memref<128xi32, #tpu.memory_space<smem>>
    %c55_i32_220 = arith.constant 55 : i32
    %664 = arith.addi %0, %c55_i32_220 : i32
    %665 = arith.index_cast %664 : i32 to index
    %666 = memref.load %arg2[%665] : memref<128xi32, #tpu.memory_space<smem>>
    %667 = arith.index_cast %663 : i32 to index
    %c0_221 = arith.constant 0 : index
    %668 = vector.load %arg3[%667, %c0_221] : memref<10x4xf32, #tpu.memory_space<vmem>>, vector<1x4xf32>
    %669 = arith.index_cast %666 : i32 to index
    %c0_222 = arith.constant 0 : index
    %670 = vector.load %arg4[%669, %c0_222] : memref<12x4xf32, #tpu.memory_space<vmem>>, vector<1x4xf32>
    %671 = arith.mulf %668, %670 : vector<1x4xf32>
    %c55 = arith.constant 55 : index
    %c0_223 = arith.constant 0 : index
    %672 = vector.load %arg6[%c55, %c0_223] : memref<128x4xf32, #tpu.memory_space<vmem>>, vector<1x4xf32>
    tpu.vector_store %arg6[%c55, %c0_223], %671 {strides = array<i32>} : memref<128x4xf32, #tpu.memory_space<vmem>>, vector<1x4xf32>,
    %c56_i32 = arith.constant 56 : i32
    %673 = arith.addi %0, %c56_i32 : i32
    %674 = arith.index_cast %673 : i32 to index
    %675 = memref.load %arg1[%674] : memref<128xi32, #tpu.memory_space<smem>>
    %c56_i32_224 = arith.constant 56 : i32
    %676 = arith.addi %0, %c56_i32_224 : i32
    %677 = arith.index_cast %676 : i32 to index
    %678 = memref.load %arg2[%677] : memref<128xi32, #tpu.memory_space<smem>>
    %679 = arith.index_cast %675 : i32 to index
    %c0_225 = arith.constant 0 : index
    %680 = vector.load %arg3[%679, %c0_225] : memref<10x4xf32, #tpu.memory_space<vmem>>, vector<1x4xf32>
    %681 = arith.index_cast %678 : i32 to index
    %c0_226 = arith.constant 0 : index
    %682 = vector.load %arg4[%681, %c0_226] : memref<12x4xf32, #tpu.memory_space<vmem>>, vector<1x4xf32>
    %683 = arith.mulf %680, %682 : vector<1x4xf32>
    %c56 = arith.constant 56 : index
    %c0_227 = arith.constant 0 : index
    %684 = vector.load %arg6[%c56, %c0_227] : memref<128x4xf32, #tpu.memory_space<vmem>>, vector<1x4xf32>
    tpu.vector_store %arg6[%c56, %c0_227], %683 {strides = array<i32>} : memref<128x4xf32, #tpu.memory_space<vmem>>, vector<1x4xf32>,
    %c57_i32 = arith.constant 57 : i32
    %685 = arith.addi %0, %c57_i32 : i32
    %686 = arith.index_cast %685 : i32 to index
    %687 = memref.load %arg1[%686] : memref<128xi32, #tpu.memory_space<smem>>
    %c57_i32_228 = arith.constant 57 : i32
    %688 = arith.addi %0, %c57_i32_228 : i32
    %689 = arith.index_cast %688 : i32 to index
    %690 = memref.load %arg2[%689] : memref<128xi32, #tpu.memory_space<smem>>
    %691 = arith.index_cast %687 : i32 to index
    %c0_229 = arith.constant 0 : index
    %692 = vector.load %arg3[%691, %c0_229] : memref<10x4xf32, #tpu.memory_space<vmem>>, vector<1x4xf32>
    %693 = arith.index_cast %690 : i32 to index
    %c0_230 = arith.constant 0 : index
    %694 = vector.load %arg4[%693, %c0_230] : memref<12x4xf32, #tpu.memory_space<vmem>>, vector<1x4xf32>
    %695 = arith.mulf %692, %694 : vector<1x4xf32>
    %c57 = arith.constant 57 : index
    %c0_231 = arith.constant 0 : index
    %696 = vector.load %arg6[%c57, %c0_231] : memref<128x4xf32, #tpu.memory_space<vmem>>, vector<1x4xf32>
    tpu.vector_store %arg6[%c57, %c0_231], %695 {strides = array<i32>} : memref<128x4xf32, #tpu.memory_space<vmem>>, vector<1x4xf32>,
    %c58_i32 = arith.constant 58 : i32
    %697 = arith.addi %0, %c58_i32 : i32
    %698 = arith.index_cast %697 : i32 to index
    %699 = memref.load %arg1[%698] : memref<128xi32, #tpu.memory_space<smem>>
    %c58_i32_232 = arith.constant 58 : i32
    %700 = arith.addi %0, %c58_i32_232 : i32
    %701 = arith.index_cast %700 : i32 to index
    %702 = memref.load %arg2[%701] : memref<128xi32, #tpu.memory_space<smem>>
    %703 = arith.index_cast %699 : i32 to index
    %c0_233 = arith.constant 0 : index
    %704 = vector.load %arg3[%703, %c0_233] : memref<10x4xf32, #tpu.memory_space<vmem>>, vector<1x4xf32>
    %705 = arith.index_cast %702 : i32 to index
    %c0_234 = arith.constant 0 : index
    %706 = vector.load %arg4[%705, %c0_234] : memref<12x4xf32, #tpu.memory_space<vmem>>, vector<1x4xf32>
    %707 = arith.mulf %704, %706 : vector<1x4xf32>
    %c58 = arith.constant 58 : index
    %c0_235 = arith.constant 0 : index
    %708 = vector.load %arg6[%c58, %c0_235] : memref<128x4xf32, #tpu.memory_space<vmem>>, vector<1x4xf32>
    tpu.vector_store %arg6[%c58, %c0_235], %707 {strides = array<i32>} : memref<128x4xf32, #tpu.memory_space<vmem>>, vector<1x4xf32>,
    %c59_i32 = arith.constant 59 : i32
    %709 = arith.addi %0, %c59_i32 : i32
    %710 = arith.index_cast %709 : i32 to index
    %711 = memref.load %arg1[%710] : memref<128xi32, #tpu.memory_space<smem>>
    %c59_i32_236 = arith.constant 59 : i32
    %712 = arith.addi %0, %c59_i32_236 : i32
    %713 = arith.index_cast %712 : i32 to index
    %714 = memref.load %arg2[%713] : memref<128xi32, #tpu.memory_space<smem>>
    %715 = arith.index_cast %711 : i32 to index
    %c0_237 = arith.constant 0 : index
    %716 = vector.load %arg3[%715, %c0_237] : memref<10x4xf32, #tpu.memory_space<vmem>>, vector<1x4xf32>
    %717 = arith.index_cast %714 : i32 to index
    %c0_238 = arith.constant 0 : index
    %718 = vector.load %arg4[%717, %c0_238] : memref<12x4xf32, #tpu.memory_space<vmem>>, vector<1x4xf32>
    %719 = arith.mulf %716, %718 : vector<1x4xf32>
    %c59 = arith.constant 59 : index
    %c0_239 = arith.constant 0 : index
    %720 = vector.load %arg6[%c59, %c0_239] : memref<128x4xf32, #tpu.memory_space<vmem>>, vector<1x4xf32>
    tpu.vector_store %arg6[%c59, %c0_239], %719 {strides = array<i32>} : memref<128x4xf32, #tpu.memory_space<vmem>>, vector<1x4xf32>,
    %c60_i32 = arith.constant 60 : i32
    %721 = arith.addi %0, %c60_i32 : i32
    %722 = arith.index_cast %721 : i32 to index
    %723 = memref.load %arg1[%722] : memref<128xi32, #tpu.memory_space<smem>>
    %c60_i32_240 = arith.constant 60 : i32
    %724 = arith.addi %0, %c60_i32_240 : i32
    %725 = arith.index_cast %724 : i32 to index
    %726 = memref.load %arg2[%725] : memref<128xi32, #tpu.memory_space<smem>>
    %727 = arith.index_cast %723 : i32 to index
    %c0_241 = arith.constant 0 : index
    %728 = vector.load %arg3[%727, %c0_241] : memref<10x4xf32, #tpu.memory_space<vmem>>, vector<1x4xf32>
    %729 = arith.index_cast %726 : i32 to index
    %c0_242 = arith.constant 0 : index
    %730 = vector.load %arg4[%729, %c0_242] : memref<12x4xf32, #tpu.memory_space<vmem>>, vector<1x4xf32>
    %731 = arith.mulf %728, %730 : vector<1x4xf32>
    %c60 = arith.constant 60 : index
    %c0_243 = arith.constant 0 : index
    %732 = vector.load %arg6[%c60, %c0_243] : memref<128x4xf32, #tpu.memory_space<vmem>>, vector<1x4xf32>
    tpu.vector_store %arg6[%c60, %c0_243], %731 {strides = array<i32>} : memref<128x4xf32, #tpu.memory_space<vmem>>, vector<1x4xf32>,
    %c61_i32 = arith.constant 61 : i32
    %733 = arith.addi %0, %c61_i32 : i32
    %734 = arith.index_cast %733 : i32 to index
    %735 = memref.load %arg1[%734] : memref<128xi32, #tpu.memory_space<smem>>
    %c61_i32_244 = arith.constant 61 : i32
    %736 = arith.addi %0, %c61_i32_244 : i32
    %737 = arith.index_cast %736 : i32 to index
    %738 = memref.load %arg2[%737] : memref<128xi32, #tpu.memory_space<smem>>
    %739 = arith.index_cast %735 : i32 to index
    %c0_245 = arith.constant 0 : index
    %740 = vector.load %arg3[%739, %c0_245] : memref<10x4xf32, #tpu.memory_space<vmem>>, vector<1x4xf32>
    %741 = arith.index_cast %738 : i32 to index
    %c0_246 = arith.constant 0 : index
    %742 = vector.load %arg4[%741, %c0_246] : memref<12x4xf32, #tpu.memory_space<vmem>>, vector<1x4xf32>
    %743 = arith.mulf %740, %742 : vector<1x4xf32>
    %c61 = arith.constant 61 : index
    %c0_247 = arith.constant 0 : index
    %744 = vector.load %arg6[%c61, %c0_247] : memref<128x4xf32, #tpu.memory_space<vmem>>, vector<1x4xf32>
    tpu.vector_store %arg6[%c61, %c0_247], %743 {strides = array<i32>} : memref<128x4xf32, #tpu.memory_space<vmem>>, vector<1x4xf32>,
    %c62_i32 = arith.constant 62 : i32
    %745 = arith.addi %0, %c62_i32 : i32
    %746 = arith.index_cast %745 : i32 to index
    %747 = memref.load %arg1[%746] : memref<128xi32, #tpu.memory_space<smem>>
    %c62_i32_248 = arith.constant 62 : i32
    %748 = arith.addi %0, %c62_i32_248 : i32
    %749 = arith.index_cast %748 : i32 to index
    %750 = memref.load %arg2[%749] : memref<128xi32, #tpu.memory_space<smem>>
    %751 = arith.index_cast %747 : i32 to index
    %c0_249 = arith.constant 0 : index
    %752 = vector.load %arg3[%751, %c0_249] : memref<10x4xf32, #tpu.memory_space<vmem>>, vector<1x4xf32>
    %753 = arith.index_cast %750 : i32 to index
    %c0_250 = arith.constant 0 : index
    %754 = vector.load %arg4[%753, %c0_250] : memref<12x4xf32, #tpu.memory_space<vmem>>, vector<1x4xf32>
    %755 = arith.mulf %752, %754 : vector<1x4xf32>
    %c62 = arith.constant 62 : index
    %c0_251 = arith.constant 0 : index
    %756 = vector.load %arg6[%c62, %c0_251] : memref<128x4xf32, #tpu.memory_space<vmem>>, vector<1x4xf32>
    tpu.vector_store %arg6[%c62, %c0_251], %755 {strides = array<i32>} : memref<128x4xf32, #tpu.memory_space<vmem>>, vector<1x4xf32>,
    %c63_i32 = arith.constant 63 : i32
    %757 = arith.addi %0, %c63_i32 : i32
    %758 = arith.index_cast %757 : i32 to index
    %759 = memref.load %arg1[%758] : memref<128xi32, #tpu.memory_space<smem>>
    %c63_i32_252 = arith.constant 63 : i32
    %760 = arith.addi %0, %c63_i32_252 : i32
    %761 = arith.index_cast %760 : i32 to index
    %762 = memref.load %arg2[%761] : memref<128xi32, #tpu.memory_space<smem>>
    %763 = arith.index_cast %759 : i32 to index
    %c0_253 = arith.constant 0 : index
    %764 = vector.load %arg3[%763, %c0_253] : memref<10x4xf32, #tpu.memory_space<vmem>>, vector<1x4xf32>
    %765 = arith.index_cast %762 : i32 to index
    %c0_254 = arith.constant 0 : index
    %766 = vector.load %arg4[%765, %c0_254] : memref<12x4xf32, #tpu.memory_space<vmem>>, vector<1x4xf32>
    %767 = arith.mulf %764, %766 : vector<1x4xf32>
    %c63 = arith.constant 63 : index
    %c0_255 = arith.constant 0 : index
    %768 = vector.load %arg6[%c63, %c0_255] : memref<128x4xf32, #tpu.memory_space<vmem>>, vector<1x4xf32>
    tpu.vector_store %arg6[%c63, %c0_255], %767 {strides = array<i32>} : memref<128x4xf32, #tpu.memory_space<vmem>>, vector<1x4xf32>,
    %c64_i32 = arith.constant 64 : i32
    %769 = arith.addi %0, %c64_i32 : i32
    %770 = arith.index_cast %769 : i32 to index
    %771 = memref.load %arg1[%770] : memref<128xi32, #tpu.memory_space<smem>>
    %c64_i32_256 = arith.constant 64 : i32
    %772 = arith.addi %0, %c64_i32_256 : i32
    %773 = arith.index_cast %772 : i32 to index
    %774 = memref.load %arg2[%773] : memref<128xi32, #tpu.memory_space<smem>>
    %775 = arith.index_cast %771 : i32 to index
    %c0_257 = arith.constant 0 : index
    %776 = vector.load %arg3[%775, %c0_257] : memref<10x4xf32, #tpu.memory_space<vmem>>, vector<1x4xf32>
    %777 = arith.index_cast %774 : i32 to index
    %c0_258 = arith.constant 0 : index
    %778 = vector.load %arg4[%777, %c0_258] : memref<12x4xf32, #tpu.memory_space<vmem>>, vector<1x4xf32>
    %779 = arith.mulf %776, %778 : vector<1x4xf32>
    %c64 = arith.constant 64 : index
    %c0_259 = arith.constant 0 : index
    %780 = vector.load %arg6[%c64, %c0_259] : memref<128x4xf32, #tpu.memory_space<vmem>>, vector<1x4xf32>
    tpu.vector_store %arg6[%c64, %c0_259], %779 {strides = array<i32>} : memref<128x4xf32, #tpu.memory_space<vmem>>, vector<1x4xf32>,
    %c65_i32 = arith.constant 65 : i32
    %781 = arith.addi %0, %c65_i32 : i32
    %782 = arith.index_cast %781 : i32 to index
    %783 = memref.load %arg1[%782] : memref<128xi32, #tpu.memory_space<smem>>
    %c65_i32_260 = arith.constant 65 : i32
    %784 = arith.addi %0, %c65_i32_260 : i32
    %785 = arith.index_cast %784 : i32 to index
    %786 = memref.load %arg2[%785] : memref<128xi32, #tpu.memory_space<smem>>
    %787 = arith.index_cast %783 : i32 to index
    %c0_261 = arith.constant 0 : index
    %788 = vector.load %arg3[%787, %c0_261] : memref<10x4xf32, #tpu.memory_space<vmem>>, vector<1x4xf32>
    %789 = arith.index_cast %786 : i32 to index
    %c0_262 = arith.constant 0 : index
    %790 = vector.load %arg4[%789, %c0_262] : memref<12x4xf32, #tpu.memory_space<vmem>>, vector<1x4xf32>
    %791 = arith.mulf %788, %790 : vector<1x4xf32>
    %c65 = arith.constant 65 : index
    %c0_263 = arith.constant 0 : index
    %792 = vector.load %arg6[%c65, %c0_263] : memref<128x4xf32, #tpu.memory_space<vmem>>, vector<1x4xf32>
    tpu.vector_store %arg6[%c65, %c0_263], %791 {strides = array<i32>} : memref<128x4xf32, #tpu.memory_space<vmem>>, vector<1x4xf32>,
    %c66_i32 = arith.constant 66 : i32
    %793 = arith.addi %0, %c66_i32 : i32
    %794 = arith.index_cast %793 : i32 to index
    %795 = memref.load %arg1[%794] : memref<128xi32, #tpu.memory_space<smem>>
    %c66_i32_264 = arith.constant 66 : i32
    %796 = arith.addi %0, %c66_i32_264 : i32
    %797 = arith.index_cast %796 : i32 to index
    %798 = memref.load %arg2[%797] : memref<128xi32, #tpu.memory_space<smem>>
    %799 = arith.index_cast %795 : i32 to index
    %c0_265 = arith.constant 0 : index
    %800 = vector.load %arg3[%799, %c0_265] : memref<10x4xf32, #tpu.memory_space<vmem>>, vector<1x4xf32>
    %801 = arith.index_cast %798 : i32 to index
    %c0_266 = arith.constant 0 : index
    %802 = vector.load %arg4[%801, %c0_266] : memref<12x4xf32, #tpu.memory_space<vmem>>, vector<1x4xf32>
    %803 = arith.mulf %800, %802 : vector<1x4xf32>
    %c66 = arith.constant 66 : index
    %c0_267 = arith.constant 0 : index
    %804 = vector.load %arg6[%c66, %c0_267] : memref<128x4xf32, #tpu.memory_space<vmem>>, vector<1x4xf32>
    tpu.vector_store %arg6[%c66, %c0_267], %803 {strides = array<i32>} : memref<128x4xf32, #tpu.memory_space<vmem>>, vector<1x4xf32>,
    %c67_i32 = arith.constant 67 : i32
    %805 = arith.addi %0, %c67_i32 : i32
    %806 = arith.index_cast %805 : i32 to index
    %807 = memref.load %arg1[%806] : memref<128xi32, #tpu.memory_space<smem>>
    %c67_i32_268 = arith.constant 67 : i32
    %808 = arith.addi %0, %c67_i32_268 : i32
    %809 = arith.index_cast %808 : i32 to index
    %810 = memref.load %arg2[%809] : memref<128xi32, #tpu.memory_space<smem>>
    %811 = arith.index_cast %807 : i32 to index
    %c0_269 = arith.constant 0 : index
    %812 = vector.load %arg3[%811, %c0_269] : memref<10x4xf32, #tpu.memory_space<vmem>>, vector<1x4xf32>
    %813 = arith.index_cast %810 : i32 to index
    %c0_270 = arith.constant 0 : index
    %814 = vector.load %arg4[%813, %c0_270] : memref<12x4xf32, #tpu.memory_space<vmem>>, vector<1x4xf32>
    %815 = arith.mulf %812, %814 : vector<1x4xf32>
    %c67 = arith.constant 67 : index
    %c0_271 = arith.constant 0 : index
    %816 = vector.load %arg6[%c67, %c0_271] : memref<128x4xf32, #tpu.memory_space<vmem>>, vector<1x4xf32>
    tpu.vector_store %arg6[%c67, %c0_271], %815 {strides = array<i32>} : memref<128x4xf32, #tpu.memory_space<vmem>>, vector<1x4xf32>,
    %c68_i32 = arith.constant 68 : i32
    %817 = arith.addi %0, %c68_i32 : i32
    %818 = arith.index_cast %817 : i32 to index
    %819 = memref.load %arg1[%818] : memref<128xi32, #tpu.memory_space<smem>>
    %c68_i32_272 = arith.constant 68 : i32
    %820 = arith.addi %0, %c68_i32_272 : i32
    %821 = arith.index_cast %820 : i32 to index
    %822 = memref.load %arg2[%821] : memref<128xi32, #tpu.memory_space<smem>>
    %823 = arith.index_cast %819 : i32 to index
    %c0_273 = arith.constant 0 : index
    %824 = vector.load %arg3[%823, %c0_273] : memref<10x4xf32, #tpu.memory_space<vmem>>, vector<1x4xf32>
    %825 = arith.index_cast %822 : i32 to index
    %c0_274 = arith.constant 0 : index
    %826 = vector.load %arg4[%825, %c0_274] : memref<12x4xf32, #tpu.memory_space<vmem>>, vector<1x4xf32>
    %827 = arith.mulf %824, %826 : vector<1x4xf32>
    %c68 = arith.constant 68 : index
    %c0_275 = arith.constant 0 : index
    %828 = vector.load %arg6[%c68, %c0_275] : memref<128x4xf32, #tpu.memory_space<vmem>>, vector<1x4xf32>
    tpu.vector_store %arg6[%c68, %c0_275], %827 {strides = array<i32>} : memref<128x4xf32, #tpu.memory_space<vmem>>, vector<1x4xf32>,
    %c69_i32 = arith.constant 69 : i32
    %829 = arith.addi %0, %c69_i32 : i32
    %830 = arith.index_cast %829 : i32 to index
    %831 = memref.load %arg1[%830] : memref<128xi32, #tpu.memory_space<smem>>
    %c69_i32_276 = arith.constant 69 : i32
    %832 = arith.addi %0, %c69_i32_276 : i32
    %833 = arith.index_cast %832 : i32 to index
    %834 = memref.load %arg2[%833] : memref<128xi32, #tpu.memory_space<smem>>
    %835 = arith.index_cast %831 : i32 to index
    %c0_277 = arith.constant 0 : index
    %836 = vector.load %arg3[%835, %c0_277] : memref<10x4xf32, #tpu.memory_space<vmem>>, vector<1x4xf32>
    %837 = arith.index_cast %834 : i32 to index
    %c0_278 = arith.constant 0 : index
    %838 = vector.load %arg4[%837, %c0_278] : memref<12x4xf32, #tpu.memory_space<vmem>>, vector<1x4xf32>
    %839 = arith.mulf %836, %838 : vector<1x4xf32>
    %c69 = arith.constant 69 : index
    %c0_279 = arith.constant 0 : index
    %840 = vector.load %arg6[%c69, %c0_279] : memref<128x4xf32, #tpu.memory_space<vmem>>, vector<1x4xf32>
    tpu.vector_store %arg6[%c69, %c0_279], %839 {strides = array<i32>} : memref<128x4xf32, #tpu.memory_space<vmem>>, vector<1x4xf32>,
    %c70_i32 = arith.constant 70 : i32
    %841 = arith.addi %0, %c70_i32 : i32
    %842 = arith.index_cast %841 : i32 to index
    %843 = memref.load %arg1[%842] : memref<128xi32, #tpu.memory_space<smem>>
    %c70_i32_280 = arith.constant 70 : i32
    %844 = arith.addi %0, %c70_i32_280 : i32
    %845 = arith.index_cast %844 : i32 to index
    %846 = memref.load %arg2[%845] : memref<128xi32, #tpu.memory_space<smem>>
    %847 = arith.index_cast %843 : i32 to index
    %c0_281 = arith.constant 0 : index
    %848 = vector.load %arg3[%847, %c0_281] : memref<10x4xf32, #tpu.memory_space<vmem>>, vector<1x4xf32>
    %849 = arith.index_cast %846 : i32 to index
    %c0_282 = arith.constant 0 : index
    %850 = vector.load %arg4[%849, %c0_282] : memref<12x4xf32, #tpu.memory_space<vmem>>, vector<1x4xf32>
    %851 = arith.mulf %848, %850 : vector<1x4xf32>
    %c70 = arith.constant 70 : index
    %c0_283 = arith.constant 0 : index
    %852 = vector.load %arg6[%c70, %c0_283] : memref<128x4xf32, #tpu.memory_space<vmem>>, vector<1x4xf32>
    tpu.vector_store %arg6[%c70, %c0_283], %851 {strides = array<i32>} : memref<128x4xf32, #tpu.memory_space<vmem>>, vector<1x4xf32>,
    %c71_i32 = arith.constant 71 : i32
    %853 = arith.addi %0, %c71_i32 : i32
    %854 = arith.index_cast %853 : i32 to index
    %855 = memref.load %arg1[%854] : memref<128xi32, #tpu.memory_space<smem>>
    %c71_i32_284 = arith.constant 71 : i32
    %856 = arith.addi %0, %c71_i32_284 : i32
    %857 = arith.index_cast %856 : i32 to index
    %858 = memref.load %arg2[%857] : memref<128xi32, #tpu.memory_space<smem>>
    %859 = arith.index_cast %855 : i32 to index
    %c0_285 = arith.constant 0 : index
    %860 = vector.load %arg3[%859, %c0_285] : memref<10x4xf32, #tpu.memory_space<vmem>>, vector<1x4xf32>
    %861 = arith.index_cast %858 : i32 to index
    %c0_286 = arith.constant 0 : index
    %862 = vector.load %arg4[%861, %c0_286] : memref<12x4xf32, #tpu.memory_space<vmem>>, vector<1x4xf32>
    %863 = arith.mulf %860, %862 : vector<1x4xf32>
    %c71 = arith.constant 71 : index
    %c0_287 = arith.constant 0 : index
    %864 = vector.load %arg6[%c71, %c0_287] : memref<128x4xf32, #tpu.memory_space<vmem>>, vector<1x4xf32>
    tpu.vector_store %arg6[%c71, %c0_287], %863 {strides = array<i32>} : memref<128x4xf32, #tpu.memory_space<vmem>>, vector<1x4xf32>,
    %c72_i32 = arith.constant 72 : i32
    %865 = arith.addi %0, %c72_i32 : i32
    %866 = arith.index_cast %865 : i32 to index
    %867 = memref.load %arg1[%866] : memref<128xi32, #tpu.memory_space<smem>>
    %c72_i32_288 = arith.constant 72 : i32
    %868 = arith.addi %0, %c72_i32_288 : i32
    %869 = arith.index_cast %868 : i32 to index
    %870 = memref.load %arg2[%869] : memref<128xi32, #tpu.memory_space<smem>>
    %871 = arith.index_cast %867 : i32 to index
    %c0_289 = arith.constant 0 : index
    %872 = vector.load %arg3[%871, %c0_289] : memref<10x4xf32, #tpu.memory_space<vmem>>, vector<1x4xf32>
    %873 = arith.index_cast %870 : i32 to index
    %c0_290 = arith.constant 0 : index
    %874 = vector.load %arg4[%873, %c0_290] : memref<12x4xf32, #tpu.memory_space<vmem>>, vector<1x4xf32>
    %875 = arith.mulf %872, %874 : vector<1x4xf32>
    %c72 = arith.constant 72 : index
    %c0_291 = arith.constant 0 : index
    %876 = vector.load %arg6[%c72, %c0_291] : memref<128x4xf32, #tpu.memory_space<vmem>>, vector<1x4xf32>
    tpu.vector_store %arg6[%c72, %c0_291], %875 {strides = array<i32>} : memref<128x4xf32, #tpu.memory_space<vmem>>, vector<1x4xf32>,
    %c73_i32 = arith.constant 73 : i32
    %877 = arith.addi %0, %c73_i32 : i32
    %878 = arith.index_cast %877 : i32 to index
    %879 = memref.load %arg1[%878] : memref<128xi32, #tpu.memory_space<smem>>
    %c73_i32_292 = arith.constant 73 : i32
    %880 = arith.addi %0, %c73_i32_292 : i32
    %881 = arith.index_cast %880 : i32 to index
    %882 = memref.load %arg2[%881] : memref<128xi32, #tpu.memory_space<smem>>
    %883 = arith.index_cast %879 : i32 to index
    %c0_293 = arith.constant 0 : index
    %884 = vector.load %arg3[%883, %c0_293] : memref<10x4xf32, #tpu.memory_space<vmem>>, vector<1x4xf32>
    %885 = arith.index_cast %882 : i32 to index
    %c0_294 = arith.constant 0 : index
    %886 = vector.load %arg4[%885, %c0_294] : memref<12x4xf32, #tpu.memory_space<vmem>>, vector<1x4xf32>
    %887 = arith.mulf %884, %886 : vector<1x4xf32>
    %c73 = arith.constant 73 : index
    %c0_295 = arith.constant 0 : index
    %888 = vector.load %arg6[%c73, %c0_295] : memref<128x4xf32, #tpu.memory_space<vmem>>, vector<1x4xf32>
    tpu.vector_store %arg6[%c73, %c0_295], %887 {strides = array<i32>} : memref<128x4xf32, #tpu.memory_space<vmem>>, vector<1x4xf32>,
    %c74_i32 = arith.constant 74 : i32
    %889 = arith.addi %0, %c74_i32 : i32
    %890 = arith.index_cast %889 : i32 to index
    %891 = memref.load %arg1[%890] : memref<128xi32, #tpu.memory_space<smem>>
    %c74_i32_296 = arith.constant 74 : i32
    %892 = arith.addi %0, %c74_i32_296 : i32
    %893 = arith.index_cast %892 : i32 to index
    %894 = memref.load %arg2[%893] : memref<128xi32, #tpu.memory_space<smem>>
    %895 = arith.index_cast %891 : i32 to index
    %c0_297 = arith.constant 0 : index
    %896 = vector.load %arg3[%895, %c0_297] : memref<10x4xf32, #tpu.memory_space<vmem>>, vector<1x4xf32>
    %897 = arith.index_cast %894 : i32 to index
    %c0_298 = arith.constant 0 : index
    %898 = vector.load %arg4[%897, %c0_298] : memref<12x4xf32, #tpu.memory_space<vmem>>, vector<1x4xf32>
    %899 = arith.mulf %896, %898 : vector<1x4xf32>
    %c74 = arith.constant 74 : index
    %c0_299 = arith.constant 0 : index
    %900 = vector.load %arg6[%c74, %c0_299] : memref<128x4xf32, #tpu.memory_space<vmem>>, vector<1x4xf32>
    tpu.vector_store %arg6[%c74, %c0_299], %899 {strides = array<i32>} : memref<128x4xf32, #tpu.memory_space<vmem>>, vector<1x4xf32>,
    %c75_i32 = arith.constant 75 : i32
    %901 = arith.addi %0, %c75_i32 : i32
    %902 = arith.index_cast %901 : i32 to index
    %903 = memref.load %arg1[%902] : memref<128xi32, #tpu.memory_space<smem>>
    %c75_i32_300 = arith.constant 75 : i32
    %904 = arith.addi %0, %c75_i32_300 : i32
    %905 = arith.index_cast %904 : i32 to index
    %906 = memref.load %arg2[%905] : memref<128xi32, #tpu.memory_space<smem>>
    %907 = arith.index_cast %903 : i32 to index
    %c0_301 = arith.constant 0 : index
    %908 = vector.load %arg3[%907, %c0_301] : memref<10x4xf32, #tpu.memory_space<vmem>>, vector<1x4xf32>
    %909 = arith.index_cast %906 : i32 to index
    %c0_302 = arith.constant 0 : index
    %910 = vector.load %arg4[%909, %c0_302] : memref<12x4xf32, #tpu.memory_space<vmem>>, vector<1x4xf32>
    %911 = arith.mulf %908, %910 : vector<1x4xf32>
    %c75 = arith.constant 75 : index
    %c0_303 = arith.constant 0 : index
    %912 = vector.load %arg6[%c75, %c0_303] : memref<128x4xf32, #tpu.memory_space<vmem>>, vector<1x4xf32>
    tpu.vector_store %arg6[%c75, %c0_303], %911 {strides = array<i32>} : memref<128x4xf32, #tpu.memory_space<vmem>>, vector<1x4xf32>,
    %c76_i32 = arith.constant 76 : i32
    %913 = arith.addi %0, %c76_i32 : i32
    %914 = arith.index_cast %913 : i32 to index
    %915 = memref.load %arg1[%914] : memref<128xi32, #tpu.memory_space<smem>>
    %c76_i32_304 = arith.constant 76 : i32
    %916 = arith.addi %0, %c76_i32_304 : i32
    %917 = arith.index_cast %916 : i32 to index
    %918 = memref.load %arg2[%917] : memref<128xi32, #tpu.memory_space<smem>>
    %919 = arith.index_cast %915 : i32 to index
    %c0_305 = arith.constant 0 : index
    %920 = vector.load %arg3[%919, %c0_305] : memref<10x4xf32, #tpu.memory_space<vmem>>, vector<1x4xf32>
    %921 = arith.index_cast %918 : i32 to index
    %c0_306 = arith.constant 0 : index
    %922 = vector.load %arg4[%921, %c0_306] : memref<12x4xf32, #tpu.memory_space<vmem>>, vector<1x4xf32>
    %923 = arith.mulf %920, %922 : vector<1x4xf32>
    %c76 = arith.constant 76 : index
    %c0_307 = arith.constant 0 : index
    %924 = vector.load %arg6[%c76, %c0_307] : memref<128x4xf32, #tpu.memory_space<vmem>>, vector<1x4xf32>
    tpu.vector_store %arg6[%c76, %c0_307], %923 {strides = array<i32>} : memref<128x4xf32, #tpu.memory_space<vmem>>, vector<1x4xf32>,
    %c77_i32 = arith.constant 77 : i32
    %925 = arith.addi %0, %c77_i32 : i32
    %926 = arith.index_cast %925 : i32 to index
    %927 = memref.load %arg1[%926] : memref<128xi32, #tpu.memory_space<smem>>
    %c77_i32_308 = arith.constant 77 : i32
    %928 = arith.addi %0, %c77_i32_308 : i32
    %929 = arith.index_cast %928 : i32 to index
    %930 = memref.load %arg2[%929] : memref<128xi32, #tpu.memory_space<smem>>
    %931 = arith.index_cast %927 : i32 to index
    %c0_309 = arith.constant 0 : index
    %932 = vector.load %arg3[%931, %c0_309] : memref<10x4xf32, #tpu.memory_space<vmem>>, vector<1x4xf32>
    %933 = arith.index_cast %930 : i32 to index
    %c0_310 = arith.constant 0 : index
    %934 = vector.load %arg4[%933, %c0_310] : memref<12x4xf32, #tpu.memory_space<vmem>>, vector<1x4xf32>
    %935 = arith.mulf %932, %934 : vector<1x4xf32>
    %c77 = arith.constant 77 : index
    %c0_311 = arith.constant 0 : index
    %936 = vector.load %arg6[%c77, %c0_311] : memref<128x4xf32, #tpu.memory_space<vmem>>, vector<1x4xf32>
    tpu.vector_store %arg6[%c77, %c0_311], %935 {strides = array<i32>} : memref<128x4xf32, #tpu.memory_space<vmem>>, vector<1x4xf32>,
    %c78_i32 = arith.constant 78 : i32
    %937 = arith.addi %0, %c78_i32 : i32
    %938 = arith.index_cast %937 : i32 to index
    %939 = memref.load %arg1[%938] : memref<128xi32, #tpu.memory_space<smem>>
    %c78_i32_312 = arith.constant 78 : i32
    %940 = arith.addi %0, %c78_i32_312 : i32
    %941 = arith.index_cast %940 : i32 to index
    %942 = memref.load %arg2[%941] : memref<128xi32, #tpu.memory_space<smem>>
    %943 = arith.index_cast %939 : i32 to index
    %c0_313 = arith.constant 0 : index
    %944 = vector.load %arg3[%943, %c0_313] : memref<10x4xf32, #tpu.memory_space<vmem>>, vector<1x4xf32>
    %945 = arith.index_cast %942 : i32 to index
    %c0_314 = arith.constant 0 : index
    %946 = vector.load %arg4[%945, %c0_314] : memref<12x4xf32, #tpu.memory_space<vmem>>, vector<1x4xf32>
    %947 = arith.mulf %944, %946 : vector<1x4xf32>
    %c78 = arith.constant 78 : index
    %c0_315 = arith.constant 0 : index
    %948 = vector.load %arg6[%c78, %c0_315] : memref<128x4xf32, #tpu.memory_space<vmem>>, vector<1x4xf32>
    tpu.vector_store %arg6[%c78, %c0_315], %947 {strides = array<i32>} : memref<128x4xf32, #tpu.memory_space<vmem>>, vector<1x4xf32>,
    %c79_i32 = arith.constant 79 : i32
    %949 = arith.addi %0, %c79_i32 : i32
    %950 = arith.index_cast %949 : i32 to index
    %951 = memref.load %arg1[%950] : memref<128xi32, #tpu.memory_space<smem>>
    %c79_i32_316 = arith.constant 79 : i32
    %952 = arith.addi %0, %c79_i32_316 : i32
    %953 = arith.index_cast %952 : i32 to index
    %954 = memref.load %arg2[%953] : memref<128xi32, #tpu.memory_space<smem>>
    %955 = arith.index_cast %951 : i32 to index
    %c0_317 = arith.constant 0 : index
    %956 = vector.load %arg3[%955, %c0_317] : memref<10x4xf32, #tpu.memory_space<vmem>>, vector<1x4xf32>
    %957 = arith.index_cast %954 : i32 to index
    %c0_318 = arith.constant 0 : index
    %958 = vector.load %arg4[%957, %c0_318] : memref<12x4xf32, #tpu.memory_space<vmem>>, vector<1x4xf32>
    %959 = arith.mulf %956, %958 : vector<1x4xf32>
    %c79 = arith.constant 79 : index
    %c0_319 = arith.constant 0 : index
    %960 = vector.load %arg6[%c79, %c0_319] : memref<128x4xf32, #tpu.memory_space<vmem>>, vector<1x4xf32>
    tpu.vector_store %arg6[%c79, %c0_319], %959 {strides = array<i32>} : memref<128x4xf32, #tpu.memory_space<vmem>>, vector<1x4xf32>,
    %c80_i32 = arith.constant 80 : i32
    %961 = arith.addi %0, %c80_i32 : i32
    %962 = arith.index_cast %961 : i32 to index
    %963 = memref.load %arg1[%962] : memref<128xi32, #tpu.memory_space<smem>>
    %c80_i32_320 = arith.constant 80 : i32
    %964 = arith.addi %0, %c80_i32_320 : i32
    %965 = arith.index_cast %964 : i32 to index
    %966 = memref.load %arg2[%965] : memref<128xi32, #tpu.memory_space<smem>>
    %967 = arith.index_cast %963 : i32 to index
    %c0_321 = arith.constant 0 : index
    %968 = vector.load %arg3[%967, %c0_321] : memref<10x4xf32, #tpu.memory_space<vmem>>, vector<1x4xf32>
    %969 = arith.index_cast %966 : i32 to index
    %c0_322 = arith.constant 0 : index
    %970 = vector.load %arg4[%969, %c0_322] : memref<12x4xf32, #tpu.memory_space<vmem>>, vector<1x4xf32>
    %971 = arith.mulf %968, %970 : vector<1x4xf32>
    %c80 = arith.constant 80 : index
    %c0_323 = arith.constant 0 : index
    %972 = vector.load %arg6[%c80, %c0_323] : memref<128x4xf32, #tpu.memory_space<vmem>>, vector<1x4xf32>
    tpu.vector_store %arg6[%c80, %c0_323], %971 {strides = array<i32>} : memref<128x4xf32, #tpu.memory_space<vmem>>, vector<1x4xf32>,
    %c81_i32 = arith.constant 81 : i32
    %973 = arith.addi %0, %c81_i32 : i32
    %974 = arith.index_cast %973 : i32 to index
    %975 = memref.load %arg1[%974] : memref<128xi32, #tpu.memory_space<smem>>
    %c81_i32_324 = arith.constant 81 : i32
    %976 = arith.addi %0, %c81_i32_324 : i32
    %977 = arith.index_cast %976 : i32 to index
    %978 = memref.load %arg2[%977] : memref<128xi32, #tpu.memory_space<smem>>
    %979 = arith.index_cast %975 : i32 to index
    %c0_325 = arith.constant 0 : index
    %980 = vector.load %arg3[%979, %c0_325] : memref<10x4xf32, #tpu.memory_space<vmem>>, vector<1x4xf32>
    %981 = arith.index_cast %978 : i32 to index
    %c0_326 = arith.constant 0 : index
    %982 = vector.load %arg4[%981, %c0_326] : memref<12x4xf32, #tpu.memory_space<vmem>>, vector<1x4xf32>
    %983 = arith.mulf %980, %982 : vector<1x4xf32>
    %c81 = arith.constant 81 : index
    %c0_327 = arith.constant 0 : index
    %984 = vector.load %arg6[%c81, %c0_327] : memref<128x4xf32, #tpu.memory_space<vmem>>, vector<1x4xf32>
    tpu.vector_store %arg6[%c81, %c0_327], %983 {strides = array<i32>} : memref<128x4xf32, #tpu.memory_space<vmem>>, vector<1x4xf32>,
    %c82_i32 = arith.constant 82 : i32
    %985 = arith.addi %0, %c82_i32 : i32
    %986 = arith.index_cast %985 : i32 to index
    %987 = memref.load %arg1[%986] : memref<128xi32, #tpu.memory_space<smem>>
    %c82_i32_328 = arith.constant 82 : i32
    %988 = arith.addi %0, %c82_i32_328 : i32
    %989 = arith.index_cast %988 : i32 to index
    %990 = memref.load %arg2[%989] : memref<128xi32, #tpu.memory_space<smem>>
    %991 = arith.index_cast %987 : i32 to index
    %c0_329 = arith.constant 0 : index
    %992 = vector.load %arg3[%991, %c0_329] : memref<10x4xf32, #tpu.memory_space<vmem>>, vector<1x4xf32>
    %993 = arith.index_cast %990 : i32 to index
    %c0_330 = arith.constant 0 : index
    %994 = vector.load %arg4[%993, %c0_330] : memref<12x4xf32, #tpu.memory_space<vmem>>, vector<1x4xf32>
    %995 = arith.mulf %992, %994 : vector<1x4xf32>
    %c82 = arith.constant 82 : index
    %c0_331 = arith.constant 0 : index
    %996 = vector.load %arg6[%c82, %c0_331] : memref<128x4xf32, #tpu.memory_space<vmem>>, vector<1x4xf32>
    tpu.vector_store %arg6[%c82, %c0_331], %995 {strides = array<i32>} : memref<128x4xf32, #tpu.memory_space<vmem>>, vector<1x4xf32>,
    %c83_i32 = arith.constant 83 : i32
    %997 = arith.addi %0, %c83_i32 : i32
    %998 = arith.index_cast %997 : i32 to index
    %999 = memref.load %arg1[%998] : memref<128xi32, #tpu.memory_space<smem>>
    %c83_i32_332 = arith.constant 83 : i32
    %1000 = arith.addi %0, %c83_i32_332 : i32
    %1001 = arith.index_cast %1000 : i32 to index
    %1002 = memref.load %arg2[%1001] : memref<128xi32, #tpu.memory_space<smem>>
    %1003 = arith.index_cast %999 : i32 to index
    %c0_333 = arith.constant 0 : index
    %1004 = vector.load %arg3[%1003, %c0_333] : memref<10x4xf32, #tpu.memory_space<vmem>>, vector<1x4xf32>
    %1005 = arith.index_cast %1002 : i32 to index
    %c0_334 = arith.constant 0 : index
    %1006 = vector.load %arg4[%1005, %c0_334] : memref<12x4xf32, #tpu.memory_space<vmem>>, vector<1x4xf32>
    %1007 = arith.mulf %1004, %1006 : vector<1x4xf32>
    %c83 = arith.constant 83 : index
    %c0_335 = arith.constant 0 : index
    %1008 = vector.load %arg6[%c83, %c0_335] : memref<128x4xf32, #tpu.memory_space<vmem>>, vector<1x4xf32>
    tpu.vector_store %arg6[%c83, %c0_335], %1007 {strides = array<i32>} : memref<128x4xf32, #tpu.memory_space<vmem>>, vector<1x4xf32>,
    %c84_i32 = arith.constant 84 : i32
    %1009 = arith.addi %0, %c84_i32 : i32
    %1010 = arith.index_cast %1009 : i32 to index
    %1011 = memref.load %arg1[%1010] : memref<128xi32, #tpu.memory_space<smem>>
    %c84_i32_336 = arith.constant 84 : i32
    %1012 = arith.addi %0, %c84_i32_336 : i32
    %1013 = arith.index_cast %1012 : i32 to index
    %1014 = memref.load %arg2[%1013] : memref<128xi32, #tpu.memory_space<smem>>
    %1015 = arith.index_cast %1011 : i32 to index
    %c0_337 = arith.constant 0 : index
    %1016 = vector.load %arg3[%1015, %c0_337] : memref<10x4xf32, #tpu.memory_space<vmem>>, vector<1x4xf32>
    %1017 = arith.index_cast %1014 : i32 to index
    %c0_338 = arith.constant 0 : index
    %1018 = vector.load %arg4[%1017, %c0_338] : memref<12x4xf32, #tpu.memory_space<vmem>>, vector<1x4xf32>
    %1019 = arith.mulf %1016, %1018 : vector<1x4xf32>
    %c84 = arith.constant 84 : index
    %c0_339 = arith.constant 0 : index
    %1020 = vector.load %arg6[%c84, %c0_339] : memref<128x4xf32, #tpu.memory_space<vmem>>, vector<1x4xf32>
    tpu.vector_store %arg6[%c84, %c0_339], %1019 {strides = array<i32>} : memref<128x4xf32, #tpu.memory_space<vmem>>, vector<1x4xf32>,
    %c85_i32 = arith.constant 85 : i32
    %1021 = arith.addi %0, %c85_i32 : i32
    %1022 = arith.index_cast %1021 : i32 to index
    %1023 = memref.load %arg1[%1022] : memref<128xi32, #tpu.memory_space<smem>>
    %c85_i32_340 = arith.constant 85 : i32
    %1024 = arith.addi %0, %c85_i32_340 : i32
    %1025 = arith.index_cast %1024 : i32 to index
    %1026 = memref.load %arg2[%1025] : memref<128xi32, #tpu.memory_space<smem>>
    %1027 = arith.index_cast %1023 : i32 to index
    %c0_341 = arith.constant 0 : index
    %1028 = vector.load %arg3[%1027, %c0_341] : memref<10x4xf32, #tpu.memory_space<vmem>>, vector<1x4xf32>
    %1029 = arith.index_cast %1026 : i32 to index
    %c0_342 = arith.constant 0 : index
    %1030 = vector.load %arg4[%1029, %c0_342] : memref<12x4xf32, #tpu.memory_space<vmem>>, vector<1x4xf32>
    %1031 = arith.mulf %1028, %1030 : vector<1x4xf32>
    %c85 = arith.constant 85 : index
    %c0_343 = arith.constant 0 : index
    %1032 = vector.load %arg6[%c85, %c0_343] : memref<128x4xf32, #tpu.memory_space<vmem>>, vector<1x4xf32>
    tpu.vector_store %arg6[%c85, %c0_343], %1031 {strides = array<i32>} : memref<128x4xf32, #tpu.memory_space<vmem>>, vector<1x4xf32>,
    %c86_i32 = arith.constant 86 : i32
    %1033 = arith.addi %0, %c86_i32 : i32
    %1034 = arith.index_cast %1033 : i32 to index
    %1035 = memref.load %arg1[%1034] : memref<128xi32, #tpu.memory_space<smem>>
    %c86_i32_344 = arith.constant 86 : i32
    %1036 = arith.addi %0, %c86_i32_344 : i32
    %1037 = arith.index_cast %1036 : i32 to index
    %1038 = memref.load %arg2[%1037] : memref<128xi32, #tpu.memory_space<smem>>
    %1039 = arith.index_cast %1035 : i32 to index
    %c0_345 = arith.constant 0 : index
    %1040 = vector.load %arg3[%1039, %c0_345] : memref<10x4xf32, #tpu.memory_space<vmem>>, vector<1x4xf32>
    %1041 = arith.index_cast %1038 : i32 to index
    %c0_346 = arith.constant 0 : index
    %1042 = vector.load %arg4[%1041, %c0_346] : memref<12x4xf32, #tpu.memory_space<vmem>>, vector<1x4xf32>
    %1043 = arith.mulf %1040, %1042 : vector<1x4xf32>
    %c86 = arith.constant 86 : index
    %c0_347 = arith.constant 0 : index
    %1044 = vector.load %arg6[%c86, %c0_347] : memref<128x4xf32, #tpu.memory_space<vmem>>, vector<1x4xf32>
    tpu.vector_store %arg6[%c86, %c0_347], %1043 {strides = array<i32>} : memref<128x4xf32, #tpu.memory_space<vmem>>, vector<1x4xf32>,
    %c87_i32 = arith.constant 87 : i32
    %1045 = arith.addi %0, %c87_i32 : i32
    %1046 = arith.index_cast %1045 : i32 to index
    %1047 = memref.load %arg1[%1046] : memref<128xi32, #tpu.memory_space<smem>>
    %c87_i32_348 = arith.constant 87 : i32
    %1048 = arith.addi %0, %c87_i32_348 : i32
    %1049 = arith.index_cast %1048 : i32 to index
    %1050 = memref.load %arg2[%1049] : memref<128xi32, #tpu.memory_space<smem>>
    %1051 = arith.index_cast %1047 : i32 to index
    %c0_349 = arith.constant 0 : index
    %1052 = vector.load %arg3[%1051, %c0_349] : memref<10x4xf32, #tpu.memory_space<vmem>>, vector<1x4xf32>
    %1053 = arith.index_cast %1050 : i32 to index
    %c0_350 = arith.constant 0 : index
    %1054 = vector.load %arg4[%1053, %c0_350] : memref<12x4xf32, #tpu.memory_space<vmem>>, vector<1x4xf32>
    %1055 = arith.mulf %1052, %1054 : vector<1x4xf32>
    %c87 = arith.constant 87 : index
    %c0_351 = arith.constant 0 : index
    %1056 = vector.load %arg6[%c87, %c0_351] : memref<128x4xf32, #tpu.memory_space<vmem>>, vector<1x4xf32>
    tpu.vector_store %arg6[%c87, %c0_351], %1055 {strides = array<i32>} : memref<128x4xf32, #tpu.memory_space<vmem>>, vector<1x4xf32>,
    %c88_i32 = arith.constant 88 : i32
    %1057 = arith.addi %0, %c88_i32 : i32
    %1058 = arith.index_cast %1057 : i32 to index
    %1059 = memref.load %arg1[%1058] : memref<128xi32, #tpu.memory_space<smem>>
    %c88_i32_352 = arith.constant 88 : i32
    %1060 = arith.addi %0, %c88_i32_352 : i32
    %1061 = arith.index_cast %1060 : i32 to index
    %1062 = memref.load %arg2[%1061] : memref<128xi32, #tpu.memory_space<smem>>
    %1063 = arith.index_cast %1059 : i32 to index
    %c0_353 = arith.constant 0 : index
    %1064 = vector.load %arg3[%1063, %c0_353] : memref<10x4xf32, #tpu.memory_space<vmem>>, vector<1x4xf32>
    %1065 = arith.index_cast %1062 : i32 to index
    %c0_354 = arith.constant 0 : index
    %1066 = vector.load %arg4[%1065, %c0_354] : memref<12x4xf32, #tpu.memory_space<vmem>>, vector<1x4xf32>
    %1067 = arith.mulf %1064, %1066 : vector<1x4xf32>
    %c88 = arith.constant 88 : index
    %c0_355 = arith.constant 0 : index
    %1068 = vector.load %arg6[%c88, %c0_355] : memref<128x4xf32, #tpu.memory_space<vmem>>, vector<1x4xf32>
    tpu.vector_store %arg6[%c88, %c0_355], %1067 {strides = array<i32>} : memref<128x4xf32, #tpu.memory_space<vmem>>, vector<1x4xf32>,
    %c89_i32 = arith.constant 89 : i32
    %1069 = arith.addi %0, %c89_i32 : i32
    %1070 = arith.index_cast %1069 : i32 to index
    %1071 = memref.load %arg1[%1070] : memref<128xi32, #tpu.memory_space<smem>>
    %c89_i32_356 = arith.constant 89 : i32
    %1072 = arith.addi %0, %c89_i32_356 : i32
    %1073 = arith.index_cast %1072 : i32 to index
    %1074 = memref.load %arg2[%1073] : memref<128xi32, #tpu.memory_space<smem>>
    %1075 = arith.index_cast %1071 : i32 to index
    %c0_357 = arith.constant 0 : index
    %1076 = vector.load %arg3[%1075, %c0_357] : memref<10x4xf32, #tpu.memory_space<vmem>>, vector<1x4xf32>
    %1077 = arith.index_cast %1074 : i32 to index
    %c0_358 = arith.constant 0 : index
    %1078 = vector.load %arg4[%1077, %c0_358] : memref<12x4xf32, #tpu.memory_space<vmem>>, vector<1x4xf32>
    %1079 = arith.mulf %1076, %1078 : vector<1x4xf32>
    %c89 = arith.constant 89 : index
    %c0_359 = arith.constant 0 : index
    %1080 = vector.load %arg6[%c89, %c0_359] : memref<128x4xf32, #tpu.memory_space<vmem>>, vector<1x4xf32>
    tpu.vector_store %arg6[%c89, %c0_359], %1079 {strides = array<i32>} : memref<128x4xf32, #tpu.memory_space<vmem>>, vector<1x4xf32>,
    %c90_i32 = arith.constant 90 : i32
    %1081 = arith.addi %0, %c90_i32 : i32
    %1082 = arith.index_cast %1081 : i32 to index
    %1083 = memref.load %arg1[%1082] : memref<128xi32, #tpu.memory_space<smem>>
    %c90_i32_360 = arith.constant 90 : i32
    %1084 = arith.addi %0, %c90_i32_360 : i32
    %1085 = arith.index_cast %1084 : i32 to index
    %1086 = memref.load %arg2[%1085] : memref<128xi32, #tpu.memory_space<smem>>
    %1087 = arith.index_cast %1083 : i32 to index
    %c0_361 = arith.constant 0 : index
    %1088 = vector.load %arg3[%1087, %c0_361] : memref<10x4xf32, #tpu.memory_space<vmem>>, vector<1x4xf32>
    %1089 = arith.index_cast %1086 : i32 to index
    %c0_362 = arith.constant 0 : index
    %1090 = vector.load %arg4[%1089, %c0_362] : memref<12x4xf32, #tpu.memory_space<vmem>>, vector<1x4xf32>
    %1091 = arith.mulf %1088, %1090 : vector<1x4xf32>
    %c90 = arith.constant 90 : index
    %c0_363 = arith.constant 0 : index
    %1092 = vector.load %arg6[%c90, %c0_363] : memref<128x4xf32, #tpu.memory_space<vmem>>, vector<1x4xf32>
    tpu.vector_store %arg6[%c90, %c0_363], %1091 {strides = array<i32>} : memref<128x4xf32, #tpu.memory_space<vmem>>, vector<1x4xf32>,
    %c91_i32 = arith.constant 91 : i32
    %1093 = arith.addi %0, %c91_i32 : i32
    %1094 = arith.index_cast %1093 : i32 to index
    %1095 = memref.load %arg1[%1094] : memref<128xi32, #tpu.memory_space<smem>>
    %c91_i32_364 = arith.constant 91 : i32
    %1096 = arith.addi %0, %c91_i32_364 : i32
    %1097 = arith.index_cast %1096 : i32 to index
    %1098 = memref.load %arg2[%1097] : memref<128xi32, #tpu.memory_space<smem>>
    %1099 = arith.index_cast %1095 : i32 to index
    %c0_365 = arith.constant 0 : index
    %1100 = vector.load %arg3[%1099, %c0_365] : memref<10x4xf32, #tpu.memory_space<vmem>>, vector<1x4xf32>
    %1101 = arith.index_cast %1098 : i32 to index
    %c0_366 = arith.constant 0 : index
    %1102 = vector.load %arg4[%1101, %c0_366] : memref<12x4xf32, #tpu.memory_space<vmem>>, vector<1x4xf32>
    %1103 = arith.mulf %1100, %1102 : vector<1x4xf32>
    %c91 = arith.constant 91 : index
    %c0_367 = arith.constant 0 : index
    %1104 = vector.load %arg6[%c91, %c0_367] : memref<128x4xf32, #tpu.memory_space<vmem>>, vector<1x4xf32>
    tpu.vector_store %arg6[%c91, %c0_367], %1103 {strides = array<i32>} : memref<128x4xf32, #tpu.memory_space<vmem>>, vector<1x4xf32>,
    %c92_i32 = arith.constant 92 : i32
    %1105 = arith.addi %0, %c92_i32 : i32
    %1106 = arith.index_cast %1105 : i32 to index
    %1107 = memref.load %arg1[%1106] : memref<128xi32, #tpu.memory_space<smem>>
    %c92_i32_368 = arith.constant 92 : i32
    %1108 = arith.addi %0, %c92_i32_368 : i32
    %1109 = arith.index_cast %1108 : i32 to index
    %1110 = memref.load %arg2[%1109] : memref<128xi32, #tpu.memory_space<smem>>
    %1111 = arith.index_cast %1107 : i32 to index
    %c0_369 = arith.constant 0 : index
    %1112 = vector.load %arg3[%1111, %c0_369] : memref<10x4xf32, #tpu.memory_space<vmem>>, vector<1x4xf32>
    %1113 = arith.index_cast %1110 : i32 to index
    %c0_370 = arith.constant 0 : index
    %1114 = vector.load %arg4[%1113, %c0_370] : memref<12x4xf32, #tpu.memory_space<vmem>>, vector<1x4xf32>
    %1115 = arith.mulf %1112, %1114 : vector<1x4xf32>
    %c92 = arith.constant 92 : index
    %c0_371 = arith.constant 0 : index
    %1116 = vector.load %arg6[%c92, %c0_371] : memref<128x4xf32, #tpu.memory_space<vmem>>, vector<1x4xf32>
    tpu.vector_store %arg6[%c92, %c0_371], %1115 {strides = array<i32>} : memref<128x4xf32, #tpu.memory_space<vmem>>, vector<1x4xf32>,
    %c93_i32 = arith.constant 93 : i32
    %1117 = arith.addi %0, %c93_i32 : i32
    %1118 = arith.index_cast %1117 : i32 to index
    %1119 = memref.load %arg1[%1118] : memref<128xi32, #tpu.memory_space<smem>>
    %c93_i32_372 = arith.constant 93 : i32
    %1120 = arith.addi %0, %c93_i32_372 : i32
    %1121 = arith.index_cast %1120 : i32 to index
    %1122 = memref.load %arg2[%1121] : memref<128xi32, #tpu.memory_space<smem>>
    %1123 = arith.index_cast %1119 : i32 to index
    %c0_373 = arith.constant 0 : index
    %1124 = vector.load %arg3[%1123, %c0_373] : memref<10x4xf32, #tpu.memory_space<vmem>>, vector<1x4xf32>
    %1125 = arith.index_cast %1122 : i32 to index
    %c0_374 = arith.constant 0 : index
    %1126 = vector.load %arg4[%1125, %c0_374] : memref<12x4xf32, #tpu.memory_space<vmem>>, vector<1x4xf32>
    %1127 = arith.mulf %1124, %1126 : vector<1x4xf32>
    %c93 = arith.constant 93 : index
    %c0_375 = arith.constant 0 : index
    %1128 = vector.load %arg6[%c93, %c0_375] : memref<128x4xf32, #tpu.memory_space<vmem>>, vector<1x4xf32>
    tpu.vector_store %arg6[%c93, %c0_375], %1127 {strides = array<i32>} : memref<128x4xf32, #tpu.memory_space<vmem>>, vector<1x4xf32>,
    %c94_i32 = arith.constant 94 : i32
    %1129 = arith.addi %0, %c94_i32 : i32
    %1130 = arith.index_cast %1129 : i32 to index
    %1131 = memref.load %arg1[%1130] : memref<128xi32, #tpu.memory_space<smem>>
    %c94_i32_376 = arith.constant 94 : i32
    %1132 = arith.addi %0, %c94_i32_376 : i32
    %1133 = arith.index_cast %1132 : i32 to index
    %1134 = memref.load %arg2[%1133] : memref<128xi32, #tpu.memory_space<smem>>
    %1135 = arith.index_cast %1131 : i32 to index
    %c0_377 = arith.constant 0 : index
    %1136 = vector.load %arg3[%1135, %c0_377] : memref<10x4xf32, #tpu.memory_space<vmem>>, vector<1x4xf32>
    %1137 = arith.index_cast %1134 : i32 to index
    %c0_378 = arith.constant 0 : index
    %1138 = vector.load %arg4[%1137, %c0_378] : memref<12x4xf32, #tpu.memory_space<vmem>>, vector<1x4xf32>
    %1139 = arith.mulf %1136, %1138 : vector<1x4xf32>
    %c94 = arith.constant 94 : index
    %c0_379 = arith.constant 0 : index
    %1140 = vector.load %arg6[%c94, %c0_379] : memref<128x4xf32, #tpu.memory_space<vmem>>, vector<1x4xf32>
    tpu.vector_store %arg6[%c94, %c0_379], %1139 {strides = array<i32>} : memref<128x4xf32, #tpu.memory_space<vmem>>, vector<1x4xf32>,
    %c95_i32 = arith.constant 95 : i32
    %1141 = arith.addi %0, %c95_i32 : i32
    %1142 = arith.index_cast %1141 : i32 to index
    %1143 = memref.load %arg1[%1142] : memref<128xi32, #tpu.memory_space<smem>>
    %c95_i32_380 = arith.constant 95 : i32
    %1144 = arith.addi %0, %c95_i32_380 : i32
    %1145 = arith.index_cast %1144 : i32 to index
    %1146 = memref.load %arg2[%1145] : memref<128xi32, #tpu.memory_space<smem>>
    %1147 = arith.index_cast %1143 : i32 to index
    %c0_381 = arith.constant 0 : index
    %1148 = vector.load %arg3[%1147, %c0_381] : memref<10x4xf32, #tpu.memory_space<vmem>>, vector<1x4xf32>
    %1149 = arith.index_cast %1146 : i32 to index
    %c0_382 = arith.constant 0 : index
    %1150 = vector.load %arg4[%1149, %c0_382] : memref<12x4xf32, #tpu.memory_space<vmem>>, vector<1x4xf32>
    %1151 = arith.mulf %1148, %1150 : vector<1x4xf32>
    %c95 = arith.constant 95 : index
    %c0_383 = arith.constant 0 : index
    %1152 = vector.load %arg6[%c95, %c0_383] : memref<128x4xf32, #tpu.memory_space<vmem>>, vector<1x4xf32>
    tpu.vector_store %arg6[%c95, %c0_383], %1151 {strides = array<i32>} : memref<128x4xf32, #tpu.memory_space<vmem>>, vector<1x4xf32>,
    %c96_i32 = arith.constant 96 : i32
    %1153 = arith.addi %0, %c96_i32 : i32
    %1154 = arith.index_cast %1153 : i32 to index
    %1155 = memref.load %arg1[%1154] : memref<128xi32, #tpu.memory_space<smem>>
    %c96_i32_384 = arith.constant 96 : i32
    %1156 = arith.addi %0, %c96_i32_384 : i32
    %1157 = arith.index_cast %1156 : i32 to index
    %1158 = memref.load %arg2[%1157] : memref<128xi32, #tpu.memory_space<smem>>
    %1159 = arith.index_cast %1155 : i32 to index
    %c0_385 = arith.constant 0 : index
    %1160 = vector.load %arg3[%1159, %c0_385] : memref<10x4xf32, #tpu.memory_space<vmem>>, vector<1x4xf32>
    %1161 = arith.index_cast %1158 : i32 to index
    %c0_386 = arith.constant 0 : index
    %1162 = vector.load %arg4[%1161, %c0_386] : memref<12x4xf32, #tpu.memory_space<vmem>>, vector<1x4xf32>
    %1163 = arith.mulf %1160, %1162 : vector<1x4xf32>
    %c96 = arith.constant 96 : index
    %c0_387 = arith.constant 0 : index
    %1164 = vector.load %arg6[%c96, %c0_387] : memref<128x4xf32, #tpu.memory_space<vmem>>, vector<1x4xf32>
    tpu.vector_store %arg6[%c96, %c0_387], %1163 {strides = array<i32>} : memref<128x4xf32, #tpu.memory_space<vmem>>, vector<1x4xf32>,
    %c97_i32 = arith.constant 97 : i32
    %1165 = arith.addi %0, %c97_i32 : i32
    %1166 = arith.index_cast %1165 : i32 to index
    %1167 = memref.load %arg1[%1166] : memref<128xi32, #tpu.memory_space<smem>>
    %c97_i32_388 = arith.constant 97 : i32
    %1168 = arith.addi %0, %c97_i32_388 : i32
    %1169 = arith.index_cast %1168 : i32 to index
    %1170 = memref.load %arg2[%1169] : memref<128xi32, #tpu.memory_space<smem>>
    %1171 = arith.index_cast %1167 : i32 to index
    %c0_389 = arith.constant 0 : index
    %1172 = vector.load %arg3[%1171, %c0_389] : memref<10x4xf32, #tpu.memory_space<vmem>>, vector<1x4xf32>
    %1173 = arith.index_cast %1170 : i32 to index
    %c0_390 = arith.constant 0 : index
    %1174 = vector.load %arg4[%1173, %c0_390] : memref<12x4xf32, #tpu.memory_space<vmem>>, vector<1x4xf32>
    %1175 = arith.mulf %1172, %1174 : vector<1x4xf32>
    %c97 = arith.constant 97 : index
    %c0_391 = arith.constant 0 : index
    %1176 = vector.load %arg6[%c97, %c0_391] : memref<128x4xf32, #tpu.memory_space<vmem>>, vector<1x4xf32>
    tpu.vector_store %arg6[%c97, %c0_391], %1175 {strides = array<i32>} : memref<128x4xf32, #tpu.memory_space<vmem>>, vector<1x4xf32>,
    %c98_i32 = arith.constant 98 : i32
    %1177 = arith.addi %0, %c98_i32 : i32
    %1178 = arith.index_cast %1177 : i32 to index
    %1179 = memref.load %arg1[%1178] : memref<128xi32, #tpu.memory_space<smem>>
    %c98_i32_392 = arith.constant 98 : i32
    %1180 = arith.addi %0, %c98_i32_392 : i32
    %1181 = arith.index_cast %1180 : i32 to index
    %1182 = memref.load %arg2[%1181] : memref<128xi32, #tpu.memory_space<smem>>
    %1183 = arith.index_cast %1179 : i32 to index
    %c0_393 = arith.constant 0 : index
    %1184 = vector.load %arg3[%1183, %c0_393] : memref<10x4xf32, #tpu.memory_space<vmem>>, vector<1x4xf32>
    %1185 = arith.index_cast %1182 : i32 to index
    %c0_394 = arith.constant 0 : index
    %1186 = vector.load %arg4[%1185, %c0_394] : memref<12x4xf32, #tpu.memory_space<vmem>>, vector<1x4xf32>
    %1187 = arith.mulf %1184, %1186 : vector<1x4xf32>
    %c98 = arith.constant 98 : index
    %c0_395 = arith.constant 0 : index
    %1188 = vector.load %arg6[%c98, %c0_395] : memref<128x4xf32, #tpu.memory_space<vmem>>, vector<1x4xf32>
    tpu.vector_store %arg6[%c98, %c0_395], %1187 {strides = array<i32>} : memref<128x4xf32, #tpu.memory_space<vmem>>, vector<1x4xf32>,
    %c99_i32 = arith.constant 99 : i32
    %1189 = arith.addi %0, %c99_i32 : i32
    %1190 = arith.index_cast %1189 : i32 to index
    %1191 = memref.load %arg1[%1190] : memref<128xi32, #tpu.memory_space<smem>>
    %c99_i32_396 = arith.constant 99 : i32
    %1192 = arith.addi %0, %c99_i32_396 : i32
    %1193 = arith.index_cast %1192 : i32 to index
    %1194 = memref.load %arg2[%1193] : memref<128xi32, #tpu.memory_space<smem>>
    %1195 = arith.index_cast %1191 : i32 to index
    %c0_397 = arith.constant 0 : index
    %1196 = vector.load %arg3[%1195, %c0_397] : memref<10x4xf32, #tpu.memory_space<vmem>>, vector<1x4xf32>
    %1197 = arith.index_cast %1194 : i32 to index
    %c0_398 = arith.constant 0 : index
    %1198 = vector.load %arg4[%1197, %c0_398] : memref<12x4xf32, #tpu.memory_space<vmem>>, vector<1x4xf32>
    %1199 = arith.mulf %1196, %1198 : vector<1x4xf32>
    %c99 = arith.constant 99 : index
    %c0_399 = arith.constant 0 : index
    %1200 = vector.load %arg6[%c99, %c0_399] : memref<128x4xf32, #tpu.memory_space<vmem>>, vector<1x4xf32>
    tpu.vector_store %arg6[%c99, %c0_399], %1199 {strides = array<i32>} : memref<128x4xf32, #tpu.memory_space<vmem>>, vector<1x4xf32>,
    %c100_i32 = arith.constant 100 : i32
    %1201 = arith.addi %0, %c100_i32 : i32
    %1202 = arith.index_cast %1201 : i32 to index
    %1203 = memref.load %arg1[%1202] : memref<128xi32, #tpu.memory_space<smem>>
    %c100_i32_400 = arith.constant 100 : i32
    %1204 = arith.addi %0, %c100_i32_400 : i32
    %1205 = arith.index_cast %1204 : i32 to index
    %1206 = memref.load %arg2[%1205] : memref<128xi32, #tpu.memory_space<smem>>
    %1207 = arith.index_cast %1203 : i32 to index
    %c0_401 = arith.constant 0 : index
    %1208 = vector.load %arg3[%1207, %c0_401] : memref<10x4xf32, #tpu.memory_space<vmem>>, vector<1x4xf32>
    %1209 = arith.index_cast %1206 : i32 to index
    %c0_402 = arith.constant 0 : index
    %1210 = vector.load %arg4[%1209, %c0_402] : memref<12x4xf32, #tpu.memory_space<vmem>>, vector<1x4xf32>
    %1211 = arith.mulf %1208, %1210 : vector<1x4xf32>
    %c100 = arith.constant 100 : index
    %c0_403 = arith.constant 0 : index
    %1212 = vector.load %arg6[%c100, %c0_403] : memref<128x4xf32, #tpu.memory_space<vmem>>, vector<1x4xf32>
    tpu.vector_store %arg6[%c100, %c0_403], %1211 {strides = array<i32>} : memref<128x4xf32, #tpu.memory_space<vmem>>, vector<1x4xf32>,
    %c101_i32 = arith.constant 101 : i32
    %1213 = arith.addi %0, %c101_i32 : i32
    %1214 = arith.index_cast %1213 : i32 to index
    %1215 = memref.load %arg1[%1214] : memref<128xi32, #tpu.memory_space<smem>>
    %c101_i32_404 = arith.constant 101 : i32
    %1216 = arith.addi %0, %c101_i32_404 : i32
    %1217 = arith.index_cast %1216 : i32 to index
    %1218 = memref.load %arg2[%1217] : memref<128xi32, #tpu.memory_space<smem>>
    %1219 = arith.index_cast %1215 : i32 to index
    %c0_405 = arith.constant 0 : index
    %1220 = vector.load %arg3[%1219, %c0_405] : memref<10x4xf32, #tpu.memory_space<vmem>>, vector<1x4xf32>
    %1221 = arith.index_cast %1218 : i32 to index
    %c0_406 = arith.constant 0 : index
    %1222 = vector.load %arg4[%1221, %c0_406] : memref<12x4xf32, #tpu.memory_space<vmem>>, vector<1x4xf32>
    %1223 = arith.mulf %1220, %1222 : vector<1x4xf32>
    %c101 = arith.constant 101 : index
    %c0_407 = arith.constant 0 : index
    %1224 = vector.load %arg6[%c101, %c0_407] : memref<128x4xf32, #tpu.memory_space<vmem>>, vector<1x4xf32>
    tpu.vector_store %arg6[%c101, %c0_407], %1223 {strides = array<i32>} : memref<128x4xf32, #tpu.memory_space<vmem>>, vector<1x4xf32>,
    %c102_i32 = arith.constant 102 : i32
    %1225 = arith.addi %0, %c102_i32 : i32
    %1226 = arith.index_cast %1225 : i32 to index
    %1227 = memref.load %arg1[%1226] : memref<128xi32, #tpu.memory_space<smem>>
    %c102_i32_408 = arith.constant 102 : i32
    %1228 = arith.addi %0, %c102_i32_408 : i32
    %1229 = arith.index_cast %1228 : i32 to index
    %1230 = memref.load %arg2[%1229] : memref<128xi32, #tpu.memory_space<smem>>
    %1231 = arith.index_cast %1227 : i32 to index
    %c0_409 = arith.constant 0 : index
    %1232 = vector.load %arg3[%1231, %c0_409] : memref<10x4xf32, #tpu.memory_space<vmem>>, vector<1x4xf32>
    %1233 = arith.index_cast %1230 : i32 to index
    %c0_410 = arith.constant 0 : index
    %1234 = vector.load %arg4[%1233, %c0_410] : memref<12x4xf32, #tpu.memory_space<vmem>>, vector<1x4xf32>
    %1235 = arith.mulf %1232, %1234 : vector<1x4xf32>
    %c102 = arith.constant 102 : index
    %c0_411 = arith.constant 0 : index
    %1236 = vector.load %arg6[%c102, %c0_411] : memref<128x4xf32, #tpu.memory_space<vmem>>, vector<1x4xf32>
    tpu.vector_store %arg6[%c102, %c0_411], %1235 {strides = array<i32>} : memref<128x4xf32, #tpu.memory_space<vmem>>, vector<1x4xf32>,
    %c103_i32 = arith.constant 103 : i32
    %1237 = arith.addi %0, %c103_i32 : i32
    %1238 = arith.index_cast %1237 : i32 to index
    %1239 = memref.load %arg1[%1238] : memref<128xi32, #tpu.memory_space<smem>>
    %c103_i32_412 = arith.constant 103 : i32
    %1240 = arith.addi %0, %c103_i32_412 : i32
    %1241 = arith.index_cast %1240 : i32 to index
    %1242 = memref.load %arg2[%1241] : memref<128xi32, #tpu.memory_space<smem>>
    %1243 = arith.index_cast %1239 : i32 to index
    %c0_413 = arith.constant 0 : index
    %1244 = vector.load %arg3[%1243, %c0_413] : memref<10x4xf32, #tpu.memory_space<vmem>>, vector<1x4xf32>
    %1245 = arith.index_cast %1242 : i32 to index
    %c0_414 = arith.constant 0 : index
    %1246 = vector.load %arg4[%1245, %c0_414] : memref<12x4xf32, #tpu.memory_space<vmem>>, vector<1x4xf32>
    %1247 = arith.mulf %1244, %1246 : vector<1x4xf32>
    %c103 = arith.constant 103 : index
    %c0_415 = arith.constant 0 : index
    %1248 = vector.load %arg6[%c103, %c0_415] : memref<128x4xf32, #tpu.memory_space<vmem>>, vector<1x4xf32>
    tpu.vector_store %arg6[%c103, %c0_415], %1247 {strides = array<i32>} : memref<128x4xf32, #tpu.memory_space<vmem>>, vector<1x4xf32>,
    %c104_i32 = arith.constant 104 : i32
    %1249 = arith.addi %0, %c104_i32 : i32
    %1250 = arith.index_cast %1249 : i32 to index
    %1251 = memref.load %arg1[%1250] : memref<128xi32, #tpu.memory_space<smem>>
    %c104_i32_416 = arith.constant 104 : i32
    %1252 = arith.addi %0, %c104_i32_416 : i32
    %1253 = arith.index_cast %1252 : i32 to index
    %1254 = memref.load %arg2[%1253] : memref<128xi32, #tpu.memory_space<smem>>
    %1255 = arith.index_cast %1251 : i32 to index
    %c0_417 = arith.constant 0 : index
    %1256 = vector.load %arg3[%1255, %c0_417] : memref<10x4xf32, #tpu.memory_space<vmem>>, vector<1x4xf32>
    %1257 = arith.index_cast %1254 : i32 to index
    %c0_418 = arith.constant 0 : index
    %1258 = vector.load %arg4[%1257, %c0_418] : memref<12x4xf32, #tpu.memory_space<vmem>>, vector<1x4xf32>
    %1259 = arith.mulf %1256, %1258 : vector<1x4xf32>
    %c104 = arith.constant 104 : index
    %c0_419 = arith.constant 0 : index
    %1260 = vector.load %arg6[%c104, %c0_419] : memref<128x4xf32, #tpu.memory_space<vmem>>, vector<1x4xf32>
    tpu.vector_store %arg6[%c104, %c0_419], %1259 {strides = array<i32>} : memref<128x4xf32, #tpu.memory_space<vmem>>, vector<1x4xf32>,
    %c105_i32 = arith.constant 105 : i32
    %1261 = arith.addi %0, %c105_i32 : i32
    %1262 = arith.index_cast %1261 : i32 to index
    %1263 = memref.load %arg1[%1262] : memref<128xi32, #tpu.memory_space<smem>>
    %c105_i32_420 = arith.constant 105 : i32
    %1264 = arith.addi %0, %c105_i32_420 : i32
    %1265 = arith.index_cast %1264 : i32 to index
    %1266 = memref.load %arg2[%1265] : memref<128xi32, #tpu.memory_space<smem>>
    %1267 = arith.index_cast %1263 : i32 to index
    %c0_421 = arith.constant 0 : index
    %1268 = vector.load %arg3[%1267, %c0_421] : memref<10x4xf32, #tpu.memory_space<vmem>>, vector<1x4xf32>
    %1269 = arith.index_cast %1266 : i32 to index
    %c0_422 = arith.constant 0 : index
    %1270 = vector.load %arg4[%1269, %c0_422] : memref<12x4xf32, #tpu.memory_space<vmem>>, vector<1x4xf32>
    %1271 = arith.mulf %1268, %1270 : vector<1x4xf32>
    %c105 = arith.constant 105 : index
    %c0_423 = arith.constant 0 : index
    %1272 = vector.load %arg6[%c105, %c0_423] : memref<128x4xf32, #tpu.memory_space<vmem>>, vector<1x4xf32>
    tpu.vector_store %arg6[%c105, %c0_423], %1271 {strides = array<i32>} : memref<128x4xf32, #tpu.memory_space<vmem>>, vector<1x4xf32>,
    %c106_i32 = arith.constant 106 : i32
    %1273 = arith.addi %0, %c106_i32 : i32
    %1274 = arith.index_cast %1273 : i32 to index
    %1275 = memref.load %arg1[%1274] : memref<128xi32, #tpu.memory_space<smem>>
    %c106_i32_424 = arith.constant 106 : i32
    %1276 = arith.addi %0, %c106_i32_424 : i32
    %1277 = arith.index_cast %1276 : i32 to index
    %1278 = memref.load %arg2[%1277] : memref<128xi32, #tpu.memory_space<smem>>
    %1279 = arith.index_cast %1275 : i32 to index
    %c0_425 = arith.constant 0 : index
    %1280 = vector.load %arg3[%1279, %c0_425] : memref<10x4xf32, #tpu.memory_space<vmem>>, vector<1x4xf32>
    %1281 = arith.index_cast %1278 : i32 to index
    %c0_426 = arith.constant 0 : index
    %1282 = vector.load %arg4[%1281, %c0_426] : memref<12x4xf32, #tpu.memory_space<vmem>>, vector<1x4xf32>
    %1283 = arith.mulf %1280, %1282 : vector<1x4xf32>
    %c106 = arith.constant 106 : index
    %c0_427 = arith.constant 0 : index
    %1284 = vector.load %arg6[%c106, %c0_427] : memref<128x4xf32, #tpu.memory_space<vmem>>, vector<1x4xf32>
    tpu.vector_store %arg6[%c106, %c0_427], %1283 {strides = array<i32>} : memref<128x4xf32, #tpu.memory_space<vmem>>, vector<1x4xf32>,
    %c107_i32 = arith.constant 107 : i32
    %1285 = arith.addi %0, %c107_i32 : i32
    %1286 = arith.index_cast %1285 : i32 to index
    %1287 = memref.load %arg1[%1286] : memref<128xi32, #tpu.memory_space<smem>>
    %c107_i32_428 = arith.constant 107 : i32
    %1288 = arith.addi %0, %c107_i32_428 : i32
    %1289 = arith.index_cast %1288 : i32 to index
    %1290 = memref.load %arg2[%1289] : memref<128xi32, #tpu.memory_space<smem>>
    %1291 = arith.index_cast %1287 : i32 to index
    %c0_429 = arith.constant 0 : index
    %1292 = vector.load %arg3[%1291, %c0_429] : memref<10x4xf32, #tpu.memory_space<vmem>>, vector<1x4xf32>
    %1293 = arith.index_cast %1290 : i32 to index
    %c0_430 = arith.constant 0 : index
    %1294 = vector.load %arg4[%1293, %c0_430] : memref<12x4xf32, #tpu.memory_space<vmem>>, vector<1x4xf32>
    %1295 = arith.mulf %1292, %1294 : vector<1x4xf32>
    %c107 = arith.constant 107 : index
    %c0_431 = arith.constant 0 : index
    %1296 = vector.load %arg6[%c107, %c0_431] : memref<128x4xf32, #tpu.memory_space<vmem>>, vector<1x4xf32>
    tpu.vector_store %arg6[%c107, %c0_431], %1295 {strides = array<i32>} : memref<128x4xf32, #tpu.memory_space<vmem>>, vector<1x4xf32>,
    %c108_i32 = arith.constant 108 : i32
    %1297 = arith.addi %0, %c108_i32 : i32
    %1298 = arith.index_cast %1297 : i32 to index
    %1299 = memref.load %arg1[%1298] : memref<128xi32, #tpu.memory_space<smem>>
    %c108_i32_432 = arith.constant 108 : i32
    %1300 = arith.addi %0, %c108_i32_432 : i32
    %1301 = arith.index_cast %1300 : i32 to index
    %1302 = memref.load %arg2[%1301] : memref<128xi32, #tpu.memory_space<smem>>
    %1303 = arith.index_cast %1299 : i32 to index
    %c0_433 = arith.constant 0 : index
    %1304 = vector.load %arg3[%1303, %c0_433] : memref<10x4xf32, #tpu.memory_space<vmem>>, vector<1x4xf32>
    %1305 = arith.index_cast %1302 : i32 to index
    %c0_434 = arith.constant 0 : index
    %1306 = vector.load %arg4[%1305, %c0_434] : memref<12x4xf32, #tpu.memory_space<vmem>>, vector<1x4xf32>
    %1307 = arith.mulf %1304, %1306 : vector<1x4xf32>
    %c108 = arith.constant 108 : index
    %c0_435 = arith.constant 0 : index
    %1308 = vector.load %arg6[%c108, %c0_435] : memref<128x4xf32, #tpu.memory_space<vmem>>, vector<1x4xf32>
    tpu.vector_store %arg6[%c108, %c0_435], %1307 {strides = array<i32>} : memref<128x4xf32, #tpu.memory_space<vmem>>, vector<1x4xf32>,
    %c109_i32 = arith.constant 109 : i32
    %1309 = arith.addi %0, %c109_i32 : i32
    %1310 = arith.index_cast %1309 : i32 to index
    %1311 = memref.load %arg1[%1310] : memref<128xi32, #tpu.memory_space<smem>>
    %c109_i32_436 = arith.constant 109 : i32
    %1312 = arith.addi %0, %c109_i32_436 : i32
    %1313 = arith.index_cast %1312 : i32 to index
    %1314 = memref.load %arg2[%1313] : memref<128xi32, #tpu.memory_space<smem>>
    %1315 = arith.index_cast %1311 : i32 to index
    %c0_437 = arith.constant 0 : index
    %1316 = vector.load %arg3[%1315, %c0_437] : memref<10x4xf32, #tpu.memory_space<vmem>>, vector<1x4xf32>
    %1317 = arith.index_cast %1314 : i32 to index
    %c0_438 = arith.constant 0 : index
    %1318 = vector.load %arg4[%1317, %c0_438] : memref<12x4xf32, #tpu.memory_space<vmem>>, vector<1x4xf32>
    %1319 = arith.mulf %1316, %1318 : vector<1x4xf32>
    %c109 = arith.constant 109 : index
    %c0_439 = arith.constant 0 : index
    %1320 = vector.load %arg6[%c109, %c0_439] : memref<128x4xf32, #tpu.memory_space<vmem>>, vector<1x4xf32>
    tpu.vector_store %arg6[%c109, %c0_439], %1319 {strides = array<i32>} : memref<128x4xf32, #tpu.memory_space<vmem>>, vector<1x4xf32>,
    %c110_i32 = arith.constant 110 : i32
    %1321 = arith.addi %0, %c110_i32 : i32
    %1322 = arith.index_cast %1321 : i32 to index
    %1323 = memref.load %arg1[%1322] : memref<128xi32, #tpu.memory_space<smem>>
    %c110_i32_440 = arith.constant 110 : i32
    %1324 = arith.addi %0, %c110_i32_440 : i32
    %1325 = arith.index_cast %1324 : i32 to index
    %1326 = memref.load %arg2[%1325] : memref<128xi32, #tpu.memory_space<smem>>
    %1327 = arith.index_cast %1323 : i32 to index
    %c0_441 = arith.constant 0 : index
    %1328 = vector.load %arg3[%1327, %c0_441] : memref<10x4xf32, #tpu.memory_space<vmem>>, vector<1x4xf32>
    %1329 = arith.index_cast %1326 : i32 to index
    %c0_442 = arith.constant 0 : index
    %1330 = vector.load %arg4[%1329, %c0_442] : memref<12x4xf32, #tpu.memory_space<vmem>>, vector<1x4xf32>
    %1331 = arith.mulf %1328, %1330 : vector<1x4xf32>
    %c110 = arith.constant 110 : index
    %c0_443 = arith.constant 0 : index
    %1332 = vector.load %arg6[%c110, %c0_443] : memref<128x4xf32, #tpu.memory_space<vmem>>, vector<1x4xf32>
    tpu.vector_store %arg6[%c110, %c0_443], %1331 {strides = array<i32>} : memref<128x4xf32, #tpu.memory_space<vmem>>, vector<1x4xf32>,
    %c111_i32 = arith.constant 111 : i32
    %1333 = arith.addi %0, %c111_i32 : i32
    %1334 = arith.index_cast %1333 : i32 to index
    %1335 = memref.load %arg1[%1334] : memref<128xi32, #tpu.memory_space<smem>>
    %c111_i32_444 = arith.constant 111 : i32
    %1336 = arith.addi %0, %c111_i32_444 : i32
    %1337 = arith.index_cast %1336 : i32 to index
    %1338 = memref.load %arg2[%1337] : memref<128xi32, #tpu.memory_space<smem>>
    %1339 = arith.index_cast %1335 : i32 to index
    %c0_445 = arith.constant 0 : index
    %1340 = vector.load %arg3[%1339, %c0_445] : memref<10x4xf32, #tpu.memory_space<vmem>>, vector<1x4xf32>
    %1341 = arith.index_cast %1338 : i32 to index
    %c0_446 = arith.constant 0 : index
    %1342 = vector.load %arg4[%1341, %c0_446] : memref<12x4xf32, #tpu.memory_space<vmem>>, vector<1x4xf32>
    %1343 = arith.mulf %1340, %1342 : vector<1x4xf32>
    %c111 = arith.constant 111 : index
    %c0_447 = arith.constant 0 : index
    %1344 = vector.load %arg6[%c111, %c0_447] : memref<128x4xf32, #tpu.memory_space<vmem>>, vector<1x4xf32>
    tpu.vector_store %arg6[%c111, %c0_447], %1343 {strides = array<i32>} : memref<128x4xf32, #tpu.memory_space<vmem>>, vector<1x4xf32>,
    %c112_i32 = arith.constant 112 : i32
    %1345 = arith.addi %0, %c112_i32 : i32
    %1346 = arith.index_cast %1345 : i32 to index
    %1347 = memref.load %arg1[%1346] : memref<128xi32, #tpu.memory_space<smem>>
    %c112_i32_448 = arith.constant 112 : i32
    %1348 = arith.addi %0, %c112_i32_448 : i32
    %1349 = arith.index_cast %1348 : i32 to index
    %1350 = memref.load %arg2[%1349] : memref<128xi32, #tpu.memory_space<smem>>
    %1351 = arith.index_cast %1347 : i32 to index
    %c0_449 = arith.constant 0 : index
    %1352 = vector.load %arg3[%1351, %c0_449] : memref<10x4xf32, #tpu.memory_space<vmem>>, vector<1x4xf32>
    %1353 = arith.index_cast %1350 : i32 to index
    %c0_450 = arith.constant 0 : index
    %1354 = vector.load %arg4[%1353, %c0_450] : memref<12x4xf32, #tpu.memory_space<vmem>>, vector<1x4xf32>
    %1355 = arith.mulf %1352, %1354 : vector<1x4xf32>
    %c112 = arith.constant 112 : index
    %c0_451 = arith.constant 0 : index
    %1356 = vector.load %arg6[%c112, %c0_451] : memref<128x4xf32, #tpu.memory_space<vmem>>, vector<1x4xf32>
    tpu.vector_store %arg6[%c112, %c0_451], %1355 {strides = array<i32>} : memref<128x4xf32, #tpu.memory_space<vmem>>, vector<1x4xf32>,
    %c113_i32 = arith.constant 113 : i32
    %1357 = arith.addi %0, %c113_i32 : i32
    %1358 = arith.index_cast %1357 : i32 to index
    %1359 = memref.load %arg1[%1358] : memref<128xi32, #tpu.memory_space<smem>>
    %c113_i32_452 = arith.constant 113 : i32
    %1360 = arith.addi %0, %c113_i32_452 : i32
    %1361 = arith.index_cast %1360 : i32 to index
    %1362 = memref.load %arg2[%1361] : memref<128xi32, #tpu.memory_space<smem>>
    %1363 = arith.index_cast %1359 : i32 to index
    %c0_453 = arith.constant 0 : index
    %1364 = vector.load %arg3[%1363, %c0_453] : memref<10x4xf32, #tpu.memory_space<vmem>>, vector<1x4xf32>
    %1365 = arith.index_cast %1362 : i32 to index
    %c0_454 = arith.constant 0 : index
    %1366 = vector.load %arg4[%1365, %c0_454] : memref<12x4xf32, #tpu.memory_space<vmem>>, vector<1x4xf32>
    %1367 = arith.mulf %1364, %1366 : vector<1x4xf32>
    %c113 = arith.constant 113 : index
    %c0_455 = arith.constant 0 : index
    %1368 = vector.load %arg6[%c113, %c0_455] : memref<128x4xf32, #tpu.memory_space<vmem>>, vector<1x4xf32>
    tpu.vector_store %arg6[%c113, %c0_455], %1367 {strides = array<i32>} : memref<128x4xf32, #tpu.memory_space<vmem>>, vector<1x4xf32>,
    %c114_i32 = arith.constant 114 : i32
    %1369 = arith.addi %0, %c114_i32 : i32
    %1370 = arith.index_cast %1369 : i32 to index
    %1371 = memref.load %arg1[%1370] : memref<128xi32, #tpu.memory_space<smem>>
    %c114_i32_456 = arith.constant 114 : i32
    %1372 = arith.addi %0, %c114_i32_456 : i32
    %1373 = arith.index_cast %1372 : i32 to index
    %1374 = memref.load %arg2[%1373] : memref<128xi32, #tpu.memory_space<smem>>
    %1375 = arith.index_cast %1371 : i32 to index
    %c0_457 = arith.constant 0 : index
    %1376 = vector.load %arg3[%1375, %c0_457] : memref<10x4xf32, #tpu.memory_space<vmem>>, vector<1x4xf32>
    %1377 = arith.index_cast %1374 : i32 to index
    %c0_458 = arith.constant 0 : index
    %1378 = vector.load %arg4[%1377, %c0_458] : memref<12x4xf32, #tpu.memory_space<vmem>>, vector<1x4xf32>
    %1379 = arith.mulf %1376, %1378 : vector<1x4xf32>
    %c114 = arith.constant 114 : index
    %c0_459 = arith.constant 0 : index
    %1380 = vector.load %arg6[%c114, %c0_459] : memref<128x4xf32, #tpu.memory_space<vmem>>, vector<1x4xf32>
    tpu.vector_store %arg6[%c114, %c0_459], %1379 {strides = array<i32>} : memref<128x4xf32, #tpu.memory_space<vmem>>, vector<1x4xf32>,
    %c115_i32 = arith.constant 115 : i32
    %1381 = arith.addi %0, %c115_i32 : i32
    %1382 = arith.index_cast %1381 : i32 to index
    %1383 = memref.load %arg1[%1382] : memref<128xi32, #tpu.memory_space<smem>>
    %c115_i32_460 = arith.constant 115 : i32
    %1384 = arith.addi %0, %c115_i32_460 : i32
    %1385 = arith.index_cast %1384 : i32 to index
    %1386 = memref.load %arg2[%1385] : memref<128xi32, #tpu.memory_space<smem>>
    %1387 = arith.index_cast %1383 : i32 to index
    %c0_461 = arith.constant 0 : index
    %1388 = vector.load %arg3[%1387, %c0_461] : memref<10x4xf32, #tpu.memory_space<vmem>>, vector<1x4xf32>
    %1389 = arith.index_cast %1386 : i32 to index
    %c0_462 = arith.constant 0 : index
    %1390 = vector.load %arg4[%1389, %c0_462] : memref<12x4xf32, #tpu.memory_space<vmem>>, vector<1x4xf32>
    %1391 = arith.mulf %1388, %1390 : vector<1x4xf32>
    %c115 = arith.constant 115 : index
    %c0_463 = arith.constant 0 : index
    %1392 = vector.load %arg6[%c115, %c0_463] : memref<128x4xf32, #tpu.memory_space<vmem>>, vector<1x4xf32>
    tpu.vector_store %arg6[%c115, %c0_463], %1391 {strides = array<i32>} : memref<128x4xf32, #tpu.memory_space<vmem>>, vector<1x4xf32>,
    %c116_i32 = arith.constant 116 : i32
    %1393 = arith.addi %0, %c116_i32 : i32
    %1394 = arith.index_cast %1393 : i32 to index
    %1395 = memref.load %arg1[%1394] : memref<128xi32, #tpu.memory_space<smem>>
    %c116_i32_464 = arith.constant 116 : i32
    %1396 = arith.addi %0, %c116_i32_464 : i32
    %1397 = arith.index_cast %1396 : i32 to index
    %1398 = memref.load %arg2[%1397] : memref<128xi32, #tpu.memory_space<smem>>
    %1399 = arith.index_cast %1395 : i32 to index
    %c0_465 = arith.constant 0 : index
    %1400 = vector.load %arg3[%1399, %c0_465] : memref<10x4xf32, #tpu.memory_space<vmem>>, vector<1x4xf32>
    %1401 = arith.index_cast %1398 : i32 to index
    %c0_466 = arith.constant 0 : index
    %1402 = vector.load %arg4[%1401, %c0_466] : memref<12x4xf32, #tpu.memory_space<vmem>>, vector<1x4xf32>
    %1403 = arith.mulf %1400, %1402 : vector<1x4xf32>
    %c116 = arith.constant 116 : index
    %c0_467 = arith.constant 0 : index
    %1404 = vector.load %arg6[%c116, %c0_467] : memref<128x4xf32, #tpu.memory_space<vmem>>, vector<1x4xf32>
    tpu.vector_store %arg6[%c116, %c0_467], %1403 {strides = array<i32>} : memref<128x4xf32, #tpu.memory_space<vmem>>, vector<1x4xf32>,
    %c117_i32 = arith.constant 117 : i32
    %1405 = arith.addi %0, %c117_i32 : i32
    %1406 = arith.index_cast %1405 : i32 to index
    %1407 = memref.load %arg1[%1406] : memref<128xi32, #tpu.memory_space<smem>>
    %c117_i32_468 = arith.constant 117 : i32
    %1408 = arith.addi %0, %c117_i32_468 : i32
    %1409 = arith.index_cast %1408 : i32 to index
    %1410 = memref.load %arg2[%1409] : memref<128xi32, #tpu.memory_space<smem>>
    %1411 = arith.index_cast %1407 : i32 to index
    %c0_469 = arith.constant 0 : index
    %1412 = vector.load %arg3[%1411, %c0_469] : memref<10x4xf32, #tpu.memory_space<vmem>>, vector<1x4xf32>
    %1413 = arith.index_cast %1410 : i32 to index
    %c0_470 = arith.constant 0 : index
    %1414 = vector.load %arg4[%1413, %c0_470] : memref<12x4xf32, #tpu.memory_space<vmem>>, vector<1x4xf32>
    %1415 = arith.mulf %1412, %1414 : vector<1x4xf32>
    %c117 = arith.constant 117 : index
    %c0_471 = arith.constant 0 : index
    %1416 = vector.load %arg6[%c117, %c0_471] : memref<128x4xf32, #tpu.memory_space<vmem>>, vector<1x4xf32>
    tpu.vector_store %arg6[%c117, %c0_471], %1415 {strides = array<i32>} : memref<128x4xf32, #tpu.memory_space<vmem>>, vector<1x4xf32>,
    %c118_i32 = arith.constant 118 : i32
    %1417 = arith.addi %0, %c118_i32 : i32
    %1418 = arith.index_cast %1417 : i32 to index
    %1419 = memref.load %arg1[%1418] : memref<128xi32, #tpu.memory_space<smem>>
    %c118_i32_472 = arith.constant 118 : i32
    %1420 = arith.addi %0, %c118_i32_472 : i32
    %1421 = arith.index_cast %1420 : i32 to index
    %1422 = memref.load %arg2[%1421] : memref<128xi32, #tpu.memory_space<smem>>
    %1423 = arith.index_cast %1419 : i32 to index
    %c0_473 = arith.constant 0 : index
    %1424 = vector.load %arg3[%1423, %c0_473] : memref<10x4xf32, #tpu.memory_space<vmem>>, vector<1x4xf32>
    %1425 = arith.index_cast %1422 : i32 to index
    %c0_474 = arith.constant 0 : index
    %1426 = vector.load %arg4[%1425, %c0_474] : memref<12x4xf32, #tpu.memory_space<vmem>>, vector<1x4xf32>
    %1427 = arith.mulf %1424, %1426 : vector<1x4xf32>
    %c118 = arith.constant 118 : index
    %c0_475 = arith.constant 0 : index
    %1428 = vector.load %arg6[%c118, %c0_475] : memref<128x4xf32, #tpu.memory_space<vmem>>, vector<1x4xf32>
    tpu.vector_store %arg6[%c118, %c0_475], %1427 {strides = array<i32>} : memref<128x4xf32, #tpu.memory_space<vmem>>, vector<1x4xf32>,
    %c119_i32 = arith.constant 119 : i32
    %1429 = arith.addi %0, %c119_i32 : i32
    %1430 = arith.index_cast %1429 : i32 to index
    %1431 = memref.load %arg1[%1430] : memref<128xi32, #tpu.memory_space<smem>>
    %c119_i32_476 = arith.constant 119 : i32
    %1432 = arith.addi %0, %c119_i32_476 : i32
    %1433 = arith.index_cast %1432 : i32 to index
    %1434 = memref.load %arg2[%1433] : memref<128xi32, #tpu.memory_space<smem>>
    %1435 = arith.index_cast %1431 : i32 to index
    %c0_477 = arith.constant 0 : index
    %1436 = vector.load %arg3[%1435, %c0_477] : memref<10x4xf32, #tpu.memory_space<vmem>>, vector<1x4xf32>
    %1437 = arith.index_cast %1434 : i32 to index
    %c0_478 = arith.constant 0 : index
    %1438 = vector.load %arg4[%1437, %c0_478] : memref<12x4xf32, #tpu.memory_space<vmem>>, vector<1x4xf32>
    %1439 = arith.mulf %1436, %1438 : vector<1x4xf32>
    %c119 = arith.constant 119 : index
    %c0_479 = arith.constant 0 : index
    %1440 = vector.load %arg6[%c119, %c0_479] : memref<128x4xf32, #tpu.memory_space<vmem>>, vector<1x4xf32>
    tpu.vector_store %arg6[%c119, %c0_479], %1439 {strides = array<i32>} : memref<128x4xf32, #tpu.memory_space<vmem>>, vector<1x4xf32>,
    %c120_i32 = arith.constant 120 : i32
    %1441 = arith.addi %0, %c120_i32 : i32
    %1442 = arith.index_cast %1441 : i32 to index
    %1443 = memref.load %arg1[%1442] : memref<128xi32, #tpu.memory_space<smem>>
    %c120_i32_480 = arith.constant 120 : i32
    %1444 = arith.addi %0, %c120_i32_480 : i32
    %1445 = arith.index_cast %1444 : i32 to index
    %1446 = memref.load %arg2[%1445] : memref<128xi32, #tpu.memory_space<smem>>
    %1447 = arith.index_cast %1443 : i32 to index
    %c0_481 = arith.constant 0 : index
    %1448 = vector.load %arg3[%1447, %c0_481] : memref<10x4xf32, #tpu.memory_space<vmem>>, vector<1x4xf32>
    %1449 = arith.index_cast %1446 : i32 to index
    %c0_482 = arith.constant 0 : index
    %1450 = vector.load %arg4[%1449, %c0_482] : memref<12x4xf32, #tpu.memory_space<vmem>>, vector<1x4xf32>
    %1451 = arith.mulf %1448, %1450 : vector<1x4xf32>
    %c120 = arith.constant 120 : index
    %c0_483 = arith.constant 0 : index
    %1452 = vector.load %arg6[%c120, %c0_483] : memref<128x4xf32, #tpu.memory_space<vmem>>, vector<1x4xf32>
    tpu.vector_store %arg6[%c120, %c0_483], %1451 {strides = array<i32>} : memref<128x4xf32, #tpu.memory_space<vmem>>, vector<1x4xf32>,
    %c121_i32 = arith.constant 121 : i32
    %1453 = arith.addi %0, %c121_i32 : i32
    %1454 = arith.index_cast %1453 : i32 to index
    %1455 = memref.load %arg1[%1454] : memref<128xi32, #tpu.memory_space<smem>>
    %c121_i32_484 = arith.constant 121 : i32
    %1456 = arith.addi %0, %c121_i32_484 : i32
    %1457 = arith.index_cast %1456 : i32 to index
    %1458 = memref.load %arg2[%1457] : memref<128xi32, #tpu.memory_space<smem>>
    %1459 = arith.index_cast %1455 : i32 to index
    %c0_485 = arith.constant 0 : index
    %1460 = vector.load %arg3[%1459, %c0_485] : memref<10x4xf32, #tpu.memory_space<vmem>>, vector<1x4xf32>
    %1461 = arith.index_cast %1458 : i32 to index
    %c0_486 = arith.constant 0 : index
    %1462 = vector.load %arg4[%1461, %c0_486] : memref<12x4xf32, #tpu.memory_space<vmem>>, vector<1x4xf32>
    %1463 = arith.mulf %1460, %1462 : vector<1x4xf32>
    %c121 = arith.constant 121 : index
    %c0_487 = arith.constant 0 : index
    %1464 = vector.load %arg6[%c121, %c0_487] : memref<128x4xf32, #tpu.memory_space<vmem>>, vector<1x4xf32>
    tpu.vector_store %arg6[%c121, %c0_487], %1463 {strides = array<i32>} : memref<128x4xf32, #tpu.memory_space<vmem>>, vector<1x4xf32>,
    %c122_i32 = arith.constant 122 : i32
    %1465 = arith.addi %0, %c122_i32 : i32
    %1466 = arith.index_cast %1465 : i32 to index
    %1467 = memref.load %arg1[%1466] : memref<128xi32, #tpu.memory_space<smem>>
    %c122_i32_488 = arith.constant 122 : i32
    %1468 = arith.addi %0, %c122_i32_488 : i32
    %1469 = arith.index_cast %1468 : i32 to index
    %1470 = memref.load %arg2[%1469] : memref<128xi32, #tpu.memory_space<smem>>
    %1471 = arith.index_cast %1467 : i32 to index
    %c0_489 = arith.constant 0 : index
    %1472 = vector.load %arg3[%1471, %c0_489] : memref<10x4xf32, #tpu.memory_space<vmem>>, vector<1x4xf32>
    %1473 = arith.index_cast %1470 : i32 to index
    %c0_490 = arith.constant 0 : index
    %1474 = vector.load %arg4[%1473, %c0_490] : memref<12x4xf32, #tpu.memory_space<vmem>>, vector<1x4xf32>
    %1475 = arith.mulf %1472, %1474 : vector<1x4xf32>
    %c122 = arith.constant 122 : index
    %c0_491 = arith.constant 0 : index
    %1476 = vector.load %arg6[%c122, %c0_491] : memref<128x4xf32, #tpu.memory_space<vmem>>, vector<1x4xf32>
    tpu.vector_store %arg6[%c122, %c0_491], %1475 {strides = array<i32>} : memref<128x4xf32, #tpu.memory_space<vmem>>, vector<1x4xf32>,
    %c123_i32 = arith.constant 123 : i32
    %1477 = arith.addi %0, %c123_i32 : i32
    %1478 = arith.index_cast %1477 : i32 to index
    %1479 = memref.load %arg1[%1478] : memref<128xi32, #tpu.memory_space<smem>>
    %c123_i32_492 = arith.constant 123 : i32
    %1480 = arith.addi %0, %c123_i32_492 : i32
    %1481 = arith.index_cast %1480 : i32 to index
    %1482 = memref.load %arg2[%1481] : memref<128xi32, #tpu.memory_space<smem>>
    %1483 = arith.index_cast %1479 : i32 to index
    %c0_493 = arith.constant 0 : index
    %1484 = vector.load %arg3[%1483, %c0_493] : memref<10x4xf32, #tpu.memory_space<vmem>>, vector<1x4xf32>
    %1485 = arith.index_cast %1482 : i32 to index
    %c0_494 = arith.constant 0 : index
    %1486 = vector.load %arg4[%1485, %c0_494] : memref<12x4xf32, #tpu.memory_space<vmem>>, vector<1x4xf32>
    %1487 = arith.mulf %1484, %1486 : vector<1x4xf32>
    %c123 = arith.constant 123 : index
    %c0_495 = arith.constant 0 : index
    %1488 = vector.load %arg6[%c123, %c0_495] : memref<128x4xf32, #tpu.memory_space<vmem>>, vector<1x4xf32>
    tpu.vector_store %arg6[%c123, %c0_495], %1487 {strides = array<i32>} : memref<128x4xf32, #tpu.memory_space<vmem>>, vector<1x4xf32>,
    %c124_i32 = arith.constant 124 : i32
    %1489 = arith.addi %0, %c124_i32 : i32
    %1490 = arith.index_cast %1489 : i32 to index
    %1491 = memref.load %arg1[%1490] : memref<128xi32, #tpu.memory_space<smem>>
    %c124_i32_496 = arith.constant 124 : i32
    %1492 = arith.addi %0, %c124_i32_496 : i32
    %1493 = arith.index_cast %1492 : i32 to index
    %1494 = memref.load %arg2[%1493] : memref<128xi32, #tpu.memory_space<smem>>
    %1495 = arith.index_cast %1491 : i32 to index
    %c0_497 = arith.constant 0 : index
    %1496 = vector.load %arg3[%1495, %c0_497] : memref<10x4xf32, #tpu.memory_space<vmem>>, vector<1x4xf32>
    %1497 = arith.index_cast %1494 : i32 to index
    %c0_498 = arith.constant 0 : index
    %1498 = vector.load %arg4[%1497, %c0_498] : memref<12x4xf32, #tpu.memory_space<vmem>>, vector<1x4xf32>
    %1499 = arith.mulf %1496, %1498 : vector<1x4xf32>
    %c124 = arith.constant 124 : index
    %c0_499 = arith.constant 0 : index
    %1500 = vector.load %arg6[%c124, %c0_499] : memref<128x4xf32, #tpu.memory_space<vmem>>, vector<1x4xf32>
    tpu.vector_store %arg6[%c124, %c0_499], %1499 {strides = array<i32>} : memref<128x4xf32, #tpu.memory_space<vmem>>, vector<1x4xf32>,
    %c125_i32 = arith.constant 125 : i32
    %1501 = arith.addi %0, %c125_i32 : i32
    %1502 = arith.index_cast %1501 : i32 to index
    %1503 = memref.load %arg1[%1502] : memref<128xi32, #tpu.memory_space<smem>>
    %c125_i32_500 = arith.constant 125 : i32
    %1504 = arith.addi %0, %c125_i32_500 : i32
    %1505 = arith.index_cast %1504 : i32 to index
    %1506 = memref.load %arg2[%1505] : memref<128xi32, #tpu.memory_space<smem>>
    %1507 = arith.index_cast %1503 : i32 to index
    %c0_501 = arith.constant 0 : index
    %1508 = vector.load %arg3[%1507, %c0_501] : memref<10x4xf32, #tpu.memory_space<vmem>>, vector<1x4xf32>
    %1509 = arith.index_cast %1506 : i32 to index
    %c0_502 = arith.constant 0 : index
    %1510 = vector.load %arg4[%1509, %c0_502] : memref<12x4xf32, #tpu.memory_space<vmem>>, vector<1x4xf32>
    %1511 = arith.mulf %1508, %1510 : vector<1x4xf32>
    %c125 = arith.constant 125 : index
    %c0_503 = arith.constant 0 : index
    %1512 = vector.load %arg6[%c125, %c0_503] : memref<128x4xf32, #tpu.memory_space<vmem>>, vector<1x4xf32>
    tpu.vector_store %arg6[%c125, %c0_503], %1511 {strides = array<i32>} : memref<128x4xf32, #tpu.memory_space<vmem>>, vector<1x4xf32>,
    %c126_i32 = arith.constant 126 : i32
    %1513 = arith.addi %0, %c126_i32 : i32
    %1514 = arith.index_cast %1513 : i32 to index
    %1515 = memref.load %arg1[%1514] : memref<128xi32, #tpu.memory_space<smem>>
    %c126_i32_504 = arith.constant 126 : i32
    %1516 = arith.addi %0, %c126_i32_504 : i32
    %1517 = arith.index_cast %1516 : i32 to index
    %1518 = memref.load %arg2[%1517] : memref<128xi32, #tpu.memory_space<smem>>
    %1519 = arith.index_cast %1515 : i32 to index
    %c0_505 = arith.constant 0 : index
    %1520 = vector.load %arg3[%1519, %c0_505] : memref<10x4xf32, #tpu.memory_space<vmem>>, vector<1x4xf32>
    %1521 = arith.index_cast %1518 : i32 to index
    %c0_506 = arith.constant 0 : index
    %1522 = vector.load %arg4[%1521, %c0_506] : memref<12x4xf32, #tpu.memory_space<vmem>>, vector<1x4xf32>
    %1523 = arith.mulf %1520, %1522 : vector<1x4xf32>
    %c126 = arith.constant 126 : index
    %c0_507 = arith.constant 0 : index
    %1524 = vector.load %arg6[%c126, %c0_507] : memref<128x4xf32, #tpu.memory_space<vmem>>, vector<1x4xf32>
    tpu.vector_store %arg6[%c126, %c0_507], %1523 {strides = array<i32>} : memref<128x4xf32, #tpu.memory_space<vmem>>, vector<1x4xf32>,
    %c127_i32 = arith.constant 127 : i32
    %1525 = arith.addi %0, %c127_i32 : i32
    %1526 = arith.index_cast %1525 : i32 to index
    %1527 = memref.load %arg1[%1526] : memref<128xi32, #tpu.memory_space<smem>>
    %c127_i32_508 = arith.constant 127 : i32
    %1528 = arith.addi %0, %c127_i32_508 : i32
    %1529 = arith.index_cast %1528 : i32 to index
    %1530 = memref.load %arg2[%1529] : memref<128xi32, #tpu.memory_space<smem>>
    %1531 = arith.index_cast %1527 : i32 to index
    %c0_509 = arith.constant 0 : index
    %1532 = vector.load %arg3[%1531, %c0_509] : memref<10x4xf32, #tpu.memory_space<vmem>>, vector<1x4xf32>
    %1533 = arith.index_cast %1530 : i32 to index
    %c0_510 = arith.constant 0 : index
    %1534 = vector.load %arg4[%1533, %c0_510] : memref<12x4xf32, #tpu.memory_space<vmem>>, vector<1x4xf32>
    %1535 = arith.mulf %1532, %1534 : vector<1x4xf32>
    %c127 = arith.constant 127 : index
    %c0_511 = arith.constant 0 : index
    %1536 = vector.load %arg6[%c127, %c0_511] : memref<128x4xf32, #tpu.memory_space<vmem>>, vector<1x4xf32>
    tpu.vector_store %arg6[%c127, %c0_511], %1535 {strides = array<i32>} : memref<128x4xf32, #tpu.memory_space<vmem>>, vector<1x4xf32>,
    %c0_512 = arith.constant 0 : index
    %c0_513 = arith.constant 0 : index
    %1537 = vector.load %arg6[%c0_512, %c0_513] : memref<128x4xf32, #tpu.memory_space<vmem>>, vector<128x4xf32>
    %cst = arith.constant dense<0.000000e+00> : vector<128xf32>
    %1538 = vector.multi_reduction <add>, %1537, %cst [1] : vector<128x4xf32> to vector<128xf32>
    %1539 = vector.shape_cast %1538 : vector<128xf32> to vector<1x128xf32>
    %c0_514 = arith.constant 0 : index
    %c0_515 = arith.constant 0 : index
    %1540 = vector.load %arg5[%c0_514, %c0_515] : memref<1x128xf32, #tpu.memory_space<vmem>>, vector<1x128xf32>
    tpu.vector_store %arg5[%c0_514, %c0_515], %1539 {strides = array<i32>} : memref<1x128xf32, #tpu.memory_space<vmem>>, vector<1x128xf32>,
    return
  }
  func.func @transform_0(%arg0: i32, %arg1: memref<128xi32, #tpu.memory_space<smem>>, %arg2: memref<128xi32, #tpu.memory_space<smem>>) -> (i32, i32) {
    %c0_i32 = arith.constant 0 : i32
    %c0_i32_0 = arith.constant 0 : i32
    %c0_i32_1 = arith.constant 0 : i32
    return %c0_i32, %c0_i32_0 : i32, i32
  }
  func.func @transform_1(%arg0: i32, %arg1: memref<128xi32, #tpu.memory_space<smem>>, %arg2: memref<128xi32, #tpu.memory_space<smem>>) -> (i32, i32) {
    %c0_i32 = arith.constant 0 : i32
    %c0_i32_0 = arith.constant 0 : i32
    %c0_i32_1 = arith.constant 0 : i32
    return %c0_i32, %c0_i32_0 : i32, i32
  }
  func.func @transform_2(%arg0: i32, %arg1: memref<128xi32, #tpu.memory_space<smem>>, %arg2: memref<128xi32, #tpu.memory_space<smem>>) -> (i32, i32) {
    %c0_i32 = arith.constant 0 : i32
    %c0_i32_0 = arith.constant 0 : i32
    return %c0_i32, %arg0 : i32, i32
  }
}

</mosaic_0001>

<bundles_post_ra>
// kernel: tpu_custom_call.1
= control target key start
LH: loop header
LB: loop body
LE: loop exit
PB: predicated region body
PF: predicated region fallthrough
CT: control target
= control target key end

     0   :  { %s3105_s0 = inlined_call_operand.vmem [shape: s32[128], index: 0, kind: input, shape index: {}]   ;;  %s3106_s2 = inlined_call_operand.vmem [shape: f32[10,4], index: 2, kind: input, shape index: {}]   ;;  %s3107_s3 = inlined_call_operand.vmem [shape: f32[12,4], index: 3, kind: input, shape index: {}]   ;;  %s3108_s4 = inlined_call_operand.hbm [shape: f32[1,128], index: 4, kind: output, shape index: {}]   ;;  %s3109_s1 = inlined_call_operand.vmem [shape: s32[128], index: 1, kind: input, shape index: {}]  }
   0x1   :  { %s9_s17 = sshll.u32 %s3105_s0, 4  ;;  %s13_s20 = sshll.u32 %s3109_s1, 4  ;;  %s10_s17 = int_to_ptr.vmem [resolvable:$true] %s9_s17  ;;  %s14_s20 = int_to_ptr.vmem [resolvable:$true] %s13_s20 }
   0x2   :  { %s1898_s21 = scalar_lea.vmem %s10_s17, 16  ;;  %p1903_p1 = scmp.lt.s32.totalorder %s10_s17, %s10_s17 }
   0x3   :  { %p1899_p0 = scmp.ne.s32.totalorder %s10_s17, %s1898_s21  ;;  %p1904_p2 = scmp.lt.s32.totalorder %s1898_s21, %s1898_s21 }
   0x5   :  { %p1905_p3 = por %p1904_p2, %p1903_p1 }
   0x7   :  { %p1906_p4 = pnand %p1905_p3, %p1899_p0 }
   0x9   :  { %1909 = shalt.err (!%p1906_p4)  }
   0xa   :  { %s1946_s22 = smov [#allocation4]   ;;  %s1910_s23 = scalar_lea.vmem %s14_s20, 16 }
   0xb   :  { %12 = dma.vmem_to_smem %s10_s17, 16, %s1946_s22, [#allocation3] }
   0xc   :  { %p1911_p5 = scmp.ne.s32.totalorder %s14_s20, %s1910_s23  ;;  %p1915_p6 = scmp.lt.s32.totalorder %s14_s20, %s14_s20 }
   0xd   :  { %p1916_p7 = scmp.lt.s32.totalorder %s1910_s23, %s1910_s23 }
   0xf   :  { %p1917_p8 = por %p1916_p7, %p1915_p6 }
  0x11   :  { %p1918_p9 = pnand %p1917_p8, %p1911_p5 }
  0x13   :  { %1921 = shalt.err (!%p1918_p9)  }
  0x14   :  { %s1947_s0 = smov [#allocation5]  }
  0x15   :  { %16 = dma.vmem_to_smem %s14_s20, 16, %s1947_s0, [#allocation3] }
  0x16   :  { %1942 = dma.done.wait [#allocation3], 32 }
  0x17   :  { %1943 = vsyncadd [#allocation3], 4294967264 }
  0x18   :  { %18 = sfence }
  0x19   :  { %s25_s1 = sld [smem:[#allocation4]] }
  0x1a   :  { %19 = vsyncpa [#allocation7], 0  ;;  %s26_s24 = sld [smem:[#allocation5]]  ;;  %vm32_vm0 = vcmask 24576   ;;  %vm1193_vm1 = vcmask 31744   ;;  %vm1269_vm2 = vcmask 130112  }
  0x1b   :  { %s1641_s25 = sld [smem:[#allocation4 + $0x1]]  ;;  %vm1276_vm3 = vcmask 195712   ;;  %vm1283_vm4 = vcmask 261312   ;;  %vm1290_vm5 = vcmask 326912   ;;  %vm1297_vm6 = vcmask 392512  }
  0x1c   :  { %s1642_s26 = sld [smem:[#allocation5 + $0x1]]  ;;  %vm1304_vm7 = vcmask 458112   ;;  %vm1311_vm8 = vcmask 523712   ;;  %vm1318_vm9 = vcmask 589312   ;;  %vm1325_vm10 = vcmask 654912  }
  0x1d   :  { %s1643_s27 = sld [smem:[#allocation4 + $0x2]]  ;;  %vm1332_vm11 = vcmask 720512   ;;  %vm1339_vm12 = vcmask 786112   ;;  %vm1346_vm13 = vcmask 851712   ;;  %vm1353_vm14 = vcmask 917312  }
  0x1e   :  { %s1644_s28 = sld [smem:[#allocation5 + $0x2]]  ;;  %vm1360_vm15 = vcmask 982912  }
  0x1f   :  { %s27_s5 = scalar_lea.vmem %s3106_s2, %s25_s1  ;;  %s1645_s6 = sld [smem:[#allocation4 + $0x3]] }
  0x20   :  { %v28_v0 = vld [vmem:[%s27_s5] sm:$0x1]  ;;  %s29_s9 = scalar_lea.vmem %s3107_s3, %s26_s24  ;;  %s1646_s10 = sld [smem:[#allocation5 + $0x3]] }
  0x21   :  { %v30_v1 = vld [vmem:[%s29_s9] sm:$0x1]  ;;  %s37_s13 = scalar_lea.vmem %s3106_s2, %s1641_s25  ;;  %s1647_s14 = sld [smem:[#allocation4 + $0x4]] }
  0x22   :  { %v31_v2 = vmul.f32 %v30_v1, %v28_v0  ;;  %v38_v3 = vld [vmem:[%s37_s13] sm:$0x1]  ;;  %s39_s17 = scalar_lea.vmem %s3107_s3, %s1642_s26  ;;  %s1648_s18 = sld [smem:[#allocation5 + $0x4]] }
  0x23   :  { %v40_v4 = vld [vmem:[%s39_s17] sm:$0x1]  ;;  %s46_s21 = scalar_lea.vmem %s3106_s2, %s1643_s27  ;;  %s1649_s22 = sld [smem:[#allocation4 + $0x5]] }
  0x24   :  { %33 = vst.msk [vmem:[#allocation2] sm:$0x1] %vm32_vm0, %v31_v2  ;;  %v41_v5 = vmul.f32 %v40_v4, %v38_v3  ;;  %v47_v6 = vld [vmem:[%s46_s21] sm:$0x1]  ;;  %s48_s1 = scalar_lea.vmem %s3107_s3, %s1644_s28  ;;  %s1650_s24 = sld [smem:[#allocation5 + $0x5]] }
  0x25   :  { %v49_v7 = vld [vmem:[%s48_s1] sm:$0x1]  ;;  %s55_s26 = scalar_lea.vmem %s3106_s2, %s1645_s6  ;;  %s1651_s30 = sld [smem:[#allocation4 + $0x6]] }
  0x26   :  { %42 = vst.msk [vmem:[#allocation2 + $0x1] sm:$0x1] %vm32_vm0, %v41_v5  ;;  %v50_v8 = vmul.f32 %v49_v7, %v47_v6  ;;  %v56_v9 = vld [vmem:[%s55_s26] sm:$0x1]  ;;  %s57_s7 = scalar_lea.vmem %s3107_s3, %s1646_s10  ;;  %s1652_s8 = sld [smem:[#allocation5 + $0x6]] }
  0x27   :  { %v58_v10 = vld [vmem:[%s57_s7] sm:$0x1]  ;;  %s64_s28 = scalar_lea.vmem %s3106_s2, %s1647_s14  ;;  %s1653_s12 = sld [smem:[#allocation4 + $0x7]] }
  0x28   :  { %51 = vst.msk [vmem:[#allocation2 + $0x2] sm:$0x1] %vm32_vm0, %v50_v8  ;;  %v59_v11 = vmul.f32 %v58_v10, %v56_v9  ;;  %v65_v12 = vld [vmem:[%s64_s28] sm:$0x1]  ;;  %s66_s15 = scalar_lea.vmem %s3107_s3, %s1648_s18  ;;  %s1654_s16 = sld [smem:[#allocation5 + $0x7]] }
  0x29   :  { %v67_v13 = vld [vmem:[%s66_s15] sm:$0x1]  ;;  %s73_s10 = scalar_lea.vmem %s3106_s2, %s1649_s22  ;;  %s1671_s20 = sld [smem:[#allocation4 + $0x10]] }
  0x2a   :  { %60 = vst.msk [vmem:[#allocation2 + $0x3] sm:$0x1] %vm32_vm0, %v59_v11  ;;  %v68_v14 = vmul.f32 %v67_v13, %v65_v12  ;;  %v74_v15 = vld [vmem:[%s73_s10] sm:$0x1]  ;;  %s75_s23 = scalar_lea.vmem %s3107_s3, %s1650_s24  ;;  %s1672_s0 = sld [smem:[#allocation5 + $0x10]] }
  0x2b   :  { %v76_v16 = vld [vmem:[%s75_s23] sm:$0x1]  ;;  %s82_s18 = scalar_lea.vmem %s3106_s2, %s1651_s30  ;;  %s1673_s29 = sld [smem:[#allocation4 + $0x11]] }
  0x2c   :  { %69 = vst.msk [vmem:[#allocation2 + $0x4] sm:$0x1] %vm32_vm0, %v68_v14  ;;  %v77_v17 = vmul.f32 %v76_v16, %v74_v15  ;;  %v83_v18 = vld [vmem:[%s82_s18] sm:$0x1]  ;;  %s84_s27 = scalar_lea.vmem %s3107_s3, %s1652_s8  ;;  %s1674_s5 = sld [smem:[#allocation5 + $0x11]] }
  0x2d   :  { %v85_v19 = vld [vmem:[%s84_s27] sm:$0x1]  ;;  %s91_s24 = scalar_lea.vmem %s3106_s2, %s1653_s12  ;;  %s1675_s11 = sld [smem:[#allocation4 + $0x12]] }
  0x2e   :  { %78 = vst.msk [vmem:[#allocation2 + $0x5] sm:$0x1] %vm32_vm0, %v77_v17  ;;  %v86_v20 = vmul.f32 %v85_v19, %v83_v18  ;;  %v92_v21 = vld [vmem:[%s91_s24] sm:$0x1]  ;;  %s93_s6 = scalar_lea.vmem %s3107_s3, %s1654_s16  ;;  %s1676_s13 = sld [smem:[#allocation5 + $0x12]] }
  0x2f   :  { %v94_v22 = vld [vmem:[%s93_s6] sm:$0x1]  ;;  %s172_s8 = scalar_lea.vmem %s3106_s2, %s1671_s20  ;;  %s1677_s19 = sld [smem:[#allocation4 + $0x13]] }
  0x30   :  { %87 = vst.msk [vmem:[#allocation2 + $0x6] sm:$0x1] %vm32_vm0, %v86_v20  ;;  %v95_v23 = vmul.f32 %v94_v22, %v92_v21  ;;  %v173_v24 = vld [vmem:[%s172_s8] sm:$0x1]  ;;  %s174_s14 = scalar_lea.vmem %s3107_s3, %s1672_s0  ;;  %s1678_s21 = sld [smem:[#allocation5 + $0x13]] }
  0x31   :  { %v175_v25 = vld [vmem:[%s174_s14] sm:$0x1]  ;;  %s181_s16 = scalar_lea.vmem %s3106_s2, %s1673_s29  ;;  %s1679_s25 = sld [smem:[#allocation4 + $0x14]] }
  0x32   :  { %96 = vst.msk [vmem:[#allocation2 + $0x7] sm:$0x1] %vm32_vm0, %v95_v23  ;;  %v176_v26 = vmul.f32 %v175_v25, %v173_v24  ;;  %v182_v27 = vld [vmem:[%s181_s16] sm:$0x1]  ;;  %s183_s22 = scalar_lea.vmem %s3107_s3, %s1674_s5  ;;  %s1680_s26 = sld [smem:[#allocation5 + $0x14]] }
  0x33   :  { %v184_v28 = vld [vmem:[%s183_s22] sm:$0x1]  ;;  %s190_s0 = scalar_lea.vmem %s3106_s2, %s1675_s11  ;;  %s2051_s9 = sld [smem:[#allocation4 + $0x15]] }
  0x34   :  { %177 = vst.msk [vmem:[#allocation2 + $0x10] sm:$0x1] %vm32_vm0, %v176_v26  ;;  %v185_v29 = vmul.f32 %v184_v28, %v182_v27  ;;  %v191_v30 = vld [vmem:[%s190_s0] sm:$0x1]  ;;  %s192_s30 = scalar_lea.vmem %s3107_s3, %s1676_s13  ;;  %s2057_s28 = sld [smem:[#allocation5 + $0x15]] }
  0x35   :  { %v193_v31 = vld [vmem:[%s192_s30] sm:$0x1]  ;;  %s199_s15 = scalar_lea.vmem %s3106_s2, %s1677_s19  ;;  %s2062_s17 = sld [smem:[#allocation4 + $0x16]] }
  0x36   :  { %186 = vst.msk [vmem:[#allocation2 + $0x11] sm:$0x1] %vm32_vm0, %v185_v29  ;;  %v194_v32 = vmul.f32 %v193_v31, %v191_v30  ;;  %v200_v33 = vld [vmem:[%s199_s15] sm:$0x1]  ;;  %s201_s12 = scalar_lea.vmem %s3107_s3, %s1678_s21  ;;  %s2068_s10 = sld [smem:[#allocation5 + $0x16]] }
  0x37   :  { %v202_v34 = vld [vmem:[%s201_s12] sm:$0x1]  ;;  %s208_s19 = scalar_lea.vmem %s3106_s2, %s1679_s25  ;;  %s2073_s23 = sld [smem:[#allocation4 + $0x17]] }
  0x38   :  { %195 = vst.msk [vmem:[#allocation2 + $0x12] sm:$0x1] %vm32_vm0, %v194_v32  ;;  %v203_v35 = vmul.f32 %v202_v34, %v200_v33  ;;  %v209_v36 = vld [vmem:[%s208_s19] sm:$0x1]  ;;  %s210_s21 = scalar_lea.vmem %s3107_s3, %s1680_s26  ;;  %s1686_s20 = sld [smem:[#allocation5 + $0x17]] }
  0x39   :  { %v1177_v37 = vld [vmem:[#allocation2] sm:$0xff]  ;;  %s217_s27 = scalar_lea.vmem %s3106_s2, %s2051_s9  ;;  %s2083_s25 = sld [smem:[#allocation4 + $0x8]] }
  0x3a   :  { %v211_v38 = vld [vmem:[%s210_s21] sm:$0x1]  ;;  %v1194_v39 = vsel %vm1193_vm1, %v1177_v37, 0.0  ;;  %204 = vst.msk [vmem:[#allocation2 + $0x13] sm:$0x1] %vm32_vm0, %v203_v35  ;;  %s219_s26 = scalar_lea.vmem %s3107_s3, %s2057_s28  ;;  %s1656_s29 = sld [smem:[#allocation5 + $0x8]] }
  0x3b   :  { %v212_v40 = vmul.f32 %v211_v38, %v209_v36  ;;  %v218_v41 = vld [vmem:[%s217_s27] sm:$0x1]  ;;  %1195 = vadd.xlane.f32.xlu0 %v1194_v39  ;;  %s226_s9 = scalar_lea.vmem %s3106_s2, %s2062_s17  ;;  %s1657_s5 = sld [smem:[#allocation4 + $0x9]] }
  0x3c   :  { %v220_v42 = vld [vmem:[%s219_s26] sm:$0x1]  ;;  %s228_s11 = scalar_lea.vmem %s3107_s3, %s2068_s10  ;;  %s1658_s8 = sld [smem:[#allocation5 + $0x9]] }
  0x3d   :  { %213 = vst.msk [vmem:[#allocation2 + $0x14] sm:$0x1] %vm32_vm0, %v212_v40  ;;  %v221_v43 = vmul.f32 %v220_v42, %v218_v41  ;;  %v227_v44 = vld [vmem:[%s226_s9] sm:$0x1]  ;;  %s235_s13 = scalar_lea.vmem %s3106_s2, %s2073_s23  ;;  %s1659_s14 = sld [smem:[#allocation4 + $0xa]] }
  0x3e   :  { %v229_v45 = vld [vmem:[%s228_s11] sm:$0x1]  ;;  %s237_s1 = scalar_lea.vmem %s3107_s3, %s1686_s20  ;;  %s1660_s16 = sld [smem:[#allocation5 + $0xa]] }
  0x3f   :  { %222 = vst.msk [vmem:[#allocation2 + $0x15] sm:$0x1] %vm32_vm0, %v221_v43  ;;  %v230_v46 = vmul.f32 %v229_v45, %v227_v44  ;;  %v236_v47 = vld [vmem:[%s235_s13] sm:$0x1]  ;;  %s100_s10 = scalar_lea.vmem %s3106_s2, %s2083_s25  ;;  %s1661_s22 = sld [smem:[#allocation4 + $0xb]] }
  0x40   :  { %v238_v48 = vld [vmem:[%s237_s1] sm:$0x1]  ;;  %s102_s7 = scalar_lea.vmem %s3107_s3, %s1656_s29  ;;  %s1662_s0 = sld [smem:[#allocation5 + $0xb]] }
  0x41   :  { %231 = vst.msk [vmem:[#allocation2 + $0x16] sm:$0x1] %vm32_vm0, %v230_v46  ;;  %v239_v49 = vmul.f32 %v238_v48, %v236_v47  ;;  %v101_v50 = vld [vmem:[%s100_s10] sm:$0x1]  ;;  %s109_s20 = scalar_lea.vmem %s3106_s2, %s1657_s5  ;;  %s1663_s30 = sld [smem:[#allocation4 + $0xc]] }
  0x42   :  { %v103_v51 = vld [vmem:[%s102_s7] sm:$0x1]  ;;  %s111_s6 = scalar_lea.vmem %s3107_s3, %s1658_s8  ;;  %s1664_s15 = sld [smem:[#allocation5 + $0xc]] }
  0x43   :  { %240 = vst.msk [vmem:[#allocation2 + $0x17] sm:$0x1] %vm32_vm0, %v239_v49  ;;  %v104_v52 = vmul.f32 %v103_v51, %v101_v50  ;;  %v110_v53 = vld [vmem:[%s109_s20] sm:$0x1]  ;;  %s118_s29 = scalar_lea.vmem %s3106_s2, %s1659_s14  ;;  %s2126_s12 = sld [smem:[#allocation4 + $0xd]] }
  0x44   :  { %v112_v54 = vld [vmem:[%s111_s6] sm:$0x1]  ;;  %s120_s17 = scalar_lea.vmem %s3107_s3, %s1660_s16  ;;  %s1666_s19 = sld [smem:[#allocation5 + $0xd]] }
  0x45   :  { %105 = vst.msk [vmem:[#allocation2 + $0x8] sm:$0x1] %vm32_vm0, %v104_v52  ;;  %v113_v55 = vmul.f32 %v112_v54, %v110_v53  ;;  %v119_v56 = vld [vmem:[%s118_s29] sm:$0x1]  ;;  %s127_s21 = scalar_lea.vmem %s3106_s2, %s1661_s22  ;;  %s2135_s18 = sld [smem:[#allocation4 + $0xe]] }
  0x46   :  { %v121_v57 = vld [vmem:[%s120_s17] sm:$0x1]  ;;  %s129_s23 = scalar_lea.vmem %s3107_s3, %s1662_s0  ;;  %s1668_s27 = sld [smem:[#allocation5 + $0xe]] }
  0x47   :  { %114 = vst.msk [vmem:[#allocation2 + $0x9] sm:$0x1] %vm32_vm0, %v113_v55  ;;  %v122_v58 = vmul.f32 %v121_v57, %v119_v56  ;;  %v128_v59 = vld [vmem:[%s127_s21] sm:$0x1]  ;;  %s136_s26 = scalar_lea.vmem %s3106_s2, %s1663_s30  ;;  %s2144_s24 = sld [smem:[#allocation4 + $0xf]] }
  0x48   :  { %v130_v60 = vld [vmem:[%s129_s23] sm:$0x1]  ;;  %s138_s25 = scalar_lea.vmem %s3107_s3, %s1664_s15  ;;  %s1670_s9 = sld [smem:[#allocation5 + $0xf]] }
  0x49   :  { %123 = vst.msk [vmem:[#allocation2 + $0xa] sm:$0x1] %vm32_vm0, %v122_v58  ;;  %v131_v61 = vmul.f32 %v130_v60, %v128_v59  ;;  %v137_v62 = vld [vmem:[%s136_s26] sm:$0x1]  ;;  %s145_s11 = scalar_lea.vmem %s3106_s2, %s2126_s12  ;;  %s2154_s28 = sld [smem:[#allocation4 + $0x18]] }
  0x4a   :  { %v1179_v63 = vld [vmem:[#allocation2 + $0x10] sm:$0xff]  ;;  %v139_v0 = vld [vmem:[%s138_s25] sm:$0x1]  ;;  %s147_s15 = scalar_lea.vmem %s3107_s3, %s1666_s19  ;;  %s1688_s5 = sld [smem:[#allocation5 + $0x18]] }
  0x4b   :  { %v1200_v1 = vsel %vm1193_vm1, %v1179_v63, 0.0  ;;  %132 = vst.msk [vmem:[#allocation2 + $0xb] sm:$0x1] %vm32_vm0, %v131_v61  ;;  %v140_v2 = vmul.f32 %v139_v0, %v137_v62  ;;  %v146_v3 = vld [vmem:[%s145_s11] sm:$0x1]  ;;  %s154_s12 = scalar_lea.vmem %s3106_s2, %s2135_s18  ;;  %s1689_s1 = sld [smem:[#allocation4 + $0x19]] }
  0x4c   :  { %1201 = vadd.xlane.f32.xlu1 %v1200_v1  ;;  %v148_v4 = vld [vmem:[%s147_s15] sm:$0x1]  ;;  %s156_s14 = scalar_lea.vmem %s3107_s3, %s1668_s27  ;;  %s1690_s10 = sld [smem:[#allocation5 + $0x19]] }
  0x4d   :  { %141 = vst.msk [vmem:[#allocation2 + $0xc] sm:$0x1] %vm32_vm0, %v140_v2  ;;  %v149_v5 = vmul.f32 %v148_v4, %v146_v3  ;;  %v155_v6 = vld [vmem:[%s154_s12] sm:$0x1]  ;;  %s163_s16 = scalar_lea.vmem %s3106_s2, %s2144_s24  ;;  %s1691_s7 = sld [smem:[#allocation4 + $0x1a]] }
  0x4e   :  { %v157_v7 = vld [vmem:[%s156_s14] sm:$0x1]  ;;  %s165_s22 = scalar_lea.vmem %s3107_s3, %s1670_s9  ;;  %s1692_s20 = sld [smem:[#allocation5 + $0x1a]] }
  0x4f   :  { %150 = vst.msk [vmem:[#allocation2 + $0xd] sm:$0x1] %vm32_vm0, %v149_v5  ;;  %v158_v8 = vmul.f32 %v157_v7, %v155_v6  ;;  %v164_v9 = vld [vmem:[%s163_s16] sm:$0x1]  ;;  %s244_s27 = scalar_lea.vmem %s3106_s2, %s2154_s28  ;;  %s1693_s6 = sld [smem:[#allocation4 + $0x1b]] }
  0x50   :  { %v166_v10 = vld [vmem:[%s165_s22] sm:$0x1]  ;;  %s246_s30 = scalar_lea.vmem %s3107_s3, %s1688_s5  ;;  %s1694_s29 = sld [smem:[#allocation5 + $0x1b]] }
  0x51   :  { %159 = vst.msk [vmem:[#allocation2 + $0xe] sm:$0x1] %vm32_vm0, %v158_v8  ;;  %v167_v11 = vmul.f32 %v166_v10, %v164_v9  ;;  %v245_v12 = vld [vmem:[%s244_s27] sm:$0x1]  ;;  %s253_s9 = scalar_lea.vmem %s3106_s2, %s1689_s1  ;;  %s1695_s17 = sld [smem:[#allocation4 + $0x1c]] }
  0x52   :  { %v247_v13 = vld [vmem:[%s246_s30] sm:$0x1]  ;;  %s255_s8 = scalar_lea.vmem %s3107_s3, %s1690_s10  ;;  %s1696_s21 = sld [smem:[#allocation5 + $0x1c]] }
  0x53   :  { %168 = vst.msk [vmem:[#allocation2 + $0xf] sm:$0x1] %vm32_vm0, %v167_v11  ;;  %v248_v14 = vmul.f32 %v247_v13, %v245_v12  ;;  %v254_v15 = vld [vmem:[%s253_s9] sm:$0x1]  ;;  %s262_s5 = scalar_lea.vmem %s3106_s2, %s1691_s7  ;;  %s2195_s23 = sld [smem:[#allocation4 + $0x1d]] }
  0x54   :  { %v256_v16 = vld [vmem:[%s255_s8] sm:$0x1]  ;;  %s264_s18 = scalar_lea.vmem %s3107_s3, %s1692_s20  ;;  %s1698_s26 = sld [smem:[#allocation5 + $0x1d]] }
  0x55   :  { %249 = vst.msk [vmem:[#allocation2 + $0x18] sm:$0x1] %vm32_vm0, %v248_v14  ;;  %v257_v17 = vmul.f32 %v256_v16, %v254_v15  ;;  %v263_v18 = vld [vmem:[%s262_s5] sm:$0x1]  ;;  %s271_s25 = scalar_lea.vmem %s3106_s2, %s1693_s6  ;;  %s2204_s0 = sld [smem:[#allocation4 + $0x1e]] }
  0x56   :  { %v265_v19 = vld [vmem:[%s264_s18] sm:$0x1]  ;;  %s273_s24 = scalar_lea.vmem %s3107_s3, %s1694_s29  ;;  %s1700_s11 = sld [smem:[#allocation5 + $0x1e]] }
  0x57   :  { %258 = vst.msk [vmem:[#allocation2 + $0x19] sm:$0x1] %vm32_vm0, %v257_v17  ;;  %v266_v20 = vmul.f32 %v265_v19, %v263_v18  ;;  %v272_v21 = vld [vmem:[%s271_s25] sm:$0x1]  ;;  %s280_s15 = scalar_lea.vmem %s3106_s2, %s1695_s17  ;;  %s2213_s13 = sld [smem:[#allocation4 + $0x1f]] }
  0x58   :  { %v274_v22 = vld [vmem:[%s273_s24] sm:$0x1]  ;;  %s282_s28 = scalar_lea.vmem %s3107_s3, %s1696_s21  ;;  %s1702_s12 = sld [smem:[#allocation5 + $0x1f]] }
  0x59   :  { %267 = vst.msk [vmem:[#allocation2 + $0x1a] sm:$0x1] %vm32_vm0, %v266_v20  ;;  %v275_v23 = vmul.f32 %v274_v22, %v272_v21  ;;  %v281_v24 = vld [vmem:[%s280_s15] sm:$0x1]  ;;  %s289_s14 = scalar_lea.vmem %s3106_s2, %s2195_s23  ;;  %s2223_s19 = sld [smem:[#allocation4 + $0x20]] }
  0x5a   :  { %v1178_v25 = vld [vmem:[#allocation2 + $0x8] sm:$0xff]  ;;  %v283_v26 = vld [vmem:[%s282_s28] sm:$0x1]  ;;  %s291_s21 = scalar_lea.vmem %s3107_s3, %s1698_s26  ;;  %s1704_s1 = sld [smem:[#allocation5 + $0x20]] }
  0x5b   :  { %v1197_v27 = vsel %vm1193_vm1, %v1178_v25, 0.0  ;;  %276 = vst.msk [vmem:[#allocation2 + $0x1b] sm:$0x1] %vm32_vm0, %v275_v23  ;;  %v284_v28 = vmul.f32 %v283_v26, %v281_v24  ;;  %v290_v29 = vld [vmem:[%s289_s14] sm:$0x1]  ;;  %s298_s23 = scalar_lea.vmem %s3106_s2, %s2204_s0  ;;  %s1705_s22 = sld [smem:[#allocation4 + $0x21]] }
  0x5c   :  { %1198 = vadd.xlane.f32.xlu0 %v1197_v27  ;;  %v292_v30 = vld [vmem:[%s291_s21] sm:$0x1]  ;;  %s300_s7 = scalar_lea.vmem %s3107_s3, %s1700_s11  ;;  %s1706_s27 = sld [smem:[#allocation5 + $0x21]] }
  0x5d   :  { %285 = vst.msk [vmem:[#allocation2 + $0x1c] sm:$0x1] %vm32_vm0, %v284_v28  ;;  %v293_v31 = vmul.f32 %v292_v30, %v290_v29  ;;  %v299_v32 = vld [vmem:[%s298_s23] sm:$0x1]  ;;  %s307_s20 = scalar_lea.vmem %s3106_s2, %s2213_s13  ;;  %s1707_s30 = sld [smem:[#allocation4 + $0x22]] }
  0x5e   :  { %v301_v33 = vld [vmem:[%s300_s7] sm:$0x1]  ;;  %s309_s6 = scalar_lea.vmem %s3107_s3, %s1702_s12  ;;  %s1708_s9 = sld [smem:[#allocation5 + $0x22]] }
  0x5f   :  { %294 = vst.msk [vmem:[#allocation2 + $0x1d] sm:$0x1] %vm32_vm0, %v293_v31  ;;  %v302_v34 = vmul.f32 %v301_v33, %v299_v32  ;;  %v308_v35 = vld [vmem:[%s307_s20] sm:$0x1]  ;;  %s316_s11 = scalar_lea.vmem %s3106_s2, %s2223_s19  ;;  %s1709_s8 = sld [smem:[#allocation4 + $0x23]] }
  0x60   :  { %v310_v36 = vld [vmem:[%s309_s6] sm:$0x1]  ;;  %s318_s17 = scalar_lea.vmem %s3107_s3, %s1704_s1  ;;  %s1710_s5 = sld [smem:[#allocation5 + $0x23]] }
  0x61   :  { %303 = vst.msk [vmem:[#allocation2 + $0x1e] sm:$0x1] %vm32_vm0, %v302_v34  ;;  %v311_v37 = vmul.f32 %v310_v36, %v308_v35  ;;  %v317_v38 = vld [vmem:[%s316_s11] sm:$0x1]  ;;  %s325_s12 = scalar_lea.vmem %s3106_s2, %s1705_s22  ;;  %s1711_s18 = sld [smem:[#allocation4 + $0x24]] }
  0x62   :  { %v319_v39 = vld [vmem:[%s318_s17] sm:$0x1]  ;;  %s327_s10 = scalar_lea.vmem %s3107_s3, %s1706_s27  ;;  %s1712_s25 = sld [smem:[#allocation5 + $0x24]] }
  0x63   :  { %312 = vst.msk [vmem:[#allocation2 + $0x1f] sm:$0x1] %vm32_vm0, %v311_v37  ;;  %v320_v40 = vmul.f32 %v319_v39, %v317_v38  ;;  %v326_v41 = vld [vmem:[%s325_s12] sm:$0x1]  ;;  %s334_s1 = scalar_lea.vmem %s3106_s2, %s1707_s30  ;;  %s2264_s24 = sld [smem:[#allocation4 + $0x25]] }
  0x64   :  { %v328_v42 = vld [vmem:[%s327_s10] sm:$0x1]  ;;  %s336_s0 = scalar_lea.vmem %s3107_s3, %s1708_s9  ;;  %s1714_s15 = sld [smem:[#allocation5 + $0x25]] }
  0x65   :  { %321 = vst.msk [vmem:[#allocation2 + $0x20] sm:$0x1] %vm32_vm0, %v320_v40  ;;  %v329_v43 = vmul.f32 %v328_v42, %v326_v41  ;;  %v335_v44 = vld [vmem:[%s334_s1] sm:$0x1]  ;;  %s343_s28 = scalar_lea.vmem %s3106_s2, %s1709_s8  ;;  %s2273_s29 = sld [smem:[#allocation4 + $0x26]] }
  0x66   :  { %v337_v45 = vld [vmem:[%s336_s0] sm:$0x1]  ;;  %s345_s13 = scalar_lea.vmem %s3107_s3, %s1710_s5  ;;  %s1716_s14 = sld [smem:[#allocation5 + $0x26]] }
  0x67   :  { %330 = vst.msk [vmem:[#allocation2 + $0x21] sm:$0x1] %vm32_vm0, %v329_v43  ;;  %v338_v46 = vmul.f32 %v337_v45, %v335_v44  ;;  %v344_v47 = vld [vmem:[%s343_s28] sm:$0x1]  ;;  %s352_s21 = scalar_lea.vmem %s3106_s2, %s1711_s18  ;;  %s2282_s16 = sld [smem:[#allocation4 + $0x27]] }
  0x68   :  { %v346_v48 = vld [vmem:[%s345_s13] sm:$0x1]  ;;  %s354_s19 = scalar_lea.vmem %s3107_s3, %s1712_s25  ;;  %s1718_s23 = sld [smem:[#allocation5 + $0x27]] }
  0x69   :  { %339 = vst.msk [vmem:[#allocation2 + $0x22] sm:$0x1] %vm32_vm0, %v338_v46  ;;  %v347_v49 = vmul.f32 %v346_v48, %v344_v47  ;;  %v353_v50 = vld [vmem:[%s352_s21] sm:$0x1]  ;;  %s361_s7 = scalar_lea.vmem %s3106_s2, %s2264_s24  ;;  %s2292_s26 = sld [smem:[#allocation4 + $0x28]] }
  0x6a   :  { %v1180_v51 = vld [vmem:[#allocation2 + $0x18] sm:$0xff]  ;;  %v355_v52 = vld [vmem:[%s354_s19] sm:$0x1]  ;;  %s363_s25 = scalar_lea.vmem %s3107_s3, %s1714_s15  ;;  %s1720_s22 = sld [smem:[#allocation5 + $0x28]] }
  0x6b   :  { %v1203_v53 = vsel %vm1193_vm1, %v1180_v51, 0.0  ;;  %348 = vst.msk [vmem:[#allocation2 + $0x23] sm:$0x1] %vm32_vm0, %v347_v49  ;;  %v356_v54 = vmul.f32 %v355_v52, %v353_v50  ;;  %v362_v55 = vld [vmem:[%s361_s7] sm:$0x1]  ;;  %s370_s24 = scalar_lea.vmem %s3106_s2, %s2273_s29  ;;  %s1721_s6 = sld [smem:[#allocation4 + $0x29]] }
  0x6c   :  { %1204 = vadd.xlane.f32.xlu1 %v1203_v53  ;;  %v364_v56 = vld [vmem:[%s363_s25] sm:$0x1]  ;;  %s372_s30 = scalar_lea.vmem %s3107_s3, %s1716_s14  ;;  %s1722_s11 = sld [smem:[#allocation5 + $0x29]] }
  0x6d   :  { %357 = vst.msk [vmem:[#allocation2 + $0x24] sm:$0x1] %vm32_vm0, %v356_v54  ;;  %v365_v57 = vmul.f32 %v364_v56, %v362_v55  ;;  %v371_v58 = vld [vmem:[%s370_s24] sm:$0x1]  ;;  %s379_s9 = scalar_lea.vmem %s3106_s2, %s2282_s16  ;;  %s1723_s17 = sld [smem:[#allocation4 + $0x2a]] }
  0x6e   :  { %v373_v59 = vld [vmem:[%s372_s30] sm:$0x1]  ;;  %s381_s8 = scalar_lea.vmem %s3107_s3, %s1718_s23  ;;  %s1724_s12 = sld [smem:[#allocation5 + $0x2a]] }
  0x6f   :  { %366 = vst.msk [vmem:[#allocation2 + $0x25] sm:$0x1] %vm32_vm0, %v365_v57  ;;  %v374_v60 = vmul.f32 %v373_v59, %v371_v58  ;;  %v380_v61 = vld [vmem:[%s379_s9] sm:$0x1]  ;;  %s388_s14 = scalar_lea.vmem %s3106_s2, %s2292_s26  ;;  %s1725_s10 = sld [smem:[#allocation4 + $0x2b]] }
  0x70   :  { %v382_v62 = vld [vmem:[%s381_s8] sm:$0x1]  ;;  %s390_s18 = scalar_lea.vmem %s3107_s3, %s1720_s22  ;;  %s1726_s1 = sld [smem:[#allocation5 + $0x2b]] }
  0x71   :  { %375 = vst.msk [vmem:[#allocation2 + $0x26] sm:$0x1] %vm32_vm0, %v374_v60  ;;  %v383_v63 = vmul.f32 %v382_v62, %v380_v61  ;;  %v389_v0 = vld [vmem:[%s388_s14] sm:$0x1]  ;;  %s397_s23 = scalar_lea.vmem %s3106_s2, %s1721_s6  ;;  %s1727_s0 = sld [smem:[#allocation4 + $0x2c]] }
  0x72   :  { %v391_v1 = vld [vmem:[%s390_s18] sm:$0x1]  ;;  %s399_s27 = scalar_lea.vmem %s3107_s3, %s1722_s11  ;;  %s1728_s28 = sld [smem:[#allocation5 + $0x2c]] }
  0x73   :  { %384 = vst.msk [vmem:[#allocation2 + $0x27] sm:$0x1] %vm32_vm0, %v383_v63  ;;  %v392_v2 = vmul.f32 %v391_v1, %v389_v0  ;;  %v398_v3 = vld [vmem:[%s397_s23] sm:$0x1]  ;;  %s406_s22 = scalar_lea.vmem %s3106_s2, %s1723_s17  ;;  %s2333_s13 = sld [smem:[#allocation4 + $0x2d]] }
  0x74   :  { %v400_v4 = vld [vmem:[%s399_s27] sm:$0x1]  ;;  %s408_s29 = scalar_lea.vmem %s3107_s3, %s1724_s12  ;;  %s1730_s21 = sld [smem:[#allocation5 + $0x2d]] }
  0x75   :  { %393 = vst.msk [vmem:[#allocation2 + $0x28] sm:$0x1] %vm32_vm0, %v392_v2  ;;  %v401_v5 = vmul.f32 %v400_v4, %v398_v3  ;;  %v407_v6 = vld [vmem:[%s406_s22] sm:$0x1]  ;;  %s415_s19 = scalar_lea.vmem %s3106_s2, %s1725_s10  ;;  %s2342_s5 = sld [smem:[#allocation4 + $0x2e]] }
  0x76   :  { %v409_v7 = vld [vmem:[%s408_s29] sm:$0x1]  ;;  %s417_s16 = scalar_lea.vmem %s3107_s3, %s1726_s1  ;;  %s1732_s7 = sld [smem:[#allocation5 + $0x2e]] }
  0x77   :  { %402 = vst.msk [vmem:[#allocation2 + $0x29] sm:$0x1] %vm32_vm0, %v401_v5  ;;  %v410_v8 = vmul.f32 %v409_v7, %v407_v6  ;;  %v416_v9 = vld [vmem:[%s415_s19] sm:$0x1]  ;;  %s424_s25 = scalar_lea.vmem %s3106_s2, %s1727_s0  ;;  %s2351_s20 = sld [smem:[#allocation4 + $0x2f]] }
  0x78   :  { %v418_v10 = vld [vmem:[%s417_s16] sm:$0x1]  ;;  %s426_s26 = scalar_lea.vmem %s3107_s3, %s1728_s28  ;;  %s1734_s24 = sld [smem:[#allocation5 + $0x2f]] }
  0x79   :  { %411 = vst.msk [vmem:[#allocation2 + $0x2a] sm:$0x1] %vm32_vm0, %v410_v8  ;;  %v419_v11 = vmul.f32 %v418_v10, %v416_v9  ;;  %v425_v12 = vld [vmem:[%s424_s25] sm:$0x1]  ;;  %s433_s30 = scalar_lea.vmem %s3106_s2, %s2333_s13  ;;  %s2361_s15 = sld [smem:[#allocation4 + $0x30]] }
  0x7a   :  { %v1181_v13 = vld [vmem:[#allocation2 + $0x20] sm:$0xff]  ;;  %s435_s28 = scalar_lea.vmem %s3107_s3, %s1730_s21  ;;  %s1736_s6 = sld [smem:[#allocation5 + $0x30]] }
  0x7b   :  { %v427_v14 = vld [vmem:[%s426_s26] sm:$0x1]  ;;  %v1206_v15 = vsel %vm1193_vm1, %v1181_v13, 0.0  ;;  %420 = vst.msk [vmem:[#allocation2 + $0x2b] sm:$0x1] %vm32_vm0, %v419_v11  ;;  %s442_s13 = scalar_lea.vmem %s3106_s2, %s2342_s5  ;;  %s1737_s8 = sld [smem:[#allocation4 + $0x31]] }
  0x7c   :  { %v428_v16 = vmul.f32 %v427_v14, %v425_v12  ;;  %v434_v17 = vld [vmem:[%s433_s30] sm:$0x1]  ;;  %1207 = vadd.xlane.f32.xlu0 %v1206_v15  ;;  %s444_s17 = scalar_lea.vmem %s3107_s3, %s1732_s7  ;;  %s1738_s14 = sld [smem:[#allocation5 + $0x31]] }
  0x7d   :  { %v436_v18 = vld [vmem:[%s435_s28] sm:$0x1]  ;;  %s451_s12 = scalar_lea.vmem %s3106_s2, %s2351_s20  ;;  %s1739_s18 = sld [smem:[#allocation4 + $0x32]] }
  0x7e   :  { %429 = vst.msk [vmem:[#allocation2 + $0x2c] sm:$0x1] %vm32_vm0, %v428_v16  ;;  %v437_v19 = vmul.f32 %v436_v18, %v434_v17  ;;  %v443_v20 = vld [vmem:[%s442_s13] sm:$0x1]  ;;  %s453_s10 = scalar_lea.vmem %s3107_s3, %s1734_s24  ;;  %s1740_s23 = sld [smem:[#allocation5 + $0x32]] }
  0x7f   :  { %v445_v21 = vld [vmem:[%s444_s17] sm:$0x1]  ;;  %s460_s7 = scalar_lea.vmem %s3106_s2, %s2361_s15  ;;  %s1741_s27 = sld [smem:[#allocation4 + $0x33]] }
  0x80   :  { %438 = vst.msk [vmem:[#allocation2 + $0x2d] sm:$0x1] %vm32_vm0, %v437_v19  ;;  %v446_v22 = vmul.f32 %v445_v21, %v443_v20  ;;  %v452_v23 = vld [vmem:[%s451_s12] sm:$0x1]  ;;  %s462_s0 = scalar_lea.vmem %s3107_s3, %s1736_s6  ;;  %s1742_s22 = sld [smem:[#allocation5 + $0x33]] }
  0x81   :  { %v454_v24 = vld [vmem:[%s453_s10] sm:$0x1]  ;;  %s469_s24 = scalar_lea.vmem %s3106_s2, %s1737_s8  ;;  %s1743_s29 = sld [smem:[#allocation4 + $0x34]] }
  0x82   :  { %447 = vst.msk [vmem:[#allocation2 + $0x2e] sm:$0x1] %vm32_vm0, %v446_v22  ;;  %v455_v25 = vmul.f32 %v454_v24, %v452_v23  ;;  %v461_v26 = vld [vmem:[%s460_s7] sm:$0x1]  ;;  %s471_s11 = scalar_lea.vmem %s3107_s3, %s1738_s14  ;;  %s1744_s19 = sld [smem:[#allocation5 + $0x34]] }
  0x83   :  { %v463_v27 = vld [vmem:[%s462_s0] sm:$0x1]  ;;  %s478_s6 = scalar_lea.vmem %s3106_s2, %s1739_s18  ;;  %s2402_s16 = sld [smem:[#allocation4 + $0x35]] }
  0x84   :  { %456 = vst.msk [vmem:[#allocation2 + $0x2f] sm:$0x1] %vm32_vm0, %v455_v25  ;;  %v464_v28 = vmul.f32 %v463_v27, %v461_v26  ;;  %v470_v29 = vld [vmem:[%s469_s24] sm:$0x1]  ;;  %s480_s5 = scalar_lea.vmem %s3107_s3, %s1740_s23  ;;  %s1746_s25 = sld [smem:[#allocation5 + $0x35]] }
  0x85   :  { %v472_v30 = vld [vmem:[%s471_s11] sm:$0x1]  ;;  %s487_s26 = scalar_lea.vmem %s3106_s2, %s1741_s27  ;;  %s2411_s1 = sld [smem:[#allocation4 + $0x36]] }
  0x86   :  { %465 = vst.msk [vmem:[#allocation2 + $0x30] sm:$0x1] %vm32_vm0, %v464_v28  ;;  %v473_v31 = vmul.f32 %v472_v30, %v470_v29  ;;  %v479_v32 = vld [vmem:[%s478_s6] sm:$0x1]  ;;  %s489_s20 = scalar_lea.vmem %s3107_s3, %s1742_s22  ;;  %s1748_s30 = sld [smem:[#allocation5 + $0x36]] }
  0x87   :  { %v481_v33 = vld [vmem:[%s480_s5] sm:$0x1]  ;;  %s496_s28 = scalar_lea.vmem %s3106_s2, %s1743_s29  ;;  %s2420_s9 = sld [smem:[#allocation4 + $0x37]] }
  0x88   :  { %474 = vst.msk [vmem:[#allocation2 + $0x31] sm:$0x1] %vm32_vm0, %v473_v31  ;;  %v482_v34 = vmul.f32 %v481_v33, %v479_v32  ;;  %v488_v35 = vld [vmem:[%s487_s26] sm:$0x1]  ;;  %s498_s15 = scalar_lea.vmem %s3107_s3, %s1744_s19  ;;  %s1750_s13 = sld [smem:[#allocation5 + $0x37]] }
  0x89   :  { %v490_v36 = vld [vmem:[%s489_s20] sm:$0x1]  ;;  %s505_s17 = scalar_lea.vmem %s3106_s2, %s2402_s16  ;;  %s2430_s21 = sld [smem:[#allocation4 + $0x38]] }
  0x8a   :  { %483 = vst.msk [vmem:[#allocation2 + $0x32] sm:$0x1] %vm32_vm0, %v482_v34  ;;  %v491_v37 = vmul.f32 %v490_v36, %v488_v35  ;;  %v497_v38 = vld [vmem:[%s496_s28] sm:$0x1]  ;;  %s507_s19 = scalar_lea.vmem %s3107_s3, %s1746_s25  ;;  %s1752_s8 = sld [smem:[#allocation5 + $0x38]] }
  0x8b   :  { %v1182_v39 = vld [vmem:[#allocation2 + $0x28] sm:$0xff]  ;;  %v499_v40 = vld [vmem:[%s498_s15] sm:$0x1]  ;;  %s514_s16 = scalar_lea.vmem %s3106_s2, %s2411_s1  ;;  %s1753_s10 = sld [smem:[#allocation4 + $0x39]] }
  0x8c   :  { %v1209_v41 = vsel %vm1193_vm1, %v1182_v39, 0.0  ;;  %492 = vst.msk [vmem:[#allocation2 + $0x33] sm:$0x1] %vm32_vm0, %v491_v37  ;;  %v500_v42 = vmul.f32 %v499_v40, %v497_v38  ;;  %v506_v43 = vld [vmem:[%s505_s17] sm:$0x1]  ;;  %s516_s18 = scalar_lea.vmem %s3107_s3, %s1748_s30  ;;  %s1754_s7 = sld [smem:[#allocation5 + $0x39]] }
  0x8d   :  { %1210 = vadd.xlane.f32.xlu1 %v1209_v41  ;;  %v508_v44 = vld [vmem:[%s507_s19] sm:$0x1]  ;;  %s523_s23 = scalar_lea.vmem %s3106_s2, %s2420_s9  ;;  %s1755_s0 = sld [smem:[#allocation4 + $0x3a]] }
  0x8e   :  { %501 = vst.msk [vmem:[#allocation2 + $0x34] sm:$0x1] %vm32_vm0, %v500_v42  ;;  %v509_v45 = vmul.f32 %v508_v44, %v506_v43  ;;  %v515_v46 = vld [vmem:[%s514_s16] sm:$0x1]  ;;  %s525_s27 = scalar_lea.vmem %s3107_s3, %s1750_s13  ;;  %s1756_s24 = sld [smem:[#allocation5 + $0x3a]] }
  0x8f   :  { %v517_v47 = vld [vmem:[%s516_s18] sm:$0x1]  ;;  %s532_s30 = scalar_lea.vmem %s3106_s2, %s2430_s21  ;;  %s1757_s11 = sld [smem:[#allocation4 + $0x3b]] }
  0x90   :  { %510 = vst.msk [vmem:[#allocation2 + $0x35] sm:$0x1] %vm32_vm0, %v509_v45  ;;  %v518_v48 = vmul.f32 %v517_v47, %v515_v46  ;;  %v524_v49 = vld [vmem:[%s523_s23] sm:$0x1]  ;;  %s534_s29 = scalar_lea.vmem %s3107_s3, %s1752_s8  ;;  %s1758_s6 = sld [smem:[#allocation5 + $0x3b]] }
  0x91   :  { %v526_v50 = vld [vmem:[%s525_s27] sm:$0x1]  ;;  %s541_s13 = scalar_lea.vmem %s3106_s2, %s1753_s10  ;;  %s1759_s5 = sld [smem:[#allocation4 + $0x3c]] }
  0x92   :  { %519 = vst.msk [vmem:[#allocation2 + $0x36] sm:$0x1] %vm32_vm0, %v518_v48  ;;  %v527_v51 = vmul.f32 %v526_v50, %v524_v49  ;;  %v533_v52 = vld [vmem:[%s532_s30] sm:$0x1]  ;;  %s543_s14 = scalar_lea.vmem %s3107_s3, %s1754_s7  ;;  %s1760_s26 = sld [smem:[#allocation5 + $0x3c]] }
  0x93   :  { %v535_v53 = vld [vmem:[%s534_s29] sm:$0x1]  ;;  %s550_s8 = scalar_lea.vmem %s3106_s2, %s1755_s0  ;;  %s2471_s20 = sld [smem:[#allocation4 + $0x3d]] }
  0x94   :  { %528 = vst.msk [vmem:[#allocation2 + $0x37] sm:$0x1] %vm32_vm0, %v527_v51  ;;  %v536_v54 = vmul.f32 %v535_v53, %v533_v52  ;;  %v542_v55 = vld [vmem:[%s541_s13] sm:$0x1]  ;;  %s552_s1 = scalar_lea.vmem %s3107_s3, %s1756_s24  ;;  %s1762_s28 = sld [smem:[#allocation5 + $0x3d]] }
  0x95   :  { %v544_v56 = vld [vmem:[%s543_s14] sm:$0x1]  ;;  %s559_s15 = scalar_lea.vmem %s3106_s2, %s1757_s11  ;;  %s2480_s22 = sld [smem:[#allocation4 + $0x3e]] }
  0x96   :  { %537 = vst.msk [vmem:[#allocation2 + $0x38] sm:$0x1] %vm32_vm0, %v536_v54  ;;  %v545_v57 = vmul.f32 %v544_v56, %v542_v55  ;;  %v551_v58 = vld [vmem:[%s550_s8] sm:$0x1]  ;;  %s561_s9 = scalar_lea.vmem %s3107_s3, %s1758_s6  ;;  %s1764_s17 = sld [smem:[#allocation5 + $0x3e]] }
  0x97   :  { %v553_v59 = vld [vmem:[%s552_s1] sm:$0x1]  ;;  %s568_s19 = scalar_lea.vmem %s3106_s2, %s1759_s5  ;;  %s2489_s12 = sld [smem:[#allocation4 + $0x3f]] }
  0x98   :  { %546 = vst.msk [vmem:[#allocation2 + $0x39] sm:$0x1] %vm32_vm0, %v545_v57  ;;  %v554_v60 = vmul.f32 %v553_v59, %v551_v58  ;;  %v560_v61 = vld [vmem:[%s559_s15] sm:$0x1]  ;;  %s570_s21 = scalar_lea.vmem %s3107_s3, %s1760_s26  ;;  %s1766_s16 = sld [smem:[#allocation5 + $0x3f]] }
  0x99   :  { %v562_v62 = vld [vmem:[%s561_s9] sm:$0x1]  ;;  %s577_s18 = scalar_lea.vmem %s3106_s2, %s2471_s20  ;;  %s2499_s25 = sld [smem:[#allocation4 + $0x40]] }
  0x9a   :  { %555 = vst.msk [vmem:[#allocation2 + $0x3a] sm:$0x1] %vm32_vm0, %v554_v60  ;;  %v563_v63 = vmul.f32 %v562_v62, %v560_v61  ;;  %v569_v0 = vld [vmem:[%s568_s19] sm:$0x1]  ;;  %s579_s26 = scalar_lea.vmem %s3107_s3, %s1762_s28  ;;  %s1768_s10 = sld [smem:[#allocation5 + $0x40]] }
  0x9b   :  { %v1183_v1 = vld [vmem:[#allocation2 + $0x30] sm:$0xff]  ;;  %v571_v2 = vld [vmem:[%s570_s21] sm:$0x1]  ;;  %s586_s20 = scalar_lea.vmem %s3106_s2, %s2480_s22  ;;  %s1769_s27 = sld [smem:[#allocation4 + $0x41]] }
  0x9c   :  { %v1212_v3 = vsel %vm1193_vm1, %v1183_v1, 0.0  ;;  %564 = vst.msk [vmem:[#allocation2 + $0x3b] sm:$0x1] %vm32_vm0, %v563_v63  ;;  %v572_v4 = vmul.f32 %v571_v2, %v569_v0  ;;  %v578_v5 = vld [vmem:[%s577_s18] sm:$0x1]  ;;  %s588_s0 = scalar_lea.vmem %s3107_s3, %s1764_s17  ;;  %s1770_s30 = sld [smem:[#allocation5 + $0x41]] }
  0x9d   :  { %1213 = vadd.xlane.f32.xlu0 %v1212_v3  ;;  %v580_v6 = vld [vmem:[%s579_s26] sm:$0x1]  ;;  %s595_s24 = scalar_lea.vmem %s3106_s2, %s2489_s12  ;;  %s1771_s29 = sld [smem:[#allocation4 + $0x42]] }
  0x9e   :  { %573 = vst.msk [vmem:[#allocation2 + $0x3c] sm:$0x1] %vm32_vm0, %v572_v4  ;;  %v581_v7 = vmul.f32 %v580_v6, %v578_v5  ;;  %v587_v8 = vld [vmem:[%s586_s20] sm:$0x1]  ;;  %s597_s11 = scalar_lea.vmem %s3107_s3, %s1766_s16  ;;  %s1772_s13 = sld [smem:[#allocation5 + $0x42]] }
  0x9f   :  { %v589_v9 = vld [vmem:[%s588_s0] sm:$0x1]  ;;  %s604_s17 = scalar_lea.vmem %s3106_s2, %s2499_s25  ;;  %s1773_s14 = sld [smem:[#allocation4 + $0x43]] }
  0xa0   :  { %582 = vst.msk [vmem:[#allocation2 + $0x3d] sm:$0x1] %vm32_vm0, %v581_v7  ;;  %v590_v10 = vmul.f32 %v589_v9, %v587_v8  ;;  %v596_v11 = vld [vmem:[%s595_s24] sm:$0x1]  ;;  %s606_s5 = scalar_lea.vmem %s3107_s3, %s1768_s10  ;;  %s1774_s8 = sld [smem:[#allocation5 + $0x43]] }
  0xa1   :  { %v598_v12 = vld [vmem:[%s597_s11] sm:$0x1]  ;;  %s613_s16 = scalar_lea.vmem %s3106_s2, %s1769_s27  ;;  %s1775_s1 = sld [smem:[#allocation4 + $0x44]] }
  0xa2   :  { %591 = vst.msk [vmem:[#allocation2 + $0x3e] sm:$0x1] %vm32_vm0, %v590_v10  ;;  %v599_v13 = vmul.f32 %v598_v12, %v596_v11  ;;  %v605_v14 = vld [vmem:[%s604_s17] sm:$0x1]  ;;  %s615_s7 = scalar_lea.vmem %s3107_s3, %s1770_s30  ;;  %s1776_s15 = sld [smem:[#allocation5 + $0x44]] }
  0xa3   :  { %v607_v15 = vld [vmem:[%s606_s5] sm:$0x1]  ;;  %s622_s10 = scalar_lea.vmem %s3106_s2, %s1771_s29  ;;  %s2540_s9 = sld [smem:[#allocation4 + $0x45]] }
  0xa4   :  { %600 = vst.msk [vmem:[#allocation2 + $0x3f] sm:$0x1] %vm32_vm0, %v599_v13  ;;  %v608_v16 = vmul.f32 %v607_v15, %v605_v14  ;;  %v614_v17 = vld [vmem:[%s613_s16] sm:$0x1]  ;;  %s624_s22 = scalar_lea.vmem %s3107_s3, %s1772_s13  ;;  %s1778_s19 = sld [smem:[#allocation5 + $0x45]] }
  0xa5   :  { %v616_v18 = vld [vmem:[%s615_s7] sm:$0x1]  ;;  %s631_s21 = scalar_lea.vmem %s3106_s2, %s1773_s14  ;;  %s2549_s6 = sld [smem:[#allocation4 + $0x46]] }
  0xa6   :  { %609 = vst.msk [vmem:[#allocation2 + $0x40] sm:$0x1] %vm32_vm0, %v608_v16  ;;  %v617_v19 = vmul.f32 %v616_v18, %v614_v17  ;;  %v623_v20 = vld [vmem:[%s622_s10] sm:$0x1]  ;;  %s633_s12 = scalar_lea.vmem %s3107_s3, %s1774_s8  ;;  %s1780_s18 = sld [smem:[#allocation5 + $0x46]] }
  0xa7   :  { %v625_v21 = vld [vmem:[%s624_s22] sm:$0x1]  ;;  %s640_s26 = scalar_lea.vmem %s3106_s2, %s1775_s1  ;;  %s2558_s23 = sld [smem:[#allocation4 + $0x47]] }
  0xa8   :  { %618 = vst.msk [vmem:[#allocation2 + $0x41] sm:$0x1] %vm32_vm0, %v617_v19  ;;  %v626_v22 = vmul.f32 %v625_v21, %v623_v20  ;;  %v632_v23 = vld [vmem:[%s631_s21] sm:$0x1]  ;;  %s642_s25 = scalar_lea.vmem %s3107_s3, %s1776_s15  ;;  %s1782_s20 = sld [smem:[#allocation5 + $0x47]] }
  0xa9   :  { %v634_v24 = vld [vmem:[%s633_s12] sm:$0x1]  ;;  %s649_s0 = scalar_lea.vmem %s3106_s2, %s2540_s9  ;;  %s2568_s28 = sld [smem:[#allocation4 + $0x48]] }
  0xaa   :  { %627 = vst.msk [vmem:[#allocation2 + $0x42] sm:$0x1] %vm32_vm0, %v626_v22  ;;  %v635_v25 = vmul.f32 %v634_v24, %v632_v23  ;;  %v641_v26 = vld [vmem:[%s640_s26] sm:$0x1]  ;;  %s651_s15 = scalar_lea.vmem %s3107_s3, %s1778_s19  ;;  %s1784_s27 = sld [smem:[#allocation5 + $0x48]] }
  0xab   :  { %v1184_v27 = vld [vmem:[#allocation2 + $0x38] sm:$0xff]  ;;  %v643_v28 = vld [vmem:[%s642_s25] sm:$0x1]  ;;  %s658_s9 = scalar_lea.vmem %s3106_s2, %s2549_s6  ;;  %s1785_s11 = sld [smem:[#allocation4 + $0x49]] }
  0xac   :  { %v1215_v29 = vsel %vm1193_vm1, %v1184_v27, 0.0  ;;  %636 = vst.msk [vmem:[#allocation2 + $0x43] sm:$0x1] %vm32_vm0, %v635_v25  ;;  %v644_v30 = vmul.f32 %v643_v28, %v641_v26  ;;  %v650_v31 = vld [vmem:[%s649_s0] sm:$0x1]  ;;  %s660_s29 = scalar_lea.vmem %s3107_s3, %s1780_s18  ;;  %s1786_s17 = sld [smem:[#allocation5 + $0x49]] }
  0xad   :  { %1216 = vadd.xlane.f32.xlu1 %v1215_v29  ;;  %v652_v32 = vld [vmem:[%s651_s15] sm:$0x1]  ;;  %s667_s13 = scalar_lea.vmem %s3106_s2, %s2558_s23  ;;  %s1787_s5 = sld [smem:[#allocation4 + $0x4a]] }
  0xae   :  { %645 = vst.msk [vmem:[#allocation2 + $0x44] sm:$0x1] %vm32_vm0, %v644_v30  ;;  %v653_v33 = vmul.f32 %v652_v32, %v650_v31  ;;  %v659_v34 = vld [vmem:[%s658_s9] sm:$0x1]  ;;  %s669_s14 = scalar_lea.vmem %s3107_s3, %s1782_s20  ;;  %s1788_s16 = sld [smem:[#allocation5 + $0x4a]] }
  0xaf   :  { %v661_v35 = vld [vmem:[%s660_s29] sm:$0x1]  ;;  %s676_s18 = scalar_lea.vmem %s3106_s2, %s2568_s28  ;;  %s1789_s7 = sld [smem:[#allocation4 + $0x4b]] }
  0xb0   :  { %654 = vst.msk [vmem:[#allocation2 + $0x45] sm:$0x1] %vm32_vm0, %v653_v33  ;;  %v662_v36 = vmul.f32 %v661_v35, %v659_v34  ;;  %v668_v37 = vld [vmem:[%s667_s13] sm:$0x1]  ;;  %s678_s1 = scalar_lea.vmem %s3107_s3, %s1784_s27  ;;  %s1790_s10 = sld [smem:[#allocation5 + $0x4b]] }
  0xb1   :  { %v670_v38 = vld [vmem:[%s669_s14] sm:$0x1]  ;;  %s685_s20 = scalar_lea.vmem %s3106_s2, %s1785_s11  ;;  %s1791_s22 = sld [smem:[#allocation4 + $0x4c]] }
  0xb2   :  { %663 = vst.msk [vmem:[#allocation2 + $0x46] sm:$0x1] %vm32_vm0, %v662_v36  ;;  %v671_v39 = vmul.f32 %v670_v38, %v668_v37  ;;  %v677_v40 = vld [vmem:[%s676_s18] sm:$0x1]  ;;  %s687_s30 = scalar_lea.vmem %s3107_s3, %s1786_s17  ;;  %s1792_s21 = sld [smem:[#allocation5 + $0x4c]] }
  0xb3   :  { %v679_v41 = vld [vmem:[%s678_s1] sm:$0x1]  ;;  %s694_s27 = scalar_lea.vmem %s3106_s2, %s1787_s5  ;;  %s2609_s12 = sld [smem:[#allocation4 + $0x4d]] }
  0xb4   :  { %672 = vst.msk [vmem:[#allocation2 + $0x47] sm:$0x1] %vm32_vm0, %v671_v39  ;;  %v680_v42 = vmul.f32 %v679_v41, %v677_v40  ;;  %v686_v43 = vld [vmem:[%s685_s20] sm:$0x1]  ;;  %s696_s6 = scalar_lea.vmem %s3107_s3, %s1788_s16  ;;  %s1794_s26 = sld [smem:[#allocation5 + $0x4d]] }
  0xb5   :  { %v688_v44 = vld [vmem:[%s687_s30] sm:$0x1]  ;;  %s703_s25 = scalar_lea.vmem %s3106_s2, %s1789_s7  ;;  %s2618_s8 = sld [smem:[#allocation4 + $0x4e]] }
  0xb6   :  { %681 = vst.msk [vmem:[#allocation2 + $0x48] sm:$0x1] %vm32_vm0, %v680_v42  ;;  %v689_v45 = vmul.f32 %v688_v44, %v686_v43  ;;  %v695_v46 = vld [vmem:[%s694_s27] sm:$0x1]  ;;  %s705_s23 = scalar_lea.vmem %s3107_s3, %s1790_s10  ;;  %s1796_s0 = sld [smem:[#allocation5 + $0x4e]] }
  0xb7   :  { %v697_v47 = vld [vmem:[%s696_s6] sm:$0x1]  ;;  %s712_s15 = scalar_lea.vmem %s3106_s2, %s1791_s22  ;;  %s2627_s24 = sld [smem:[#allocation4 + $0x4f]] }
  0xb8   :  { %690 = vst.msk [vmem:[#allocation2 + $0x49] sm:$0x1] %vm32_vm0, %v689_v45  ;;  %v698_v48 = vmul.f32 %v697_v47, %v695_v46  ;;  %v704_v49 = vld [vmem:[%s703_s25] sm:$0x1]  ;;  %s714_s28 = scalar_lea.vmem %s3107_s3, %s1792_s21  ;;  %s1798_s9 = sld [smem:[#allocation5 + $0x4f]] }
  0xb9   :  { %v706_v50 = vld [vmem:[%s705_s23] sm:$0x1]  ;;  %s721_s29 = scalar_lea.vmem %s3106_s2, %s2609_s12  ;;  %s2637_s19 = sld [smem:[#allocation4 + $0x50]] }
  0xba   :  { %699 = vst.msk [vmem:[#allocation2 + $0x4a] sm:$0x1] %vm32_vm0, %v698_v48  ;;  %v707_v51 = vmul.f32 %v706_v50, %v704_v49  ;;  %v713_v52 = vld [vmem:[%s712_s15] sm:$0x1]  ;;  %s723_s21 = scalar_lea.vmem %s3107_s3, %s1794_s26  ;;  %s1800_s11 = sld [smem:[#allocation5 + $0x50]] }
  0xbb   :  { %v1185_v53 = vld [vmem:[#allocation2 + $0x40] sm:$0xff]  ;;  %s730_s12 = scalar_lea.vmem %s3106_s2, %s2618_s8  ;;  %s1801_s14 = sld [smem:[#allocation4 + $0x51]] }
  0xbc   :  { %v715_v54 = vld [vmem:[%s714_s28] sm:$0x1]  ;;  %v1218_v55 = vsel %vm1193_vm1, %v1185_v53, 0.0  ;;  %708 = vst.msk [vmem:[#allocation2 + $0x4b] sm:$0x1] %vm32_vm0, %v707_v51  ;;  %s732_s5 = scalar_lea.vmem %s3107_s3, %s1796_s0  ;;  %s1802_s18 = sld [smem:[#allocation5 + $0x51]] }
  0xbd   :  { %v716_v56 = vmul.f32 %v715_v54, %v713_v52  ;;  %v722_v57 = vld [vmem:[%s721_s29] sm:$0x1]  ;;  %1219 = vadd.xlane.f32.xlu0 %v1218_v55  ;;  %s739_s16 = scalar_lea.vmem %s3106_s2, %s2627_s24  ;;  %s1803_s1 = sld [smem:[#allocation4 + $0x52]] }
  0xbe   :  { %v724_v58 = vld [vmem:[%s723_s21] sm:$0x1]  ;;  %s741_s7 = scalar_lea.vmem %s3107_s3, %s1798_s9  ;;  %s1804_s20 = sld [smem:[#allocation5 + $0x52]] }
  0xbf   :  { %717 = vst.msk [vmem:[#allocation2 + $0x4c] sm:$0x1] %vm32_vm0, %v716_v56  ;;  %v725_v59 = vmul.f32 %v724_v58, %v722_v57  ;;  %v731_v60 = vld [vmem:[%s730_s12] sm:$0x1]  ;;  %s748_s0 = scalar_lea.vmem %s3106_s2, %s2637_s19  ;;  %s1805_s30 = sld [smem:[#allocation4 + $0x53]] }
  0xc0   :  { %v733_v61 = vld [vmem:[%s732_s5] sm:$0x1]  ;;  %s750_s22 = scalar_lea.vmem %s3107_s3, %s1800_s11  ;;  %s1806_s27 = sld [smem:[#allocation5 + $0x53]] }
  0xc1   :  { %726 = vst.msk [vmem:[#allocation2 + $0x4d] sm:$0x1] %vm32_vm0, %v725_v59  ;;  %v734_v62 = vmul.f32 %v733_v61, %v731_v60  ;;  %v740_v63 = vld [vmem:[%s739_s16] sm:$0x1]  ;;  %s757_s9 = scalar_lea.vmem %s3106_s2, %s1801_s14  ;;  %s1807_s6 = sld [smem:[#allocation4 + $0x54]] }
  0xc2   :  { %v742_v0 = vld [vmem:[%s741_s7] sm:$0x1]  ;;  %s759_s17 = scalar_lea.vmem %s3107_s3, %s1802_s18  ;;  %s1808_s25 = sld [smem:[#allocation5 + $0x54]] }
  0xc3   :  { %735 = vst.msk [vmem:[#allocation2 + $0x4e] sm:$0x1] %vm32_vm0, %v734_v62  ;;  %v743_v1 = vmul.f32 %v742_v0, %v740_v63  ;;  %v749_v2 = vld [vmem:[%s748_s0] sm:$0x1]  ;;  %s766_s11 = scalar_lea.vmem %s3106_s2, %s1803_s1  ;;  %s2678_s23 = sld [smem:[#allocation4 + $0x55]] }
  0xc4   :  { %v751_v3 = vld [vmem:[%s750_s22] sm:$0x1]  ;;  %s768_s8 = scalar_lea.vmem %s3107_s3, %s1804_s20  ;;  %s1810_s15 = sld [smem:[#allocation5 + $0x55]] }
  0xc5   :  { %744 = vst.msk [vmem:[#allocation2 + $0x4f] sm:$0x1] %vm32_vm0, %v743_v1  ;;  %v752_v4 = vmul.f32 %v751_v3, %v749_v2  ;;  %v758_v5 = vld [vmem:[%s757_s9] sm:$0x1]  ;;  %s775_s28 = scalar_lea.vmem %s3106_s2, %s1805_s30  ;;  %s2687_s10 = sld [smem:[#allocation4 + $0x56]] }
  0xc6   :  { %v760_v6 = vld [vmem:[%s759_s17] sm:$0x1]  ;;  %s777_s24 = scalar_lea.vmem %s3107_s3, %s1806_s27  ;;  %s1812_s29 = sld [smem:[#allocation5 + $0x56]] }
  0xc7   :  { %753 = vst.msk [vmem:[#allocation2 + $0x50] sm:$0x1] %vm32_vm0, %v752_v4  ;;  %v761_v7 = vmul.f32 %v760_v6, %v758_v5  ;;  %v767_v8 = vld [vmem:[%s766_s11] sm:$0x1]  ;;  %s784_s21 = scalar_lea.vmem %s3106_s2, %s1807_s6  ;;  %s2696_s13 = sld [smem:[#allocation4 + $0x57]] }
  0xc8   :  { %v769_v9 = vld [vmem:[%s768_s8] sm:$0x1]  ;;  %s786_s19 = scalar_lea.vmem %s3107_s3, %s1808_s25  ;;  %s1814_s12 = sld [smem:[#allocation5 + $0x57]] }
  0xc9   :  { %762 = vst.msk [vmem:[#allocation2 + $0x51] sm:$0x1] %vm32_vm0, %v761_v7  ;;  %v770_v10 = vmul.f32 %v769_v9, %v767_v8  ;;  %v776_v11 = vld [vmem:[%s775_s28] sm:$0x1]  ;;  %s793_s5 = scalar_lea.vmem %s3106_s2, %s2678_s23  ;;  %s2706_s26 = sld [smem:[#allocation4 + $0x58]] }
  0xca   :  { %v778_v12 = vld [vmem:[%s777_s24] sm:$0x1]  ;;  %s795_s25 = scalar_lea.vmem %s3107_s3, %s1810_s15  ;;  %s1816_s14 = sld [smem:[#allocation5 + $0x58]] }
  0xcb   :  { %771 = vst.msk [vmem:[#allocation2 + $0x52] sm:$0x1] %vm32_vm0, %v770_v10  ;;  %v779_v13 = vmul.f32 %v778_v12, %v776_v11  ;;  %v785_v14 = vld [vmem:[%s784_s21] sm:$0x1]  ;;  %s802_s23 = scalar_lea.vmem %s3106_s2, %s2687_s10  ;;  %s1817_s7 = sld [smem:[#allocation4 + $0x59]] }
  0xcc   :  { %v1186_v15 = vld [vmem:[#allocation2 + $0x48] sm:$0xff]  ;;  %v787_v16 = vld [vmem:[%s786_s19] sm:$0x1]  ;;  %s804_s1 = scalar_lea.vmem %s3107_s3, %s1812_s29  ;;  %s1818_s0 = sld [smem:[#allocation5 + $0x59]] }
  0xcd   :  { %v1221_v17 = vsel %vm1193_vm1, %v1186_v15, 0.0  ;;  %780 = vst.msk [vmem:[#allocation2 + $0x53] sm:$0x1] %vm32_vm0, %v779_v13  ;;  %v788_v18 = vmul.f32 %v787_v16, %v785_v14  ;;  %v794_v19 = vld [vmem:[%s793_s5] sm:$0x1]  ;;  %s811_s20 = scalar_lea.vmem %s3106_s2, %s2696_s13  ;;  %s1819_s22 = sld [smem:[#allocation4 + $0x5a]] }
  0xce   :  { %1222 = vadd.xlane.f32.xlu1 %v1221_v17  ;;  %v796_v20 = vld [vmem:[%s795_s25] sm:$0x1]  ;;  %s813_s30 = scalar_lea.vmem %s3107_s3, %s1814_s12  ;;  %s1820_s9 = sld [smem:[#allocation5 + $0x5a]] }
  0xcf   :  { %789 = vst.msk [vmem:[#allocation2 + $0x54] sm:$0x1] %vm32_vm0, %v788_v18  ;;  %v797_v21 = vmul.f32 %v796_v20, %v794_v19  ;;  %v803_v22 = vld [vmem:[%s802_s23] sm:$0x1]  ;;  %s820_s29 = scalar_lea.vmem %s3106_s2, %s2706_s26  ;;  %s1821_s17 = sld [smem:[#allocation4 + $0x5b]] }
  0xd0   :  { %v805_v23 = vld [vmem:[%s804_s1] sm:$0x1]  ;;  %s822_s6 = scalar_lea.vmem %s3107_s3, %s1816_s14  ;;  %s1822_s11 = sld [smem:[#allocation5 + $0x5b]] }
  0xd1   :  { %798 = vst.msk [vmem:[#allocation2 + $0x55] sm:$0x1] %vm32_vm0, %v797_v21  ;;  %v806_v24 = vmul.f32 %v805_v23, %v803_v22  ;;  %v812_v25 = vld [vmem:[%s811_s20] sm:$0x1]  ;;  %s829_s12 = scalar_lea.vmem %s3106_s2, %s1817_s7  ;;  %s1823_s8 = sld [smem:[#allocation4 + $0x5c]] }
  0xd2   :  { %v814_v26 = vld [vmem:[%s813_s30] sm:$0x1]  ;;  %s831_s18 = scalar_lea.vmem %s3107_s3, %s1818_s0  ;;  %s1824_s28 = sld [smem:[#allocation5 + $0x5c]] }
  0xd3   :  { %807 = vst.msk [vmem:[#allocation2 + $0x56] sm:$0x1] %vm32_vm0, %v806_v24  ;;  %v815_v27 = vmul.f32 %v814_v26, %v812_v25  ;;  %v821_v28 = vld [vmem:[%s820_s29] sm:$0x1]  ;;  %s838_s14 = scalar_lea.vmem %s3106_s2, %s1819_s22  ;;  %s2747_s24 = sld [smem:[#allocation4 + $0x5d]] }
  0xd4   :  { %v823_v29 = vld [vmem:[%s822_s6] sm:$0x1]  ;;  %s840_s10 = scalar_lea.vmem %s3107_s3, %s1820_s9  ;;  %s1826_s21 = sld [smem:[#allocation5 + $0x5d]] }
  0xd5   :  { %816 = vst.msk [vmem:[#allocation2 + $0x57] sm:$0x1] %vm32_vm0, %v815_v27  ;;  %v824_v30 = vmul.f32 %v823_v29, %v821_v28  ;;  %v830_v31 = vld [vmem:[%s829_s12] sm:$0x1]  ;;  %s847_s19 = scalar_lea.vmem %s3106_s2, %s1821_s17  ;;  %s2756_s27 = sld [smem:[#allocation4 + $0x5e]] }
  0xd6   :  { %v832_v32 = vld [vmem:[%s831_s18] sm:$0x1]  ;;  %s849_s13 = scalar_lea.vmem %s3107_s3, %s1822_s11  ;;  %s1828_s5 = sld [smem:[#allocation5 + $0x5e]] }
  0xd7   :  { %825 = vst.msk [vmem:[#allocation2 + $0x58] sm:$0x1] %vm32_vm0, %v824_v30  ;;  %v833_v33 = vmul.f32 %v832_v32, %v830_v31  ;;  %v839_v34 = vld [vmem:[%s838_s14] sm:$0x1]  ;;  %s856_s25 = scalar_lea.vmem %s3106_s2, %s1823_s8  ;;  %s2765_s16 = sld [smem:[#allocation4 + $0x5f]] }
  0xd8   :  { %v841_v35 = vld [vmem:[%s840_s10] sm:$0x1]  ;;  %s858_s26 = scalar_lea.vmem %s3107_s3, %s1824_s28  ;;  %s1830_s23 = sld [smem:[#allocation5 + $0x5f]] }
  0xd9   :  { %834 = vst.msk [vmem:[#allocation2 + $0x59] sm:$0x1] %vm32_vm0, %v833_v33  ;;  %v842_v36 = vmul.f32 %v841_v35, %v839_v34  ;;  %v848_v37 = vld [vmem:[%s847_s19] sm:$0x1]  ;;  %s865_s1 = scalar_lea.vmem %s3106_s2, %s2747_s24  ;;  %s2775_s15 = sld [smem:[#allocation4 + $0x60]] }
  0xda   :  { %v850_v38 = vld [vmem:[%s849_s13] sm:$0x1]  ;;  %s867_s28 = scalar_lea.vmem %s3107_s3, %s1826_s21  ;;  %s1832_s7 = sld [smem:[#allocation5 + $0x60]] }
  0xdb   :  { %843 = vst.msk [vmem:[#allocation2 + $0x5a] sm:$0x1] %vm32_vm0, %v842_v36  ;;  %v851_v39 = vmul.f32 %v850_v38, %v848_v37  ;;  %v857_v40 = vld [vmem:[%s856_s25] sm:$0x1]  ;;  %s874_s24 = scalar_lea.vmem %s3106_s2, %s2756_s27  ;;  %s1833_s30 = sld [smem:[#allocation4 + $0x61]] }
  0xdc   :  { %v1187_v41 = vld [vmem:[#allocation2 + $0x50] sm:$0xff]  ;;  %v859_v42 = vld [vmem:[%s858_s26] sm:$0x1]  ;;  %s876_s22 = scalar_lea.vmem %s3107_s3, %s1828_s5  ;;  %s1834_s29 = sld [smem:[#allocation5 + $0x61]] }
  0xdd   :  { %v1224_v43 = vsel %vm1193_vm1, %v1187_v41, 0.0  ;;  %852 = vst.msk [vmem:[#allocation2 + $0x5b] sm:$0x1] %vm32_vm0, %v851_v39  ;;  %v860_v44 = vmul.f32 %v859_v42, %v857_v40  ;;  %v866_v45 = vld [vmem:[%s865_s1] sm:$0x1]  ;;  %s883_s9 = scalar_lea.vmem %s3106_s2, %s2765_s16  ;;  %s1835_s6 = sld [smem:[#allocation4 + $0x62]] }
  0xde   :  { %1225 = vadd.xlane.f32.xlu0 %v1224_v43  ;;  %v868_v46 = vld [vmem:[%s867_s28] sm:$0x1]  ;;  %s885_s17 = scalar_lea.vmem %s3107_s3, %s1830_s23  ;;  %s1836_s12 = sld [smem:[#allocation5 + $0x62]] }
  0xdf   :  { %861 = vst.msk [vmem:[#allocation2 + $0x5c] sm:$0x1] %vm32_vm0, %v860_v44  ;;  %v869_v47 = vmul.f32 %v868_v46, %v866_v45  ;;  %v875_v48 = vld [vmem:[%s874_s24] sm:$0x1]  ;;  %s892_s5 = scalar_lea.vmem %s3106_s2, %s2775_s15  ;;  %s1837_s18 = sld [smem:[#allocation4 + $0x63]] }
  0xe0   :  { %v877_v49 = vld [vmem:[%s876_s22] sm:$0x1]  ;;  %s894_s8 = scalar_lea.vmem %s3107_s3, %s1832_s7  ;;  %s1838_s14 = sld [smem:[#allocation5 + $0x63]] }
  0xe1   :  { %870 = vst.msk [vmem:[#allocation2 + $0x5d] sm:$0x1] %vm32_vm0, %v869_v47  ;;  %v878_v50 = vmul.f32 %v877_v49, %v875_v48  ;;  %v884_v51 = vld [vmem:[%s883_s9] sm:$0x1]  ;;  %s901_s23 = scalar_lea.vmem %s3106_s2, %s1833_s30  ;;  %s1839_s10 = sld [smem:[#allocation4 + $0x64]] }
  0xe2   :  { %v886_v52 = vld [vmem:[%s885_s17] sm:$0x1]  ;;  %s903_s0 = scalar_lea.vmem %s3107_s3, %s1834_s29  ;;  %s1840_s19 = sld [smem:[#allocation5 + $0x64]] }
  0xe3   :  { %879 = vst.msk [vmem:[#allocation2 + $0x5e] sm:$0x1] %vm32_vm0, %v878_v50  ;;  %v887_v53 = vmul.f32 %v886_v52, %v884_v51  ;;  %v893_v54 = vld [vmem:[%s892_s5] sm:$0x1]  ;;  %s910_s7 = scalar_lea.vmem %s3106_s2, %s1835_s6  ;;  %s2816_s13 = sld [smem:[#allocation4 + $0x65]] }
  0xe4   :  { %v895_v55 = vld [vmem:[%s894_s8] sm:$0x1]  ;;  %s912_s27 = scalar_lea.vmem %s3107_s3, %s1836_s12  ;;  %s1842_s25 = sld [smem:[#allocation5 + $0x65]] }
  0xe5   :  { %888 = vst.msk [vmem:[#allocation2 + $0x5f] sm:$0x1] %vm32_vm0, %v887_v53  ;;  %v896_v56 = vmul.f32 %v895_v55, %v893_v54  ;;  %v902_v57 = vld [vmem:[%s901_s23] sm:$0x1]  ;;  %s919_s26 = scalar_lea.vmem %s3106_s2, %s1837_s18  ;;  %s2825_s11 = sld [smem:[#allocation4 + $0x66]] }
  0xe6   :  { %v904_v58 = vld [vmem:[%s903_s0] sm:$0x1]  ;;  %s921_s16 = scalar_lea.vmem %s3107_s3, %s1838_s14  ;;  %s1844_s1 = sld [smem:[#allocation5 + $0x66]] }
  0xe7   :  { %897 = vst.msk [vmem:[#allocation2 + $0x60] sm:$0x1] %vm32_vm0, %v896_v56  ;;  %v905_v59 = vmul.f32 %v904_v58, %v902_v57  ;;  %v911_v60 = vld [vmem:[%s910_s7] sm:$0x1]  ;;  %s928_s28 = scalar_lea.vmem %s3106_s2, %s1839_s10  ;;  %s2834_s20 = sld [smem:[#allocation4 + $0x67]] }
  0xe8   :  { %v913_v61 = vld [vmem:[%s912_s27] sm:$0x1]  ;;  %s930_s15 = scalar_lea.vmem %s3107_s3, %s1840_s19  ;;  %s1846_s24 = sld [smem:[#allocation5 + $0x67]] }
  0xe9   :  { %906 = vst.msk [vmem:[#allocation2 + $0x61] sm:$0x1] %vm32_vm0, %v905_v59  ;;  %v914_v62 = vmul.f32 %v913_v61, %v911_v60  ;;  %v920_v63 = vld [vmem:[%s919_s26] sm:$0x1]  ;;  %s937_s22 = scalar_lea.vmem %s3106_s2, %s2816_s13  ;;  %s2844_s21 = sld [smem:[#allocation4 + $0x68]] }
  0xea   :  { %v922_v0 = vld [vmem:[%s921_s16] sm:$0x1]  ;;  %s939_s19 = scalar_lea.vmem %s3107_s3, %s1842_s25  ;;  %s1848_s30 = sld [smem:[#allocation5 + $0x68]] }
  0xeb   :  { %915 = vst.msk [vmem:[#allocation2 + $0x62] sm:$0x1] %vm32_vm0, %v914_v62  ;;  %v923_v1 = vmul.f32 %v922_v0, %v920_v63  ;;  %v929_v2 = vld [vmem:[%s928_s28] sm:$0x1]  ;;  %s946_s13 = scalar_lea.vmem %s3106_s2, %s2825_s11  ;;  %s1849_s17 = sld [smem:[#allocation4 + $0x69]] }
  0xec   :  { %v1188_v3 = vld [vmem:[#allocation2 + $0x58] sm:$0xff]  ;;  %v931_v4 = vld [vmem:[%s930_s15] sm:$0x1]  ;;  %s948_s6 = scalar_lea.vmem %s3107_s3, %s1844_s1  ;;  %s1850_s5 = sld [smem:[#allocation5 + $0x69]] }
  0xed   :  { %v1227_v5 = vsel %vm1193_vm1, %v1188_v3, 0.0  ;;  %924 = vst.msk [vmem:[#allocation2 + $0x63] sm:$0x1] %vm32_vm0, %v923_v1  ;;  %v932_v6 = vmul.f32 %v931_v4, %v929_v2  ;;  %v938_v7 = vld [vmem:[%s937_s22] sm:$0x1]  ;;  %s955_s12 = scalar_lea.vmem %s3106_s2, %s2834_s20  ;;  %s1851_s8 = sld [smem:[#allocation4 + $0x6a]] }
  0xee   :  { %1228 = vadd.xlane.f32.xlu1 %v1227_v5  ;;  %v940_v8 = vld [vmem:[%s939_s19] sm:$0x1]  ;;  %s957_s18 = scalar_lea.vmem %s3107_s3, %s1846_s24  ;;  %s1852_s23 = sld [smem:[#allocation5 + $0x6a]] }
  0xef   :  { %933 = vst.msk [vmem:[#allocation2 + $0x64] sm:$0x1] %vm32_vm0, %v932_v6  ;;  %v941_v9 = vmul.f32 %v940_v8, %v938_v7  ;;  %v947_v10 = vld [vmem:[%s946_s13] sm:$0x1]  ;;  %s964_s1 = scalar_lea.vmem %s3106_s2, %s2844_s21  ;;  %s1853_s0 = sld [smem:[#allocation4 + $0x6b]] }
  0xf0   :  { %v949_v11 = vld [vmem:[%s948_s6] sm:$0x1]  ;;  %s966_s10 = scalar_lea.vmem %s3107_s3, %s1848_s30  ;;  %s1854_s7 = sld [smem:[#allocation5 + $0x6b]] }
  0xf1   :  { %942 = vst.msk [vmem:[#allocation2 + $0x65] sm:$0x1] %vm32_vm0, %v941_v9  ;;  %v950_v12 = vmul.f32 %v949_v11, %v947_v10  ;;  %v956_v13 = vld [vmem:[%s955_s12] sm:$0x1]  ;;  %s973_s24 = scalar_lea.vmem %s3106_s2, %s1849_s17  ;;  %s1855_s27 = sld [smem:[#allocation4 + $0x6c]] }
  0xf2   :  { %v958_v14 = vld [vmem:[%s957_s18] sm:$0x1]  ;;  %s975_s29 = scalar_lea.vmem %s3107_s3, %s1850_s5  ;;  %s1856_s26 = sld [smem:[#allocation5 + $0x6c]] }
  0xf3   :  { %951 = vst.msk [vmem:[#allocation2 + $0x66] sm:$0x1] %vm32_vm0, %v950_v12  ;;  %v959_v15 = vmul.f32 %v958_v14, %v956_v13  ;;  %v965_v16 = vld [vmem:[%s964_s1] sm:$0x1]  ;;  %s982_s30 = scalar_lea.vmem %s3106_s2, %s1851_s8  ;;  %s2885_s16 = sld [smem:[#allocation4 + $0x6d]] }
  0xf4   :  { %v967_v17 = vld [vmem:[%s966_s10] sm:$0x1]  ;;  %s984_s11 = scalar_lea.vmem %s3107_s3, %s1852_s23  ;;  %s1858_s28 = sld [smem:[#allocation5 + $0x6d]] }
  0xf5   :  { %960 = vst.msk [vmem:[#allocation2 + $0x67] sm:$0x1] %vm32_vm0, %v959_v15  ;;  %v968_v18 = vmul.f32 %v967_v17, %v965_v16  ;;  %v974_v19 = vld [vmem:[%s973_s24] sm:$0x1]  ;;  %s991_s15 = scalar_lea.vmem %s3106_s2, %s1853_s0  ;;  %s2894_s14 = sld [smem:[#allocation4 + $0x6e]] }
  0xf6   :  { %v976_v20 = vld [vmem:[%s975_s29] sm:$0x1]  ;;  %s993_s20 = scalar_lea.vmem %s3107_s3, %s1854_s7  ;;  %s1860_s22 = sld [smem:[#allocation5 + $0x6e]] }
  0xf7   :  { %969 = vst.msk [vmem:[#allocation2 + $0x68] sm:$0x1] %vm32_vm0, %v968_v18  ;;  %v977_v21 = vmul.f32 %v976_v20, %v974_v19  ;;  %v983_v22 = vld [vmem:[%s982_s30] sm:$0x1]  ;;  %s1000_s19 = scalar_lea.vmem %s3106_s2, %s1855_s27  ;;  %s2903_s9 = sld [smem:[#allocation4 + $0x6f]] }
  0xf8   :  { %v985_v23 = vld [vmem:[%s984_s11] sm:$0x1]  ;;  %s1002_s21 = scalar_lea.vmem %s3107_s3, %s1856_s26  ;;  %s1862_s13 = sld [smem:[#allocation5 + $0x6f]] }
  0xf9   :  { %978 = vst.msk [vmem:[#allocation2 + $0x69] sm:$0x1] %vm32_vm0, %v977_v21  ;;  %v986_v24 = vmul.f32 %v985_v23, %v983_v22  ;;  %v992_v25 = vld [vmem:[%s991_s15] sm:$0x1]  ;;  %s1009_s6 = scalar_lea.vmem %s3106_s2, %s2885_s16  ;;  %s2913_s25 = sld [smem:[#allocation4 + $0x70]] }
  0xfa   :  { %v994_v26 = vld [vmem:[%s993_s20] sm:$0x1]  ;;  %s1011_s26 = scalar_lea.vmem %s3107_s3, %s1858_s28  ;;  %s1864_s17 = sld [smem:[#allocation5 + $0x70]] }
  0xfb   :  { %987 = vst.msk [vmem:[#allocation2 + $0x6a] sm:$0x1] %vm32_vm0, %v986_v24  ;;  %v995_v27 = vmul.f32 %v994_v26, %v992_v25  ;;  %v1001_v28 = vld [vmem:[%s1000_s19] sm:$0x1]  ;;  %s1018_s16 = scalar_lea.vmem %s3106_s2, %s2894_s14  ;;  %s1865_s18 = sld [smem:[#allocation4 + $0x71]] }
  0xfc   :  { %v1189_v29 = vld [vmem:[#allocation2 + $0x60] sm:$0xff]  ;;  %s1020_s8 = scalar_lea.vmem %s3107_s3, %s1860_s22  ;;  %s1866_s1 = sld [smem:[#allocation5 + $0x71]] }
  0xfd   :  { %v1003_v30 = vld [vmem:[%s1002_s21] sm:$0x1]  ;;  %v1230_v31 = vsel %vm1193_vm1, %v1189_v29, 0.0  ;;  %996 = vst.msk [vmem:[#allocation2 + $0x6b] sm:$0x1] %vm32_vm0, %v995_v27  ;;  %s1027_s23 = scalar_lea.vmem %s3106_s2, %s2903_s9  ;;  %s1867_s10 = sld [smem:[#allocation4 + $0x72]] }
  0xfe   :  { %v1004_v32 = vmul.f32 %v1003_v30, %v1001_v28  ;;  %v1010_v33 = vld [vmem:[%s1009_s6] sm:$0x1]  ;;  %1231 = vadd.xlane.f32.xlu0 %v1230_v31  ;;  %s1029_s0 = scalar_lea.vmem %s3107_s3, %s1862_s13  ;;  %s1868_s24 = sld [smem:[#allocation5 + $0x72]] }
  0xff   :  { %v1012_v34 = vld [vmem:[%s1011_s26] sm:$0x1]  ;;  %s1036_s22 = scalar_lea.vmem %s3106_s2, %s2913_s25  ;;  %s1869_s29 = sld [smem:[#allocation4 + $0x73]] }
 0x100   :  { %1005 = vst.msk [vmem:[#allocation2 + $0x6c] sm:$0x1] %vm32_vm0, %v1004_v32  ;;  %v1013_v35 = vmul.f32 %v1012_v34, %v1010_v33  ;;  %v1019_v36 = vld [vmem:[%s1018_s16] sm:$0x1]  ;;  %s1038_s27 = scalar_lea.vmem %s3107_s3, %s1864_s17  ;;  %s1870_s30 = sld [smem:[#allocation5 + $0x73]]  ;;  %v1196_v32 = vpop.xlane.xlu0 %1195  ;;  %v1258_v33 = vlaneseq  ;;  %v1202_v34 = vpop.xlane.xlu1 %1201 }
 0x101   :  { %v1021_v37 = vld [vmem:[%s1020_s8] sm:$0x1]  ;;  %s1045_s13 = scalar_lea.vmem %s3106_s2, %s1865_s18  ;;  %s1871_s11 = sld [smem:[#allocation4 + $0x74]] }
 0x102   :  { %1014 = vst.msk [vmem:[#allocation2 + $0x6d] sm:$0x1] %vm32_vm0, %v1013_v35  ;;  %v1022_v38 = vmul.f32 %v1021_v37, %v1019_v36  ;;  %v1028_v39 = vld [vmem:[%s1027_s23] sm:$0x1]  ;;  %s1047_s5 = scalar_lea.vmem %s3107_s3, %s1866_s1  ;;  %s1872_s15 = sld [smem:[#allocation5 + $0x74]]  ;;  %v3066_v35 = vand.u32 127, %v1258_v33 }
 0x103   :  { %v1030_v40 = vld [vmem:[%s1029_s0] sm:$0x1]  ;;  %s1054_s17 = scalar_lea.vmem %s3106_s2, %s1867_s10  ;;  %s2954_s20 = sld [smem:[#allocation4 + $0x75]] }
 0x104   :  { %1023 = vst.msk [vmem:[#allocation2 + $0x6e] sm:$0x1] %vm32_vm0, %v1022_v38  ;;  %v1031_v41 = vmul.f32 %v1030_v40, %v1028_v39  ;;  %v1037_v42 = vld [vmem:[%s1036_s22] sm:$0x1]  ;;  %s1056_s14 = scalar_lea.vmem %s3107_s3, %s1868_s24  ;;  %s1874_s19 = sld [smem:[#allocation5 + $0x75]]  ;;  %v1199_v36 = vpop.xlane.xlu0 %1198  ;;  %v1264_v37 = vadd.s32 4294967288, %v3066_v35  ;;  %v1205_v39 = vpop.xlane.xlu1 %1204 }
 0x105   :  { %v1039_v43 = vld [vmem:[%s1038_s27] sm:$0x1]  ;;  %s1063_s21 = scalar_lea.vmem %s3106_s2, %s1869_s29  ;;  %s2963_s7 = sld [smem:[#allocation4 + $0x76]]  ;;  %v3069_v38 = vshrl.u32 %v1258_v33, 7 }
 0x106   :  { %1032 = vst.msk [vmem:[#allocation2 + $0x6f] sm:$0x1] %vm32_vm0, %v1031_v41  ;;  %v1040_v44 = vmul.f32 %v1039_v43, %v1037_v42  ;;  %v1046_v45 = vld [vmem:[%s1045_s13] sm:$0x1]  ;;  %s1065_s9 = scalar_lea.vmem %s3107_s3, %s1870_s30  ;;  %s1876_s6 = sld [smem:[#allocation5 + $0x76]]  ;;  %v1271_v42 = vadd.s32 4294967280, %v3066_v35 }
 0x107   :  { %v1048_v46 = vld [vmem:[%s1047_s5] sm:$0x1]  ;;  %s1072_s26 = scalar_lea.vmem %s3106_s2, %s1871_s11  ;;  %s2972_s12 = sld [smem:[#allocation4 + $0x77]]  ;;  %v1267_v40 = vsub.s32 %v1264_v37, %v3069_v38  ;;  %v1262_v43 = vsub.s32 %v3066_v35, %v3069_v38 }
 0x108   :  { %1041 = vst.msk [vmem:[#allocation2 + $0x70] sm:$0x1] %vm32_vm0, %v1040_v44  ;;  %v1049_v47 = vmul.f32 %v1048_v46, %v1046_v45  ;;  %v1055_v48 = vld [vmem:[%s1054_s17] sm:$0x1]  ;;  %s1074_s25 = scalar_lea.vmem %s3107_s3, %s1872_s15  ;;  %s1878_s16 = sld [smem:[#allocation5 + $0x77]]  ;;  %v1208_v41 = vpop.xlane.xlu0 %1207  ;;  %v1278_v44 = vadd.s32 4294967272, %v3066_v35  ;;  %v1274_v46 = vsub.s32 %v1271_v42, %v3069_v38 }
 0x109   :  { %v1057_v49 = vld [vmem:[%s1056_s14] sm:$0x1]  ;;  %s1081_s8 = scalar_lea.vmem %s3106_s2, %s2954_s20  ;;  %s2982_s28 = sld [smem:[#allocation4 + $0x78]]  ;;  %v1268_v45 = vrot.slane %v1199_v36, %v1267_v40  ;;  %v1362_v40 = vadd.s32 4294967176, %v3066_v35 }
 0x10a   :  { %1050 = vst.msk [vmem:[#allocation2 + $0x71] sm:$0x1] %vm32_vm0, %v1049_v47  ;;  %v1058_v50 = vmul.f32 %v1057_v49, %v1055_v48  ;;  %v1064_v51 = vld [vmem:[%s1063_s21] sm:$0x1]  ;;  %s1083_s15 = scalar_lea.vmem %s3107_s3, %s1874_s19  ;;  %s1880_s18 = sld [smem:[#allocation5 + $0x78]]  ;;  %v1285_v47 = vadd.s32 4294967264, %v3066_v35  ;;  %v1263_v49 = vrot.slane %v1196_v32, %v1262_v43 }
 0x10b   :  { %v1066_v52 = vld [vmem:[%s1065_s9] sm:$0x1]  ;;  %s1090_s20 = scalar_lea.vmem %s3106_s2, %s2963_s7  ;;  %s1881_s0 = sld [smem:[#allocation4 + $0x79]] }
 0x10c   :  { %1059 = vst.msk [vmem:[#allocation2 + $0x72] sm:$0x1] %vm32_vm0, %v1058_v50  ;;  %v1067_v53 = vmul.f32 %v1066_v52, %v1064_v51  ;;  %v1073_v54 = vld [vmem:[%s1072_s26] sm:$0x1]  ;;  %s1092_s10 = scalar_lea.vmem %s3107_s3, %s1876_s6  ;;  %s1882_s22 = sld [smem:[#allocation5 + $0x79]]  ;;  %v1281_v50 = vsub.s32 %v1278_v44, %v3069_v38  ;;  %v1270_v52 = vsel %vm1269_vm2, %v1268_v45, %v1263_v49  ;;  %v1365_v45 = vsub.s32 %v1362_v40, %v3069_v38 }
 0x10d   :  { %v1190_v55 = vld [vmem:[#allocation2 + $0x68] sm:$0xff]  ;;  %v1075_v56 = vld [vmem:[%s1074_s25] sm:$0x1]  ;;  %s1099_s24 = scalar_lea.vmem %s3106_s2, %s2972_s12  ;;  %s1883_s27 = sld [smem:[#allocation4 + $0x7a]] }
 0x10e   :  { %v1233_v57 = vsel %vm1193_vm1, %v1190_v55, 0.0  ;;  %1068 = vst.msk [vmem:[#allocation2 + $0x73] sm:$0x1] %vm32_vm0, %v1067_v53  ;;  %v1076_v58 = vmul.f32 %v1075_v56, %v1073_v54  ;;  %v1082_v59 = vld [vmem:[%s1081_s8] sm:$0x1]  ;;  %s1101_s29 = scalar_lea.vmem %s3107_s3, %s1878_s16  ;;  %s1884_s13 = sld [smem:[#allocation5 + $0x7a]]  ;;  %v1275_v54 = vrot.slane %v1202_v34, %v1274_v46  ;;  %v1288_v55 = vsub.s32 %v1285_v47, %v3069_v38 }
 0x10f   :  { %1234 = vadd.xlane.f32.xlu1 %v1233_v57  ;;  %v1084_v60 = vld [vmem:[%s1083_s15] sm:$0x1]  ;;  %s1108_s6 = scalar_lea.vmem %s3106_s2, %s2982_s28  ;;  %s1885_s5 = sld [smem:[#allocation4 + $0x7b]]  ;;  %v1292_v53 = vadd.s32 4294967256, %v3066_v35  ;;  %v1299_v56 = vadd.s32 4294967248, %v3066_v35  ;;  %v1282_v57 = vrot.slane %v1205_v39, %v1281_v50 }
 0x110   :  { %1077 = vst.msk [vmem:[#allocation2 + $0x74] sm:$0x1] %vm32_vm0, %v1076_v58  ;;  %v1085_v61 = vmul.f32 %v1084_v60, %v1082_v59  ;;  %v1091_v62 = vld [vmem:[%s1090_s20] sm:$0x1]  ;;  %s1110_s11 = scalar_lea.vmem %s3107_s3, %s1880_s18  ;;  %s1886_s17 = sld [smem:[#allocation5 + $0x7b]]  ;;  %v1277_v58 = vsel %vm1276_vm3, %v1275_v54, %v1270_v52 }
 0x111   :  { %v1093_v63 = vld [vmem:[%s1092_s10] sm:$0x1]  ;;  %s1117_s16 = scalar_lea.vmem %s3106_s2, %s1881_s0  ;;  %s1887_s14 = sld [smem:[#allocation4 + $0x7c]]  ;;  %v1295_v60 = vsub.s32 %v1292_v53, %v3069_v38 }
 0x112   :  { %1086 = vst.msk [vmem:[#allocation2 + $0x75] sm:$0x1] %vm32_vm0, %v1085_v61  ;;  %v1094_v0 = vmul.f32 %v1093_v63, %v1091_v62  ;;  %v1100_v1 = vld [vmem:[%s1099_s24] sm:$0x1]  ;;  %s1119_s1 = scalar_lea.vmem %s3107_s3, %s1882_s22  ;;  %s1888_s21 = sld [smem:[#allocation5 + $0x7c]]  ;;  %v1306_v61 = vadd.s32 4294967240, %v3066_v35  ;;  %v1289_v63 = vrot.slane %v1208_v41, %v1288_v55 }
 0x113   :  { %v1102_v2 = vld [vmem:[%s1101_s29] sm:$0x1]  ;;  %s1126_s18 = scalar_lea.vmem %s3106_s2, %s1883_s27  ;;  %s1889_s9 = sld [smem:[#allocation4 + $0x7d]] }
 0x114   :  { %1095 = vst.msk [vmem:[#allocation2 + $0x76] sm:$0x1] %vm32_vm0, %v1094_v0  ;;  %v1103_v3 = vmul.f32 %v1102_v2, %v1100_v1  ;;  %v1109_v4 = vld [vmem:[%s1108_s6] sm:$0x1]  ;;  %s1128_s7 = scalar_lea.vmem %s3107_s3, %s1884_s13  ;;  %s1890_s26 = sld [smem:[#allocation5 + $0x7d]]  ;;  %v1302_v0 = vsub.s32 %v1299_v56, %v3069_v38  ;;  %v1313_v1 = vadd.s32 4294967232, %v3066_v35  ;;  %v1284_v2 = vsel %vm1283_vm4, %v1282_v57, %v1277_v58 }
 0x115   :  { %v1111_v5 = vld [vmem:[%s1110_s11] sm:$0x1]  ;;  %s1135_s22 = scalar_lea.vmem %s3106_s2, %s1885_s5  ;;  %s1891_s30 = sld [smem:[#allocation4 + $0x7e]] }
 0x116   :  { %1104 = vst.msk [vmem:[#allocation2 + $0x77] sm:$0x1] %vm32_vm0, %v1103_v3  ;;  %v1112_v6 = vmul.f32 %v1111_v5, %v1109_v4  ;;  %v1118_v7 = vld [vmem:[%s1117_s16] sm:$0x1]  ;;  %s1137_s12 = scalar_lea.vmem %s3107_s3, %s1886_s17  ;;  %s1892_s8 = sld [smem:[#allocation5 + $0x7e]]  ;;  %v1211_v48 = vpop.xlane.xlu1 %1210  ;;  %v1309_v4 = vsub.s32 %v1306_v61, %v3069_v38  ;;  %v1320_v5 = vadd.s32 4294967224, %v3066_v35 }
 0x117   :  { %v1120_v8 = vld [vmem:[%s1119_s1] sm:$0x1]  ;;  %s1144_s13 = scalar_lea.vmem %s3106_s2, %s1887_s14  ;;  %s1893_s23 = sld [smem:[#allocation4 + $0x7f]]  ;;  %v1296_v3 = vrot.slane %v1211_v48, %v1295_v60 }
 0x118   :  { %1113 = vst.msk [vmem:[#allocation2 + $0x78] sm:$0x1] %vm32_vm0, %v1112_v6  ;;  %v1121_v9 = vmul.f32 %v1120_v8, %v1118_v7  ;;  %v1127_v10 = vld [vmem:[%s1126_s18] sm:$0x1]  ;;  %s1146_s28 = scalar_lea.vmem %s3107_s3, %s1888_s21  ;;  %s1894_s20 = sld [smem:[#allocation5 + $0x7f]]  ;;  %v1291_v6 = vsel %vm1290_vm5, %v1289_v63, %v1284_v2  ;;  %v1316_v8 = vsub.s32 %v1313_v1, %v3069_v38 }
 0x119   :  { %v1129_v11 = vld [vmem:[%s1128_s7] sm:$0x1]  ;;  %s1153_s10 = scalar_lea.vmem %s3106_s2, %s1889_s9 }
 0x11a   :  { %1122 = vst.msk [vmem:[#allocation2 + $0x79] sm:$0x1] %vm32_vm0, %v1121_v9  ;;  %v1130_v12 = vmul.f32 %v1129_v11, %v1127_v10  ;;  %v1136_v13 = vld [vmem:[%s1135_s22] sm:$0x1]  ;;  %s1155_s18 = scalar_lea.vmem %s3107_s3, %s1890_s26  ;;  %v1327_v10 = vadd.s32 4294967216, %v3066_v35 }
 0x11b   :  { %v1138_v14 = vld [vmem:[%s1137_s12] sm:$0x1]  ;;  %s1162_s24 = scalar_lea.vmem %s3106_s2, %s1891_s30 }
 0x11c   :  { %1131 = vst.msk [vmem:[#allocation2 + $0x7a] sm:$0x1] %vm32_vm0, %v1130_v12  ;;  %v1139_v15 = vmul.f32 %v1138_v14, %v1136_v13  ;;  %v1145_v16 = vld [vmem:[%s1144_s13] sm:$0x1]  ;;  %s1164_s29 = scalar_lea.vmem %s3107_s3, %s1892_s8  ;;  %v1298_v12 = vsel %vm1297_vm6, %v1296_v3, %v1291_v6  ;;  %v1323_v14 = vsub.s32 %v1320_v5, %v3069_v38 }
 0x11d   :  { %v1191_v17 = vld [vmem:[#allocation2 + $0x70] sm:$0xff]  ;;  %v1147_v18 = vld [vmem:[%s1146_s28] sm:$0x1]  ;;  %s1171_s27 = scalar_lea.vmem %s3106_s2, %s1893_s23  ;;  %s1948_s2 = smov [#allocation6]  }
 0x11e   :  { %v1236_v19 = vsel %vm1193_vm1, %v1191_v17, 0.0  ;;  %1140 = vst.msk [vmem:[#allocation2 + $0x7b] sm:$0x1] %vm32_vm0, %v1139_v15  ;;  %v1148_v20 = vmul.f32 %v1147_v18, %v1145_v16  ;;  %v1154_v21 = vld [vmem:[%s1153_s10] sm:$0x1]  ;;  %s1173_s30 = scalar_lea.vmem %s3107_s3, %s1894_s20  ;;  %v1334_v15 = vadd.s32 4294967208, %v3066_v35  ;;  %v1330_v18 = vsub.s32 %v1327_v10, %v3069_v38 }
 0x11f   :  { %1237 = vadd.xlane.f32.xlu0 %v1236_v19  ;;  %v1156_v22 = vld [vmem:[%s1155_s18] sm:$0x1]  ;;  %v1341_v19 = vadd.s32 4294967200, %v3066_v35  ;;  %s1377_s3 = sshll.u32 %s1948_s2, 4  ;;  %s1378_s3 = int_to_ptr.vmem [resolvable:$true] %s1377_s3 }
 0x120   :  { %1149 = vst.msk [vmem:[#allocation2 + $0x7c] sm:$0x1] %vm32_vm0, %v1148_v20  ;;  %v1157_v23 = vmul.f32 %v1156_v22, %v1154_v21  ;;  %v1163_v24 = vld [vmem:[%s1162_s24] sm:$0x1]  ;;  %s1922_s12 = scalar_lea.vmem %s1378_s3, 16  ;;  %s1926_s8 = scalar_lea.vmem %s1378_s3, 32 }
 0x121   :  { %v1165_v25 = vld [vmem:[%s1164_s29] sm:$0x1]  ;;  %p1923_p10 = scmp.ne.s32.totalorder %s1378_s3, %s1922_s12  ;;  %p1927_p11 = scmp.lt.s32.totalorder %s1378_s3, %s1378_s3 }
 0x122   :  { %1158 = vst.msk [vmem:[#allocation2 + $0x7d] sm:$0x1] %vm32_vm0, %v1157_v23  ;;  %v1166_v26 = vmul.f32 %v1165_v25, %v1163_v24  ;;  %v1172_v27 = vld [vmem:[%s1171_s27] sm:$0x1]  ;;  %v1337_v23 = vsub.s32 %v1334_v15, %v3069_v38  ;;  %v1348_v25 = vadd.s32 4294967192, %v3066_v35  ;;  %p1928_p12 = scmp.lt.s32.totalorder %s1926_s8, %s1922_s12 }
 0x123   :  { %v1174_v28 = vld [vmem:[%s1173_s30] sm:$0x1] }
 0x124   :  { %1167 = vst.msk [vmem:[#allocation2 + $0x7e] sm:$0x1] %vm32_vm0, %v1166_v26  ;;  %v1175_v29 = vmul.f32 %v1174_v28, %v1172_v27  ;;  %v1344_v28 = vsub.s32 %v1341_v19, %v3069_v38  ;;  %v1351_v32 = vsub.s32 %v1348_v25, %v3069_v38  ;;  %p1929_p13 = por %p1928_p12, %p1927_p11 }
 0x126   :  { %1176 = vst.msk [vmem:[#allocation2 + $0x7f] sm:$0x1] %vm32_vm0, %v1175_v29  ;;  %v1214_v51 = vpop.xlane.xlu0 %1213  ;;  %v1355_v29 = vadd.s32 4294967184, %v3066_v35  ;;  %vm1367_vm0 = vcmask 1048512   ;;  %p1930_p0 = pnand %p1929_p13, %p1923_p10 }
 0x127   :  { %v1303_v7 = vrot.slane %v1214_v51, %v1302_v0 }
 0x128   :  { %v1358_v37 = vsub.s32 %v1355_v29, %v3069_v38 }
 0x129   :  { %v1305_v16 = vsel %vm1304_vm7, %v1303_v7, %v1298_v12 }
 0x12d   :  { %v1192_v30 = vld [vmem:[#allocation2 + $0x78] sm:$0xff] }
 0x12e   :  { %v1239_v31 = vsel %vm1193_vm1, %v1192_v30, 0.0 }
 0x12f   :  { %1240 = vadd.xlane.f32.xlu1 %v1239_v31 }
 0x136   :  { %v1217_v59 = vpop.xlane.xlu1 %1216 }
 0x137   :  { %v1310_v13 = vrot.slane %v1217_v59, %v1309_v4 }
 0x139   :  { %v1312_v21 = vsel %vm1311_vm8, %v1310_v13, %v1305_v16 }
 0x146   :  { %v1220_v62 = vpop.xlane.xlu0 %1219 }
 0x147   :  { %v1317_v17 = vrot.slane %v1220_v62, %v1316_v8 }
 0x149   :  { %v1319_v26 = vsel %vm1318_vm9, %v1317_v17, %v1312_v21 }
 0x157   :  { %v1223_v9 = vpop.xlane.xlu1 %1222 }
 0x158   :  { %v1324_v22 = vrot.slane %v1223_v9, %v1323_v14 }
 0x15a   :  { %v1326_v30 = vsel %vm1325_vm10, %v1324_v22, %v1319_v26 }
 0x167   :  { %v1226_v11 = vpop.xlane.xlu0 %1225 }
 0x168   :  { %v1331_v27 = vrot.slane %v1226_v11, %v1330_v18 }
 0x16a   :  { %v1333_v33 = vsel %vm1332_vm11, %v1331_v27, %v1326_v30 }
 0x177   :  { %v1229_v20 = vpop.xlane.xlu1 %1228 }
 0x178   :  { %v1338_v31 = vrot.slane %v1229_v20, %v1337_v23 }
 0x17a   :  { %v1340_v41 = vsel %vm1339_vm12, %v1338_v31, %v1333_v33 }
 0x187   :  { %v1232_v24 = vpop.xlane.xlu0 %1231 }
 0x188   :  { %v1345_v34 = vrot.slane %v1232_v24, %v1344_v28 }
 0x18a   :  { %v1347_v43 = vsel %vm1346_vm13, %v1345_v34, %v1340_v41 }
 0x198   :  { %v1235_v36 = vpop.xlane.xlu1 %1234 }
 0x199   :  { %v1352_v42 = vrot.slane %v1235_v36, %v1351_v32 }
 0x19b   :  { %v1354_v46 = vsel %vm1353_vm14, %v1352_v42, %v1347_v43 }
 0x1a8   :  { %v1238_v39 = vpop.xlane.xlu0 %1237 }
 0x1a9   :  { %v1359_v44 = vrot.slane %v1238_v39, %v1358_v37 }
 0x1ab   :  { %v1361_v48 = vsel %vm1360_vm15, %v1359_v44, %v1354_v46 }
 0x1b8   :  { %v1241_v47 = vpop.xlane.xlu1 %1240 }
 0x1b9   :  { %v1366_v49 = vrot.slane %v1241_v47, %v1365_v45 }
 0x1bb   :  { %v1368_v50 = vsel %vm1367_vm0, %v1366_v49, %v1361_v48 }
 0x1bc   :  { %1370 = vst [vmem:[#allocation6] sm:$0x1] %v1368_v50 }
 0x1bd   :  { %1933 = shalt.err (!%p1930_p0)
}
 0x1be   :  { %1380 = dma.vmem_to_hbm [thread:$0]  %s1378_s3, 16, %s3108_s4, [#allocation7]  }
 0x1bf   :  { %1944 = dma.done.wait [#allocation7], 16  }
 0x1c0   :  { %1945 = vsyncadd [#allocation7], 4294967280 }
 0x1c1   :  { %1384 = vsyncpa [#allocation7], 1 }

</bundles_post_ra>
